<compile_context>
chip_gen: v6e
topology: v6e:2x2x1
jax: 0.10.0
libtpu: 0.0.40
codegen_flags: <defaults>
</compile_context>

<pallas_src>
import functools

import numpy as np
import jax
import jax.numpy as jnp
from jax.experimental import pallas as pl
from jax.experimental.pallas import tpu as pltpu


def _vmem_limit_bytes():
    # Generation-aware scoped-VMEM budget: ~75% of physical VMEM (96 MiB on
    # v5e/v6e, 48 MiB on v7x), falling back to 48 MiB if the query fails.
    try:
        return int(0.75 * pltpu.get_tpu_info().vmem_capacity_bytes)
    except Exception:
        return 48 * 1024 * 1024


_VMEM_LIMIT = _vmem_limit_bytes()


def _round_up(x, m):
    return (x + m - 1) // m * m


# ----------------------------------------------------------------------------
# Kernel 1: dense matmul + shift + activation.
# First layer: ConvTranspose2d(k=4, s=1, p=0) on a 1x1 input is exactly
# x(B,Cin) @ W(Cin, 16*Cout), reshaped to (B, 4, 4, Cout).
# ----------------------------------------------------------------------------
def _matmul_shift_act_kernel(x_ref, w_ref, shift_ref, o_ref, *, act):
    y = jnp.dot(x_ref[...], w_ref[...], preferred_element_type=jnp.float32)
    y = y + shift_ref[...]
    if act == "relu":
        y = jnp.maximum(y, 0.0)
    elif act == "tanh":
        y = jnp.tanh(y)
    o_ref[...] = y.astype(o_ref.dtype)


def _dense_matmul_shift_act(x2, w2, shift2, act, out_dtype):
    B, K = x2.shape
    N = w2.shape[1]
    return pl.pallas_call(
        functools.partial(_matmul_shift_act_kernel, act=act),
        out_shape=jax.ShapeDtypeStruct((B, N), out_dtype),
        grid=(1,),
        in_specs=[
            pl.BlockSpec((B, K), lambda i: (0, 0)),
            pl.BlockSpec((K, N), lambda i: (0, 0)),
            pl.BlockSpec((1, N), lambda i: (0, 0)),
        ],
        out_specs=pl.BlockSpec((B, N), lambda i: (0, 0)),
        compiler_params=pltpu.CompilerParams(
            dimension_semantics=("arbitrary",),
            vmem_limit_bytes=_VMEM_LIMIT),
    )(x2, w2, shift2)


# ----------------------------------------------------------------------------
# Kernel 2: ConvTranspose2d(k=4, s=2, p=1) via sub-pixel (parity) decomposition,
# fused with BN shift (scale pre-folded into the weights) and ReLU / Tanh.
#
#   y[b, 2m+rh, 2n+rw, co] =
#     sum_{dh,dw in {0,1}, ci} x_pad[b, m+rh+dh, n+rw+dw, ci]
#                              * W[ci, co, 3-rh-2*dh, 3-rw-2*dw]
#
# The 4 taps of each parity are pre-concatenated along Cin (K = 4*Cin), so each
# parity is a single (M, 4*Cin) @ (4*Cin, Cp) matmul with M = bt*H*W.  The
# output block (bt, H, 2, W, 2*Cp) row-major-reshapes to (B, 2H, 2W, Cp), i.e.
# the pixel shuffle costs nothing in the wrapper.
# ----------------------------------------------------------------------------
def _subpixel_convt_kernel(x_ref, w_ref, shift_ref, o_ref, *, act):
    # x_ref:     (bt, H+2, W+2, Cin)  bf16   spatially padded input tile
    # w_ref:     (4, 4*Cin, Cp)       bf16   per-parity K-concatenated taps
    # shift_ref: (1, 2*Cp)            f32    BN shift tiled for both col parities
    # o_ref:     (bt, H, 2, W, 2*Cp)         parity-packed (pixel-shuffle-ready)
    bt, hp2, wp2, cin = x_ref.shape
    H, W = hp2 - 2, wp2 - 2
    cp = w_ref.shape[-1]
    M = bt * H * W

    # 9 unique shifted windows, each materialized once (was 16).
    wins = [[x_ref[:, u:u + H, v:v + W, :].reshape(M, cin) for v in range(3)]
            for u in range(3)]

    for rh in range(2):                       # output row parity
        parts = []
        for rw in range(2):                   # output column parity
            # K-concatenate this parity's 4 taps -> one wide matmul (K = 4*Cin).
            lhs = jnp.concatenate(
                [wins[rh][rw], wins[rh][rw + 1],
                 wins[rh + 1][rw], wins[rh + 1][rw + 1]], axis=-1)
            parts.append(jnp.dot(lhs, w_ref[2 * rh + rw],
                                 preferred_element_type=jnp.float32))
        y = jnp.concatenate(parts, axis=-1) + shift_ref[...]   # (M, 2*Cp) f32
        if act == "relu":
            y = jnp.maximum(y, 0.0)
        elif act == "tanh":
            y = jnp.tanh(y)
        # Full-lane-width (2*Cp is a multiple of 128) store for one row parity.
        o_ref[:, :, rh:rh + 1, :, :] = (
            y.reshape(bt, H, 1, W, 2 * cp).astype(o_ref.dtype))


def _pick_batch_tile(B, H, W, cin, cp):
    """Largest divisor of B whose per-step blocks + temporaries fit VMEM."""
    budget = int(0.55 * _VMEM_LIMIT)
    w_bytes = 2 * (4 * 4 * cin * cp * 2)                 # weights (double-buffered)
    for bt in range(B, 0, -1):
        if B % bt:
            continue
        xin = (H + 2) * (W + 2) * cin * 2                # padded input block (bf16)
        xout = H * W * 4 * cp * 2                        # parity-packed output block
        tmp = H * W * (cin * 2 * (9 + 4) + 2 * cp * 4 * 3)   # windows/LHS/f32 epi
        if w_bytes + bt * (2 * (xin + xout) + tmp) <= budget:
            return bt
    return 1


def _convt_s2_block(x_nhwc, w_packed, shift2, act, out_dtype):
    B, H, W, Cin = x_nhwc.shape
    Cp = w_packed.shape[-1]
    assert w_packed.shape[1] == 4 * Cin
    # TODO(synk): the +1 spatial zero-pad is still one small XLA copy between
    # layers; fully fusing it in-kernel (masked boundary windows) is left out
    # to keep the lowering to proven offset-read / full-block-store patterns.
    xp = jnp.pad(x_nhwc, ((0, 0), (1, 1), (1, 1), (0, 0)))
    bt = _pick_batch_tile(B, H, W, Cin, Cp)

    out = pl.pallas_call(
        functools.partial(_subpixel_convt_kernel, act=act),
        out_shape=jax.ShapeDtypeStruct((B, H, 2, W, 2 * Cp), out_dtype),
        grid=(B // bt,),
        in_specs=[
            pl.BlockSpec((bt, H + 2, W + 2, Cin), lambda i: (i, 0, 0, 0)),
            # TODO(synk): for very large generator configs, stream the weights
            # with an inner Cin-reduction grid axis instead of keeping the full
            # (4, 4*Cin, Cp) block resident (v7x 64 MiB VMEM).
            pl.BlockSpec((4, 4 * Cin, Cp), lambda i: (0, 0, 0)),
            pl.BlockSpec((1, 2 * Cp), lambda i: (0, 0)),
        ],
        out_specs=pl.BlockSpec((bt, H, 2, W, 2 * Cp),
                               lambda i: (i, 0, 0, 0, 0)),
        compiler_params=pltpu.CompilerParams(
            dimension_semantics=("parallel",),
            vmem_limit_bytes=_VMEM_LIMIT),
    )(xp, w_packed, shift2)

    # Pixel shuffle is a pure (free) row-major reshape of the packed layout.
    return out.reshape(B, 2 * H, 2 * W, Cp)


# ----------------------------------------------------------------------------
# Parameters: mirrors Generator_DCGAN._make_generator, then packs once.
# ----------------------------------------------------------------------------
def init_params(key, in_noise, output_size, out_ch):
    features = 2 ** int(np.log2(output_size) / 2) * output_size
    specs = [(in_noise, features, 1, 0, True)]           # k4 s1 p0 + BN + ReLU
    out_size, feat = 4, features
    while out_size < int(output_size / 2):
        specs.append((feat, feat // 2, 2, 1, True))       # k4 s2 p1 + BN + ReLU
        feat //= 2
        out_size *= 2
    specs.append((feat, out_ch, 2, 1, False))             # final k4 s2 p1 + Tanh

    params = []
    for (ci, co, s, p, has_bn) in specs:
        key, sub = jax.random.split(key)
        w = 0.02 * jax.random.normal(sub, (ci, co, 4, 4), jnp.float32)
        bn = None
        if has_bn:
            bn = dict(gamma=jnp.ones((co,), jnp.float32),
                      beta=jnp.zeros((co,), jnp.float32),
                      mean=jnp.zeros((co,), jnp.float32),
                      var=jnp.ones((co,), jnp.float32))
        params.append(dict(w=w, stride=s, pad=p, bn=bn))
    return params


def prepare_params(params):
    """One-time packing: BN fold, parity/tap K-concat, channel pad, bf16 cast."""
    packed = []
    prev_phys_out = None
    for layer in params:
        w = layer["w"]                           # (Cin, Cout, 4, 4)
        ci, co = w.shape[0], w.shape[1]
        bn = layer["bn"]
        if bn is not None:
            eps = 1e-5
            scale = bn["gamma"] * jax.lax.rsqrt(bn["var"] + eps)
            shift = bn["beta"] - bn["mean"] * scale
            act = "relu"
        else:
            scale = jnp.ones((co,), jnp.float32)
            shift = jnp.zeros((co,), jnp.float32)
            act = "tanh"

        if layer["stride"] == 1:
            # First layer (1x1 input): pure matmul to a 4x4 output.
            wf = jnp.transpose(w, (0, 2, 3, 1)).reshape(ci, 16 * co)
            wf = wf * jnp.tile(scale, 16)[None, :]
            packed.append(dict(kind="dense1x1",
                               w=wf.astype(jnp.bfloat16),
                               shift=jnp.tile(shift, 16).reshape(1, 16 * co),
                               cout=co, act=act))
            prev_phys_out = co
        else:
            cin_p = prev_phys_out                # physical (possibly padded) Cin
            cp = _round_up(co, 64)               # 2*cp is a multiple of 128
            ws = w * scale[None, :, None, None]  # fold BN scale once
            ws = jnp.pad(ws, ((0, cin_p - ci), (0, cp - co), (0, 0), (0, 0)))
            blocks = []
            for r in range(4):                   # output parity (rh, rw)
                rh, rw = r // 2, r % 2
                taps = []
                for t in range(4):               # effective 2x2 tap (dh, dw)
                    dh, dw = t // 2, t % 2
                    taps.append(ws[:, :, 3 - rh - 2 * dh, 3 - rw - 2 * dw])
                blocks.append(jnp.concatenate(taps, axis=0))    # (4*cin_p, cp)
            w_pack = jnp.stack(blocks, axis=0)                  # (4, 4*cin_p, cp)
            shift_p = jnp.pad(shift, (0, cp - co))
            packed.append(dict(kind="subpixel",
                               w=w_pack.astype(jnp.bfloat16),
                               shift=jnp.tile(shift_p, 2).reshape(1, 2 * cp),
                               cout=co, cout_p=cp, act=act))
            prev_phys_out = cp
    return packed


def generator_dcgan_forward(x_nchw, packed):
    # x_nchw: (B, in_noise, 1, 1) like PyTorch; returns (B, out_ch, S, S) NCHW f32.
    B = x_nchw.shape[0]
    x = None
    for layer in packed:
        if layer["kind"] == "dense1x1":
            x2 = x_nchw[:, :, 0, 0].astype(jnp.bfloat16)          # (B, Cin)
            y = _dense_matmul_shift_act(x2, layer["w"], layer["shift"],
                                        layer["act"], jnp.bfloat16)
            x = y.reshape(B, 4, 4, layer["cout"])
        else:
            x = _convt_s2_block(x, layer["w"], layer["shift"], layer["act"],
                                jnp.bfloat16)
    out_ch = packed[-1]["cout"]
    y = x[..., :out_ch].astype(jnp.float32)        # drop lane padding, back to f32
    return jnp.transpose(y, (0, 3, 1, 2))          # NHWC -> NCHW


if __name__ == "__main__":
    B, in_noise, output_size, out_ch = 2, 16, 16, 3   # small shapes
    key = jax.random.PRNGKey(0)
    kx, kp = jax.random.split(key)
    x = jax.random.normal(kx, (B, in_noise, 1, 1), jnp.float32)

    params = init_params(kp, in_noise, output_size, out_ch)
    packed = prepare_params(params)                 # one-time weight packing

    fwd = jax.jit(lambda xx: generator_dcgan_forward(xx, packed))
    out = jax.block_until_ready(fwd(x))

    assert out.shape == (B, out_ch, output_size, output_size), out.shape
    assert out.dtype == jnp.float32
    assert bool(jnp.all(jnp.isfinite(out)))
    assert bool(jnp.all(jnp.abs(out) <= 1.0 + 1e-6))   # Tanh output range
    print("KERNEL_OK")
</pallas_src>

<mosaic_0001>
module attributes {stable_mosaic.version = 11 : i64} {
  func.func @_matmul_shift_act_kernel(%arg0: i32, %arg1: memref<2x16xbf16, #tpu.memory_space<vmem>>, %arg2: memref<16x1024xbf16, #tpu.memory_space<vmem>>, %arg3: memref<1x1024xf32, #tpu.memory_space<vmem>>, %arg4: memref<2x1024xbf16, #tpu.memory_space<vmem>>) attributes {dimension_semantics = [#tpu.dimension_semantics<arbitrary>], iteration_bounds = array<i64: 1>, scalar_prefetch = 0 : i64, scratch_operands = 0 : i64, tpu.core_type = #tpu.core_type<tc>, window_params = [{pipeline_mode = #tpu.pipeline_mode<synchronous>, transform_indices = @transform_0, window_bounds = array<i64: 2, 16>}, {pipeline_mode = #tpu.pipeline_mode<synchronous>, transform_indices = @transform_1, window_bounds = array<i64: 16, 1024>}, {pipeline_mode = #tpu.pipeline_mode<synchronous>, transform_indices = @transform_2, window_bounds = array<i64: 1, 1024>}, {pipeline_mode = #tpu.pipeline_mode<synchronous>, transform_indices = @transform_3, window_bounds = array<i64: 2, 1024>}]} {
    %c0 = arith.constant 0 : index
    %c0_0 = arith.constant 0 : index
    %0 = vector.load %arg1[%c0, %c0_0] : memref<2x16xbf16, #tpu.memory_space<vmem>>, vector<2x16xbf16>
    %c0_1 = arith.constant 0 : index
    %c0_2 = arith.constant 0 : index
    %1 = vector.load %arg2[%c0_1, %c0_2] : memref<16x1024xbf16, #tpu.memory_space<vmem>>, vector<16x1024xbf16>
    %cst = arith.constant dense<0.000000e+00> : vector<2x1024xf32>
    %2 = tpu.matmul %0, %1, %cst {dimension_numbers = #tpu.dot_dimension_numbers<[1], [0], [0], [1], [0, 0, 1, 1], [], []>} : vector<2x16xbf16>, vector<16x1024xbf16>, vector<2x1024xf32> -> vector<2x1024xf32>
    %c0_3 = arith.constant 0 : index
    %c0_4 = arith.constant 0 : index
    %3 = vector.load %arg3[%c0_3, %c0_4] : memref<1x1024xf32, #tpu.memory_space<vmem>>, vector<1x1024xf32>
    %4 = vector.broadcast %3 : vector<1x1024xf32> to vector<2x1024xf32>
    %5 = arith.addf %2, %4 : vector<2x1024xf32>
    %cst_5 = arith.constant 0.000000e+00 : f32
    %6 = vector.broadcast %cst_5 : f32 to vector<2x1024xf32>
    %7 = arith.maximumf %5, %6 : vector<2x1024xf32>
    %8 = arith.truncf %7 : vector<2x1024xf32> to vector<2x1024xbf16>
    %c0_6 = arith.constant 0 : index
    %c0_7 = arith.constant 0 : index
    %9 = vector.load %arg4[%c0_6, %c0_7] : memref<2x1024xbf16, #tpu.memory_space<vmem>>, vector<2x1024xbf16>
    tpu.vector_store %arg4[%c0_6, %c0_7], %8 {strides = array<i32>} : memref<2x1024xbf16, #tpu.memory_space<vmem>>, vector<2x1024xbf16>,
    return
  }
  func.func @transform_0(%arg0: i32) -> (i32, i32) {
    %c0_i32 = arith.constant 0 : i32
    %c0_i32_0 = arith.constant 0 : i32
    %c0_i32_1 = arith.constant 0 : i32
    return %c0_i32, %c0_i32_0 : i32, i32
  }
  func.func @transform_1(%arg0: i32) -> (i32, i32) {
    %c0_i32 = arith.constant 0 : i32
    %c0_i32_0 = arith.constant 0 : i32
    %c0_i32_1 = arith.constant 0 : i32
    return %c0_i32, %c0_i32_0 : i32, i32
  }
  func.func @transform_2(%arg0: i32) -> (i32, i32) {
    %c0_i32 = arith.constant 0 : i32
    %c0_i32_0 = arith.constant 0 : i32
    %c0_i32_1 = arith.constant 0 : i32
    return %c0_i32, %c0_i32_0 : i32, i32
  }
  func.func @transform_3(%arg0: i32) -> (i32, i32) {
    %c0_i32 = arith.constant 0 : i32
    %c0_i32_0 = arith.constant 0 : i32
    %c0_i32_1 = arith.constant 0 : i32
    return %c0_i32, %c0_i32_0 : i32, i32
  }
}

module attributes {stable_mosaic.version = 11 : i64} {
  func.func @_subpixel_convt_kernel(%arg0: i32, %arg1: memref<2x6x6x64xbf16, #tpu.memory_space<vmem>>, %arg2: memref<4x256x64xbf16, #tpu.memory_space<vmem>>, %arg3: memref<1x128xf32, #tpu.memory_space<vmem>>, %arg4: memref<2x4x2x4x128xbf16, #tpu.memory_space<vmem>>) attributes {dimension_semantics = [#tpu.dimension_semantics<parallel>], iteration_bounds = array<i64: 1>, scalar_prefetch = 0 : i64, scratch_operands = 0 : i64, tpu.core_type = #tpu.core_type<tc>, window_params = [{transform_indices = @transform_0, window_bounds = array<i64: 2, 6, 6, 64>}, {pipeline_mode = #tpu.pipeline_mode<synchronous>, transform_indices = @transform_1, window_bounds = array<i64: 4, 256, 64>}, {pipeline_mode = #tpu.pipeline_mode<synchronous>, transform_indices = @transform_2, window_bounds = array<i64: 1, 128>}, {transform_indices = @transform_3, window_bounds = array<i64: 2, 4, 2, 4, 128>}]} {
    %c0 = arith.constant 0 : index
    %c0_0 = arith.constant 0 : index
    %c0_1 = arith.constant 0 : index
    %c0_2 = arith.constant 0 : index
    %0 = vector.load %arg1[%c0, %c0_0, %c0_1, %c0_2] : memref<2x6x6x64xbf16, #tpu.memory_space<vmem>>, vector<2x4x4x64xbf16>
    %1 = vector.shape_cast %0 : vector<2x4x4x64xbf16> to vector<32x64xbf16>
    %c0_3 = arith.constant 0 : index
    %c0_4 = arith.constant 0 : index
    %c1 = arith.constant 1 : index
    %c0_5 = arith.constant 0 : index
    %2 = vector.load %arg1[%c0_3, %c0_4, %c1, %c0_5] : memref<2x6x6x64xbf16, #tpu.memory_space<vmem>>, vector<2x4x4x64xbf16>
    %3 = vector.shape_cast %2 : vector<2x4x4x64xbf16> to vector<32x64xbf16>
    %c0_6 = arith.constant 0 : index
    %c0_7 = arith.constant 0 : index
    %c2 = arith.constant 2 : index
    %c0_8 = arith.constant 0 : index
    %4 = vector.load %arg1[%c0_6, %c0_7, %c2, %c0_8] : memref<2x6x6x64xbf16, #tpu.memory_space<vmem>>, vector<2x4x4x64xbf16>
    %5 = vector.shape_cast %4 : vector<2x4x4x64xbf16> to vector<32x64xbf16>
    %c0_9 = arith.constant 0 : index
    %c1_10 = arith.constant 1 : index
    %c0_11 = arith.constant 0 : index
    %c0_12 = arith.constant 0 : index
    %6 = vector.load %arg1[%c0_9, %c1_10, %c0_11, %c0_12] : memref<2x6x6x64xbf16, #tpu.memory_space<vmem>>, vector<2x4x4x64xbf16>
    %7 = vector.shape_cast %6 : vector<2x4x4x64xbf16> to vector<32x64xbf16>
    %c0_13 = arith.constant 0 : index
    %c1_14 = arith.constant 1 : index
    %c1_15 = arith.constant 1 : index
    %c0_16 = arith.constant 0 : index
    %8 = vector.load %arg1[%c0_13, %c1_14, %c1_15, %c0_16] : memref<2x6x6x64xbf16, #tpu.memory_space<vmem>>, vector<2x4x4x64xbf16>
    %9 = vector.shape_cast %8 : vector<2x4x4x64xbf16> to vector<32x64xbf16>
    %c0_17 = arith.constant 0 : index
    %c1_18 = arith.constant 1 : index
    %c2_19 = arith.constant 2 : index
    %c0_20 = arith.constant 0 : index
    %10 = vector.load %arg1[%c0_17, %c1_18, %c2_19, %c0_20] : memref<2x6x6x64xbf16, #tpu.memory_space<vmem>>, vector<2x4x4x64xbf16>
    %11 = vector.shape_cast %10 : vector<2x4x4x64xbf16> to vector<32x64xbf16>
    %c0_21 = arith.constant 0 : index
    %c2_22 = arith.constant 2 : index
    %c0_23 = arith.constant 0 : index
    %c0_24 = arith.constant 0 : index
    %12 = vector.load %arg1[%c0_21, %c2_22, %c0_23, %c0_24] : memref<2x6x6x64xbf16, #tpu.memory_space<vmem>>, vector<2x4x4x64xbf16>
    %13 = vector.shape_cast %12 : vector<2x4x4x64xbf16> to vector<32x64xbf16>
    %c0_25 = arith.constant 0 : index
    %c2_26 = arith.constant 2 : index
    %c1_27 = arith.constant 1 : index
    %c0_28 = arith.constant 0 : index
    %14 = vector.load %arg1[%c0_25, %c2_26, %c1_27, %c0_28] : memref<2x6x6x64xbf16, #tpu.memory_space<vmem>>, vector<2x4x4x64xbf16>
    %15 = vector.shape_cast %14 : vector<2x4x4x64xbf16> to vector<32x64xbf16>
    %c0_29 = arith.constant 0 : index
    %c2_30 = arith.constant 2 : index
    %c2_31 = arith.constant 2 : index
    %c0_32 = arith.constant 0 : index
    %16 = vector.load %arg1[%c0_29, %c2_30, %c2_31, %c0_32] : memref<2x6x6x64xbf16, #tpu.memory_space<vmem>>, vector<2x4x4x64xbf16>
    %17 = vector.shape_cast %16 : vector<2x4x4x64xbf16> to vector<32x64xbf16>
    %18 = tpu.concatenate %1, %3, %7, %9 in 1 : vector<32x64xbf16>, vector<32x64xbf16>, vector<32x64xbf16>, vector<32x64xbf16> -> vector<32x256xbf16>
    %c0_33 = arith.constant 0 : index
    %c0_34 = arith.constant 0 : index
    %c0_35 = arith.constant 0 : index
    %19 = vector.load %arg2[%c0_33, %c0_34, %c0_35] : memref<4x256x64xbf16, #tpu.memory_space<vmem>>, vector<1x256x64xbf16>
    %20 = vector.shape_cast %19 : vector<1x256x64xbf16> to vector<256x64xbf16>
    %cst = arith.constant dense<0.000000e+00> : vector<32x64xf32>
    %21 = tpu.matmul %18, %20, %cst {dimension_numbers = #tpu.dot_dimension_numbers<[1], [0], [0], [1], [0, 0, 1, 1], [], []>} : vector<32x256xbf16>, vector<256x64xbf16>, vector<32x64xf32> -> vector<32x64xf32>
    %22 = tpu.concatenate %3, %5, %9, %11 in 1 : vector<32x64xbf16>, vector<32x64xbf16>, vector<32x64xbf16>, vector<32x64xbf16> -> vector<32x256xbf16>
    %c1_36 = arith.constant 1 : index
    %c0_37 = arith.constant 0 : index
    %c0_38 = arith.constant 0 : index
    %23 = vector.load %arg2[%c1_36, %c0_37, %c0_38] : memref<4x256x64xbf16, #tpu.memory_space<vmem>>, vector<1x256x64xbf16>
    %24 = vector.shape_cast %23 : vector<1x256x64xbf16> to vector<256x64xbf16>
    %cst_39 = arith.constant dense<0.000000e+00> : vector<32x64xf32>
    %25 = tpu.matmul %22, %24, %cst_39 {dimension_numbers = #tpu.dot_dimension_numbers<[1], [0], [0], [1], [0, 0, 1, 1], [], []>} : vector<32x256xbf16>, vector<256x64xbf16>, vector<32x64xf32> -> vector<32x64xf32>
    %26 = tpu.concatenate %21, %25 in 1 : vector<32x64xf32>, vector<32x64xf32> -> vector<32x128xf32>
    %c0_40 = arith.constant 0 : index
    %c0_41 = arith.constant 0 : index
    %27 = vector.load %arg3[%c0_40, %c0_41] : memref<1x128xf32, #tpu.memory_space<vmem>>, vector<1x128xf32>
    %28 = vector.broadcast %27 : vector<1x128xf32> to vector<32x128xf32>
    %29 = arith.addf %26, %28 : vector<32x128xf32>
    %cst_42 = arith.constant 0.000000e+00 : f32
    %30 = vector.broadcast %cst_42 : f32 to vector<32x128xf32>
    %31 = arith.maximumf %29, %30 : vector<32x128xf32>
    %32 = vector.shape_cast %31 : vector<32x128xf32> to vector<2x4x1x4x128xf32>
    %33 = arith.truncf %32 : vector<2x4x1x4x128xf32> to vector<2x4x1x4x128xbf16>
    %c0_43 = arith.constant 0 : index
    %c0_44 = arith.constant 0 : index
    %c0_45 = arith.constant 0 : index
    %c0_46 = arith.constant 0 : index
    %c0_47 = arith.constant 0 : index
    %34 = vector.load %arg4[%c0_43, %c0_44, %c0_45, %c0_46, %c0_47] : memref<2x4x2x4x128xbf16, #tpu.memory_space<vmem>>, vector<2x4x1x4x128xbf16>
    tpu.vector_store %arg4[%c0_43, %c0_44, %c0_45, %c0_46, %c0_47], %33 {strides = array<i32>} : memref<2x4x2x4x128xbf16, #tpu.memory_space<vmem>>, vector<2x4x1x4x128xbf16>,
    %35 = tpu.concatenate %7, %9, %13, %15 in 1 : vector<32x64xbf16>, vector<32x64xbf16>, vector<32x64xbf16>, vector<32x64xbf16> -> vector<32x256xbf16>
    %c2_48 = arith.constant 2 : index
    %c0_49 = arith.constant 0 : index
    %c0_50 = arith.constant 0 : index
    %36 = vector.load %arg2[%c2_48, %c0_49, %c0_50] : memref<4x256x64xbf16, #tpu.memory_space<vmem>>, vector<1x256x64xbf16>
    %37 = vector.shape_cast %36 : vector<1x256x64xbf16> to vector<256x64xbf16>
    %cst_51 = arith.constant dense<0.000000e+00> : vector<32x64xf32>
    %38 = tpu.matmul %35, %37, %cst_51 {dimension_numbers = #tpu.dot_dimension_numbers<[1], [0], [0], [1], [0, 0, 1, 1], [], []>} : vector<32x256xbf16>, vector<256x64xbf16>, vector<32x64xf32> -> vector<32x64xf32>
    %39 = tpu.concatenate %9, %11, %15, %17 in 1 : vector<32x64xbf16>, vector<32x64xbf16>, vector<32x64xbf16>, vector<32x64xbf16> -> vector<32x256xbf16>
    %c3 = arith.constant 3 : index
    %c0_52 = arith.constant 0 : index
    %c0_53 = arith.constant 0 : index
    %40 = vector.load %arg2[%c3, %c0_52, %c0_53] : memref<4x256x64xbf16, #tpu.memory_space<vmem>>, vector<1x256x64xbf16>
    %41 = vector.shape_cast %40 : vector<1x256x64xbf16> to vector<256x64xbf16>
    %cst_54 = arith.constant dense<0.000000e+00> : vector<32x64xf32>
    %42 = tpu.matmul %39, %41, %cst_54 {dimension_numbers = #tpu.dot_dimension_numbers<[1], [0], [0], [1], [0, 0, 1, 1], [], []>} : vector<32x256xbf16>, vector<256x64xbf16>, vector<32x64xf32> -> vector<32x64xf32>
    %43 = tpu.concatenate %38, %42 in 1 : vector<32x64xf32>, vector<32x64xf32> -> vector<32x128xf32>
    %c0_55 = arith.constant 0 : index
    %c0_56 = arith.constant 0 : index
    %44 = vector.load %arg3[%c0_55, %c0_56] : memref<1x128xf32, #tpu.memory_space<vmem>>, vector<1x128xf32>
    %45 = vector.broadcast %44 : vector<1x128xf32> to vector<32x128xf32>
    %46 = arith.addf %43, %45 : vector<32x128xf32>
    %cst_57 = arith.constant 0.000000e+00 : f32
    %47 = vector.broadcast %cst_57 : f32 to vector<32x128xf32>
    %48 = arith.maximumf %46, %47 : vector<32x128xf32>
    %49 = vector.shape_cast %48 : vector<32x128xf32> to vector<2x4x1x4x128xf32>
    %50 = arith.truncf %49 : vector<2x4x1x4x128xf32> to vector<2x4x1x4x128xbf16>
    %c0_58 = arith.constant 0 : index
    %c0_59 = arith.constant 0 : index
    %c1_60 = arith.constant 1 : index
    %c0_61 = arith.constant 0 : index
    %c0_62 = arith.constant 0 : index
    %51 = vector.load %arg4[%c0_58, %c0_59, %c1_60, %c0_61, %c0_62] : memref<2x4x2x4x128xbf16, #tpu.memory_space<vmem>>, vector<2x4x1x4x128xbf16>
    tpu.vector_store %arg4[%c0_58, %c0_59, %c1_60, %c0_61, %c0_62], %50 {strides = array<i32>} : memref<2x4x2x4x128xbf16, #tpu.memory_space<vmem>>, vector<2x4x1x4x128xbf16>,
    return
  }
  func.func @transform_0(%arg0: i32) -> (i32, i32, i32, i32) {
    %c0_i32 = arith.constant 0 : i32
    %c0_i32_0 = arith.constant 0 : i32
    %c0_i32_1 = arith.constant 0 : i32
    %c0_i32_2 = arith.constant 0 : i32
    return %arg0, %c0_i32, %c0_i32_0, %c0_i32_1 : i32, i32, i32, i32
  }
  func.func @transform_1(%arg0: i32) -> (i32, i32, i32) {
    %c0_i32 = arith.constant 0 : i32
    %c0_i32_0 = arith.constant 0 : i32
    %c0_i32_1 = arith.constant 0 : i32
    %c0_i32_2 = arith.constant 0 : i32
    return %c0_i32, %c0_i32_0, %c0_i32_1 : i32, i32, i32
  }
  func.func @transform_2(%arg0: i32) -> (i32, i32) {
    %c0_i32 = arith.constant 0 : i32
    %c0_i32_0 = arith.constant 0 : i32
    %c0_i32_1 = arith.constant 0 : i32
    return %c0_i32, %c0_i32_0 : i32, i32
  }
  func.func @transform_3(%arg0: i32) -> (i32, i32, i32, i32, i32) {
    %c0_i32 = arith.constant 0 : i32
    %c0_i32_0 = arith.constant 0 : i32
    %c0_i32_1 = arith.constant 0 : i32
    %c0_i32_2 = arith.constant 0 : i32
    %c0_i32_3 = arith.constant 0 : i32
    return %arg0, %c0_i32, %c0_i32_0, %c0_i32_1, %c0_i32_2 : i32, i32, i32, i32, i32
  }
}

module attributes {stable_mosaic.version = 11 : i64} {
  func.func @_subpixel_convt_kernel(%arg0: i32, %arg1: memref<2x10x10x64xbf16, #tpu.memory_space<vmem>>, %arg2: memref<4x256x64xbf16, #tpu.memory_space<vmem>>, %arg3: memref<1x128xf32, #tpu.memory_space<vmem>>, %arg4: memref<2x8x2x8x128xbf16, #tpu.memory_space<vmem>>) attributes {dimension_semantics = [#tpu.dimension_semantics<parallel>], iteration_bounds = array<i64: 1>, scalar_prefetch = 0 : i64, scratch_operands = 0 : i64, tpu.core_type = #tpu.core_type<tc>, window_params = [{transform_indices = @transform_0, window_bounds = array<i64: 2, 10, 10, 64>}, {pipeline_mode = #tpu.pipeline_mode<synchronous>, transform_indices = @transform_1, window_bounds = array<i64: 4, 256, 64>}, {pipeline_mode = #tpu.pipeline_mode<synchronous>, transform_indices = @transform_2, window_bounds = array<i64: 1, 128>}, {transform_indices = @transform_3, window_bounds = array<i64: 2, 8, 2, 8, 128>}]} {
    %c0 = arith.constant 0 : index
    %c0_0 = arith.constant 0 : index
    %c0_1 = arith.constant 0 : index
    %c0_2 = arith.constant 0 : index
    %0 = vector.load %arg1[%c0, %c0_0, %c0_1, %c0_2] : memref<2x10x10x64xbf16, #tpu.memory_space<vmem>>, vector<2x8x8x64xbf16>
    %1 = vector.shape_cast %0 : vector<2x8x8x64xbf16> to vector<128x64xbf16>
    %c0_3 = arith.constant 0 : index
    %c0_4 = arith.constant 0 : index
    %c1 = arith.constant 1 : index
    %c0_5 = arith.constant 0 : index
    %2 = vector.load %arg1[%c0_3, %c0_4, %c1, %c0_5] : memref<2x10x10x64xbf16, #tpu.memory_space<vmem>>, vector<2x8x8x64xbf16>
    %3 = vector.shape_cast %2 : vector<2x8x8x64xbf16> to vector<128x64xbf16>
    %c0_6 = arith.constant 0 : index
    %c0_7 = arith.constant 0 : index
    %c2 = arith.constant 2 : index
    %c0_8 = arith.constant 0 : index
    %4 = vector.load %arg1[%c0_6, %c0_7, %c2, %c0_8] : memref<2x10x10x64xbf16, #tpu.memory_space<vmem>>, vector<2x8x8x64xbf16>
    %5 = vector.shape_cast %4 : vector<2x8x8x64xbf16> to vector<128x64xbf16>
    %c0_9 = arith.constant 0 : index
    %c1_10 = arith.constant 1 : index
    %c0_11 = arith.constant 0 : index
    %c0_12 = arith.constant 0 : index
    %6 = vector.load %arg1[%c0_9, %c1_10, %c0_11, %c0_12] : memref<2x10x10x64xbf16, #tpu.memory_space<vmem>>, vector<2x8x8x64xbf16>
    %7 = vector.shape_cast %6 : vector<2x8x8x64xbf16> to vector<128x64xbf16>
    %c0_13 = arith.constant 0 : index
    %c1_14 = arith.constant 1 : index
    %c1_15 = arith.constant 1 : index
    %c0_16 = arith.constant 0 : index
    %8 = vector.load %arg1[%c0_13, %c1_14, %c1_15, %c0_16] : memref<2x10x10x64xbf16, #tpu.memory_space<vmem>>, vector<2x8x8x64xbf16>
    %9 = vector.shape_cast %8 : vector<2x8x8x64xbf16> to vector<128x64xbf16>
    %c0_17 = arith.constant 0 : index
    %c1_18 = arith.constant 1 : index
    %c2_19 = arith.constant 2 : index
    %c0_20 = arith.constant 0 : index
    %10 = vector.load %arg1[%c0_17, %c1_18, %c2_19, %c0_20] : memref<2x10x10x64xbf16, #tpu.memory_space<vmem>>, vector<2x8x8x64xbf16>
    %11 = vector.shape_cast %10 : vector<2x8x8x64xbf16> to vector<128x64xbf16>
    %c0_21 = arith.constant 0 : index
    %c2_22 = arith.constant 2 : index
    %c0_23 = arith.constant 0 : index
    %c0_24 = arith.constant 0 : index
    %12 = vector.load %arg1[%c0_21, %c2_22, %c0_23, %c0_24] : memref<2x10x10x64xbf16, #tpu.memory_space<vmem>>, vector<2x8x8x64xbf16>
    %13 = vector.shape_cast %12 : vector<2x8x8x64xbf16> to vector<128x64xbf16>
    %c0_25 = arith.constant 0 : index
    %c2_26 = arith.constant 2 : index
    %c1_27 = arith.constant 1 : index
    %c0_28 = arith.constant 0 : index
    %14 = vector.load %arg1[%c0_25, %c2_26, %c1_27, %c0_28] : memref<2x10x10x64xbf16, #tpu.memory_space<vmem>>, vector<2x8x8x64xbf16>
    %15 = vector.shape_cast %14 : vector<2x8x8x64xbf16> to vector<128x64xbf16>
    %c0_29 = arith.constant 0 : index
    %c2_30 = arith.constant 2 : index
    %c2_31 = arith.constant 2 : index
    %c0_32 = arith.constant 0 : index
    %16 = vector.load %arg1[%c0_29, %c2_30, %c2_31, %c0_32] : memref<2x10x10x64xbf16, #tpu.memory_space<vmem>>, vector<2x8x8x64xbf16>
    %17 = vector.shape_cast %16 : vector<2x8x8x64xbf16> to vector<128x64xbf16>
    %18 = tpu.concatenate %1, %3, %7, %9 in 1 : vector<128x64xbf16>, vector<128x64xbf16>, vector<128x64xbf16>, vector<128x64xbf16> -> vector<128x256xbf16>
    %c0_33 = arith.constant 0 : index
    %c0_34 = arith.constant 0 : index
    %c0_35 = arith.constant 0 : index
    %19 = vector.load %arg2[%c0_33, %c0_34, %c0_35] : memref<4x256x64xbf16, #tpu.memory_space<vmem>>, vector<1x256x64xbf16>
    %20 = vector.shape_cast %19 : vector<1x256x64xbf16> to vector<256x64xbf16>
    %cst = arith.constant dense<0.000000e+00> : vector<128x64xf32>
    %21 = tpu.matmul %18, %20, %cst {dimension_numbers = #tpu.dot_dimension_numbers<[1], [0], [0], [1], [0, 0, 1, 1], [], []>} : vector<128x256xbf16>, vector<256x64xbf16>, vector<128x64xf32> -> vector<128x64xf32>
    %22 = tpu.concatenate %3, %5, %9, %11 in 1 : vector<128x64xbf16>, vector<128x64xbf16>, vector<128x64xbf16>, vector<128x64xbf16> -> vector<128x256xbf16>
    %c1_36 = arith.constant 1 : index
    %c0_37 = arith.constant 0 : index
    %c0_38 = arith.constant 0 : index
    %23 = vector.load %arg2[%c1_36, %c0_37, %c0_38] : memref<4x256x64xbf16, #tpu.memory_space<vmem>>, vector<1x256x64xbf16>
    %24 = vector.shape_cast %23 : vector<1x256x64xbf16> to vector<256x64xbf16>
    %cst_39 = arith.constant dense<0.000000e+00> : vector<128x64xf32>
    %25 = tpu.matmul %22, %24, %cst_39 {dimension_numbers = #tpu.dot_dimension_numbers<[1], [0], [0], [1], [0, 0, 1, 1], [], []>} : vector<128x256xbf16>, vector<256x64xbf16>, vector<128x64xf32> -> vector<128x64xf32>
    %26 = tpu.concatenate %21, %25 in 1 : vector<128x64xf32>, vector<128x64xf32> -> vector<128x128xf32>
    %c0_40 = arith.constant 0 : index
    %c0_41 = arith.constant 0 : index
    %27 = vector.load %arg3[%c0_40, %c0_41] : memref<1x128xf32, #tpu.memory_space<vmem>>, vector<1x128xf32>
    %28 = vector.broadcast %27 : vector<1x128xf32> to vector<128x128xf32>
    %29 = arith.addf %26, %28 : vector<128x128xf32>
    %30 = math.tanh %29 : vector<128x128xf32>
    %31 = vector.shape_cast %30 : vector<128x128xf32> to vector<2x8x1x8x128xf32>
    %32 = arith.truncf %31 : vector<2x8x1x8x128xf32> to vector<2x8x1x8x128xbf16>
    %c0_42 = arith.constant 0 : index
    %c0_43 = arith.constant 0 : index
    %c0_44 = arith.constant 0 : index
    %c0_45 = arith.constant 0 : index
    %c0_46 = arith.constant 0 : index
    %33 = vector.load %arg4[%c0_42, %c0_43, %c0_44, %c0_45, %c0_46] : memref<2x8x2x8x128xbf16, #tpu.memory_space<vmem>>, vector<2x8x1x8x128xbf16>
    tpu.vector_store %arg4[%c0_42, %c0_43, %c0_44, %c0_45, %c0_46], %32 {strides = array<i32>} : memref<2x8x2x8x128xbf16, #tpu.memory_space<vmem>>, vector<2x8x1x8x128xbf16>,
    %34 = tpu.concatenate %7, %9, %13, %15 in 1 : vector<128x64xbf16>, vector<128x64xbf16>, vector<128x64xbf16>, vector<128x64xbf16> -> vector<128x256xbf16>
    %c2_47 = arith.constant 2 : index
    %c0_48 = arith.constant 0 : index
    %c0_49 = arith.constant 0 : index
    %35 = vector.load %arg2[%c2_47, %c0_48, %c0_49] : memref<4x256x64xbf16, #tpu.memory_space<vmem>>, vector<1x256x64xbf16>
    %36 = vector.shape_cast %35 : vector<1x256x64xbf16> to vector<256x64xbf16>
    %cst_50 = arith.constant dense<0.000000e+00> : vector<128x64xf32>
    %37 = tpu.matmul %34, %36, %cst_50 {dimension_numbers = #tpu.dot_dimension_numbers<[1], [0], [0], [1], [0, 0, 1, 1], [], []>} : vector<128x256xbf16>, vector<256x64xbf16>, vector<128x64xf32> -> vector<128x64xf32>
    %38 = tpu.concatenate %9, %11, %15, %17 in 1 : vector<128x64xbf16>, vector<128x64xbf16>, vector<128x64xbf16>, vector<128x64xbf16> -> vector<128x256xbf16>
    %c3 = arith.constant 3 : index
    %c0_51 = arith.constant 0 : index
    %c0_52 = arith.constant 0 : index
    %39 = vector.load %arg2[%c3, %c0_51, %c0_52] : memref<4x256x64xbf16, #tpu.memory_space<vmem>>, vector<1x256x64xbf16>
    %40 = vector.shape_cast %39 : vector<1x256x64xbf16> to vector<256x64xbf16>
    %cst_53 = arith.constant dense<0.000000e+00> : vector<128x64xf32>
    %41 = tpu.matmul %38, %40, %cst_53 {dimension_numbers = #tpu.dot_dimension_numbers<[1], [0], [0], [1], [0, 0, 1, 1], [], []>} : vector<128x256xbf16>, vector<256x64xbf16>, vector<128x64xf32> -> vector<128x64xf32>
    %42 = tpu.concatenate %37, %41 in 1 : vector<128x64xf32>, vector<128x64xf32> -> vector<128x128xf32>
    %c0_54 = arith.constant 0 : index
    %c0_55 = arith.constant 0 : index
    %43 = vector.load %arg3[%c0_54, %c0_55] : memref<1x128xf32, #tpu.memory_space<vmem>>, vector<1x128xf32>
    %44 = vector.broadcast %43 : vector<1x128xf32> to vector<128x128xf32>
    %45 = arith.addf %42, %44 : vector<128x128xf32>
    %46 = math.tanh %45 : vector<128x128xf32>
    %47 = vector.shape_cast %46 : vector<128x128xf32> to vector<2x8x1x8x128xf32>
    %48 = arith.truncf %47 : vector<2x8x1x8x128xf32> to vector<2x8x1x8x128xbf16>
    %c0_56 = arith.constant 0 : index
    %c0_57 = arith.constant 0 : index
    %c1_58 = arith.constant 1 : index
    %c0_59 = arith.constant 0 : index
    %c0_60 = arith.constant 0 : index
    %49 = vector.load %arg4[%c0_56, %c0_57, %c1_58, %c0_59, %c0_60] : memref<2x8x2x8x128xbf16, #tpu.memory_space<vmem>>, vector<2x8x1x8x128xbf16>
    tpu.vector_store %arg4[%c0_56, %c0_57, %c1_58, %c0_59, %c0_60], %48 {strides = array<i32>} : memref<2x8x2x8x128xbf16, #tpu.memory_space<vmem>>, vector<2x8x1x8x128xbf16>,
    return
  }
  func.func @transform_0(%arg0: i32) -> (i32, i32, i32, i32) {
    %c0_i32 = arith.constant 0 : i32
    %c0_i32_0 = arith.constant 0 : i32
    %c0_i32_1 = arith.constant 0 : i32
    %c0_i32_2 = arith.constant 0 : i32
    return %arg0, %c0_i32, %c0_i32_0, %c0_i32_1 : i32, i32, i32, i32
  }
  func.func @transform_1(%arg0: i32) -> (i32, i32, i32) {
    %c0_i32 = arith.constant 0 : i32
    %c0_i32_0 = arith.constant 0 : i32
    %c0_i32_1 = arith.constant 0 : i32
    %c0_i32_2 = arith.constant 0 : i32
    return %c0_i32, %c0_i32_0, %c0_i32_1 : i32, i32, i32
  }
  func.func @transform_2(%arg0: i32) -> (i32, i32) {
    %c0_i32 = arith.constant 0 : i32
    %c0_i32_0 = arith.constant 0 : i32
    %c0_i32_1 = arith.constant 0 : i32
    return %c0_i32, %c0_i32_0 : i32, i32
  }
  func.func @transform_3(%arg0: i32) -> (i32, i32, i32, i32, i32) {
    %c0_i32 = arith.constant 0 : i32
    %c0_i32_0 = arith.constant 0 : i32
    %c0_i32_1 = arith.constant 0 : i32
    %c0_i32_2 = arith.constant 0 : i32
    %c0_i32_3 = arith.constant 0 : i32
    return %arg0, %c0_i32, %c0_i32_0, %c0_i32_1, %c0_i32_2 : i32, i32, i32, i32, i32
  }
}

</mosaic_0001>

<bundles_post_ra>
// kernel: _lambda_.3
= control target key start
LH: loop header
LB: loop body
LE: loop exit
PB: predicated region body
PF: predicated region fallthrough
CT: control target
= control target key end

     0   :  { %8 = vsyncpa [#allocation3], 0  ;;  %s411_s12 = smov [#allocation2]   ;;  %s448_s0 = inlined_call_operand.vmem [shape: bf16[2,16], index: 0, kind: input, shape index: {}]   ;;  %s449_s1 = inlined_call_operand.hbm [shape: bf16[16,1024], index: 1, kind: input, shape index: {}]   ;;  %s450_s2 = inlined_call_operand.vmem [shape: f32[1,1024], index: 2, kind: input, shape index: {}]   ;;  %s451_s3 = inlined_call_operand.vmem [shape: bf16[2,1024], index: 3, kind: output, shape index: {}]  }
   0x1   :  { %s16_s13 = sshll.u32 %s411_s12, 4  ;;  %s17_s13 = int_to_ptr.vmem [resolvable:$true] %s16_s13 }
   0x2   :  { %s397_s14 = scalar_lea.vmem %s17_s13, 1024  ;;  %p402_p1 = scmp.lt.s32.totalorder %s17_s13, %s17_s13 }
   0x3   :  { %p398_p0 = scmp.ne.s32.totalorder %s17_s13, %s397_s14  ;;  %p403_p2 = scmp.lt.s32.totalorder %s397_s14, %s397_s14 }
   0x5   :  { %p404_p3 = por %p403_p2, %p402_p1 }
   0x7   :  { %p405_p4 = pnand %p404_p3, %p398_p0 }
   0x9   :  { %408 = shalt.err (!%p405_p4)
}
   0xa   :  { %s412_s15 = smov 512   ;;  %s413_s16 = smov 32  }
   0xb   :  { %22 = dma.hbm_to_vmem [thread:$0]  %s449_s1, 1024, %s17_s13, [#allocation3], %s412_s15, %s412_s15, %s413_s16  }
   0xc   :  { %409 = dma.done.wait [#allocation3], 1024  }
   0xd   :  { %410 = vsyncadd [#allocation3], 4294966272  ;;  %v414_v0 = vmov 0   ;;  %v30_v1 = vld [vmem:[#allocation2] sm:$0xff]  ;;  %v31_v3 = vld [vmem:[#allocation2 + $0x8] sm:$0xff]  ;;  %vm120_vm0 = vcmask 130048   ;;  %v40_v18 = vlaneseq }
   0xe   :  { %156 = vmatprep.mubr.bf16.mxu0 %v414_v0  ;;  %197 = vmatprep.mubr.bf16.mxu1 %v414_v0  ;;  %v34_v2 = vld [vmem:[#allocation2 + $0x20] sm:$0xff]  ;;  %v35_v5 = vld [vmem:[#allocation2 + $0x28] sm:$0xff]  ;;  %v32_v7 = vld [vmem:[#allocation2 + $0x10] sm:$0xff]  ;;  %v415_v33 = vmov 1966171168  }
   0xf   :  { %v369_v4 = vcombine.high %v30_v1, %v34_v2  ;;  %v368_v6 = vcombine.low %v30_v1, %v34_v2  ;;  %v371_v8 = vcombine.high %v31_v3, %v35_v5  ;;  %v370_v9 = vcombine.low %v31_v3, %v35_v5  ;;  %v36_v10 = vld [vmem:[#allocation2 + $0x30] sm:$0xff]  ;;  %v33_v11 = vld [vmem:[#allocation2 + $0x18] sm:$0xff]  ;;  %v29_v15 = vld [vmem:[%s448_s0] sm:$0x1] }
  0x10   :  { %v37_v12 = vld [vmem:[#allocation2 + $0x38] sm:$0xff]  ;;  %v373_v13 = vcombine.high %v32_v7, %v36_v10  ;;  %v372_v16 = vcombine.low %v32_v7, %v36_v10  ;;  %v41_v19 = vshrl.u32 %v40_v18, 7  ;;  %v38_v24 = vld [vmem:[%s450_s2] sm:$0xff]  ;;  %v317_v34 = vunpack.c.l.s4 %v415_v33 }
  0x11   :  { %138 = vmatprep.subr.bf16.mxu0 %v369_v4  ;;  %v375_v14 = vcombine.high %v33_v11, %v37_v12  ;;  %179 = vmatprep.subr.bf16.mxu1 %v371_v8  ;;  %v374_v17 = vcombine.low %v33_v11, %v37_v12 }
  0x12   :  { %139 = vmatpush1.bf16.msra.mxu0 %v368_v6  ;;  %180 = vmatpush1.bf16.msra.mxu1 %v370_v9  ;;  %v46_v20 = vsub.s32 1, %v41_v19  ;;  %v42_v21 = vsub.s32 0, %v41_v19  ;;  %v50_v22 = vsub.s32 2, %v41_v19  ;;  %v54_v23 = vsub.s32 3, %v41_v19 }
  0x13   :  { %220 = vmatprep.subr.bf16.mxu0 %v373_v13  ;;  %261 = vmatprep.subr.bf16.mxu1 %v375_v14  ;;  %v58_v31 = vsub.s32 4, %v41_v19  ;;  %v66_v35 = vsub.s32 6, %v41_v19  ;;  %v62_v38 = vsub.s32 5, %v41_v19  ;;  %v70_v43 = vsub.s32 7, %v41_v19 }
  0x14   :  { %v47_v25 = vrot.slane %v38_v24, %v46_v20  ;;  %v43_v26 = vrot.slane %v38_v24, %v42_v21  ;;  %v51_v28 = vrot.slane %v38_v24, %v50_v22  ;;  %v55_v29 = vrot.slane %v38_v24, %v54_v23 }
  0x15   :  { %376 = vmatmul.mubr.msk.bf16.vlgmr.msra.gmra.mxu0 %vm120_vm0, %v29_v15  ;;  %377 = vmatmul.mubr.msk.bf16.vlgmr.msra.gmra.mxu1 %vm120_vm0, %v29_v15  ;;  %v59_v45 = vrot.slane %v38_v24, %v58_v31  ;;  %v318_v47 = vunpack.c.0.s8 %v317_v34  ;;  %v67_v50 = vrot.slane %v38_v24, %v66_v35  ;;  %v63_v52 = vrot.slane %v38_v24, %v62_v38 }
  0x16   :  { %221 = vmatpush1.bf16.msra.mxu0 %v372_v16  ;;  %262 = vmatpush1.bf16.msra.mxu1 %v374_v17  ;;  %v71_v56 = vrot.slane %v38_v24, %v70_v43 }
  0x17   :  { %238 = vmatprep.mubr.bf16.mxu0 %v414_v0  ;;  %279 = vmatprep.mubr.bf16.mxu1 %v414_v0  ;;  %v321_v60 = vsub.s32 %v318_v47, %v41_v19 }
  0x1d   :  { %378 = vmatmul.mubr.msk.bf16.vlgmr.msra.gmra.mxu0 %vm120_vm0, %v29_v15  ;;  %379 = vmatmul.mubr.msk.bf16.vlgmr.msra.gmra.mxu1 %vm120_vm0, %v29_v15 }
  0xd5   :  { %v158_v27 = vpop.f32.mrf.mxu0  ;;  %v199_v30 = vpop.f32.mrf.mxu1 }
  0xd6   :  { %v159_v39 = vadd.f32 %v158_v27, %v43_v26  ;;  %v200_v40 = vadd.f32 %v199_v30, %v51_v28 }
  0xd7   :  { %v160_v32 = vpop.f32.mrf.mxu0  ;;  %v201_v37 = vpop.f32.mrf.mxu1 }
  0xd8   :  { %v161_v36 = vadd.f32 %v160_v32, %v47_v25  ;;  %v202_v41 = vadd.f32 %v201_v37, %v55_v29  ;;  %v288_v53 = vmax.f32 %v159_v39, 0.0  ;;  %v290_v54 = vmax.f32 %v200_v40, 0.0 }
  0xd9   :  { %v162_v42 = vpop.f32.mrf.mxu0  ;;  %v203_v44 = vpop.f32.mrf.mxu1 }
  0xda   :  { %v289_v46 = vmax.f32 %v161_v36, 0.0  ;;  %v291_v48 = vmax.f32 %v202_v41, 0.0 }
  0xdb   :  { %v163_v49 = vpop.f32.mrf.mxu0  ;;  %v204_v51 = vpop.f32.mrf.mxu1 }
  0xdc   :  { %v380_v59 = vpack.c.bf16 %v289_v46, %v288_v53  ;;  %v381_v61 = vpack.c.bf16 %v291_v48, %v290_v54 }
  0xdd   :  { %v240_v55 = vpop.f32.mrf.mxu0  ;;  %v281_v58 = vpop.f32.mrf.mxu1 }
  0xde   :  { %v241_v57 = vadd.f32 %v240_v55, %v59_v45  ;;  %v282_v62 = vadd.f32 %v281_v58, %v67_v50  ;;  %v322_v7 = vrot.slane %v380_v59, %v321_v60  ;;  %v329_v8 = vrot.slane %v381_v61, %v321_v60 }
  0xdf   :  { %v242_v63 = vpop.f32.mrf.mxu0  ;;  %v283_v1 = vpop.f32.mrf.mxu1 }
  0xe0   :  { %v243_v0 = vadd.f32 %v242_v63, %v63_v52  ;;  %v284_v2 = vadd.f32 %v283_v1, %v71_v56  ;;  %v292_v4 = vmax.f32 %v241_v57, 0.0  ;;  %v294_v9 = vmax.f32 %v282_v62, 0.0 }
  0xe1   :  { %v244_v3 = vpop.f32.mrf.mxu0  ;;  %v285_v6 = vpop.f32.mrf.mxu1  ;;  %v344_v16 = vcombine.low %v322_v7, %v329_v8 }
  0xe2   :  { %v293_v5 = vmax.f32 %v243_v0, 0.0  ;;  %v295_v10 = vmax.f32 %v284_v2, 0.0 }
  0xe3   :  { %v245_v11 = vpop.f32.mrf.mxu0  ;;  %v286_v13 = vpop.f32.mrf.mxu1  ;;  %v352_v19 = vrot.slane %v344_v16, %v321_v60 }
  0xe4   :  { %v382_v12 = vpack.c.bf16 %v293_v5, %v292_v4  ;;  %v383_v14 = vpack.c.bf16 %v295_v10, %v294_v9 }
  0xe6   :  { %v336_v15 = vrot.slane %v382_v12, %v321_v60  ;;  %v343_v17 = vrot.slane %v383_v14, %v321_v60 }
  0xe8   :  { %v345_v18 = vcombine.low %v336_v15, %v343_v17 }
  0xea   :  { %v359_v20 = vrot.slane %v345_v18, %v321_v60 }
  0xec   :  { %v360_v21 = vcombine.low %v352_v19, %v359_v20 }
  0xee   :  { %362 = vst [vmem:[%s451_s3] sm:$0xff] %v360_v21 }
  0xef   :  { %367 = vsyncpa [#allocation3], 1 }

// kernel: _lambda_.4
= control target key start
LH: loop header
LB: loop body
LE: loop exit
PB: predicated region body
PF: predicated region fallthrough
CT: control target
= control target key end

     0   :  { %8 = vsyncpa [#allocation3], 0  ;;  %s2647_s12 = smov [#allocation2]   ;;  %s3031_s0 = inlined_call_operand.vmem [shape: bf16[2,6,6,64], index: 0, kind: input, shape index: {}]   ;;  %s3032_s1 = inlined_call_operand.hbm [shape: bf16[4,256,64], index: 1, kind: input, shape index: {}]   ;;  %s3033_s2 = inlined_call_operand.vmem [shape: f32[1,128], index: 2, kind: input, shape index: {}]   ;;  %s3034_s3 = inlined_call_operand.vmem [shape: bf16[2,4,2,4,128], index: 3, kind: output, shape index: {}]  }
   0x1   :  { %s16_s13 = sshll.u32 %s2647_s12, 4  ;;  %s17_s13 = int_to_ptr.vmem [resolvable:$true] %s16_s13 }
   0x2   :  { %s2633_s14 = scalar_lea.vmem %s17_s13, 8192  ;;  %p2638_p1 = scmp.lt.s32.totalorder %s17_s13, %s17_s13 }
   0x3   :  { %p2634_p0 = scmp.ne.s32.totalorder %s17_s13, %s2633_s14  ;;  %p2639_p2 = scmp.lt.s32.totalorder %s2633_s14, %s2633_s14 }
   0x5   :  { %p2640_p3 = por %p2639_p2, %p2638_p1 }
   0x7   :  { %p2641_p4 = pnand %p2640_p3, %p2634_p0 }
   0x9   :  { %2644 = shalt.err (!%p2641_p4)
}
   0xa   :  { %s2648_s15 = smov 64   ;;  %s2649_s16 = smov 4  }
   0xb   :  { %22 = dma.hbm_to_vmem [thread:$0]  %s3032_s1, 8192, %s17_s13, [#allocation3], %s2648_s15, %s2648_s15, %s2649_s16  }
   0xc   :  { %2645 = dma.done.wait [#allocation3], 8192  }
   0xd   :  { %2646 = vsyncadd [#allocation3], 4294959104  ;;  %vm316_vm0 = vcmask 1040384   ;;  %vm317_vm1 = vcmask 1042434   ;;  %v994_v0 = vlaneseq  ;;  %vm319_vm3 = vcmask 1044484   ;;  %v2537_v9 = vld [vmem:[#allocation2 + $0xf8] sm:$0xff]  }
   0xe   :  { %vm318_vm2 = vmor %vm316_vm0, %vm317_vm1  ;;  %v2650_v1 = vmov 1983009808   ;;  %vm321_vm5 = vcmask 1046534   ;;  %v2538_v14 = vld [vmem:[#allocation2 + $0xb8] sm:$0xff]   ;;  %2449 = vmatprep.subr.bf16.mxu1 %v2537_v9  ;;  %vm117_vm7 = vsmask.f32 1280 }
   0xf   :  { %v992_v2 = vunpack.c.l.s4 %v2650_v1  ;;  %vm320_vm4 = vmor %vm318_vm2, %vm319_vm3  ;;  %v995_v3 = vshrl.u32 %v994_v0, 7  ;;  %v2283_v4 = vld.sshfl [vmem:[%s3031_s0 + $0x4] sm:$0x12 pattern:$0x76325410]  ;;  %2450 = vmatpush3.bf16.msra.mxu1 %v2538_v14  ;;  %v2539_v39 = vld [vmem:[#allocation2 + $0xf0] sm:$0xff]  }
  0x10   :  { %v2284_v6 = vld.sshfl [vmem:[%s3031_s0 + $0x8] sm:$0x12 pattern:$0x76325410]  ;;  %v579_v7 = vcombine.high %v2283_v4, %v2283_v4  ;;  %v2291_v8 = vrot.slane %v2283_v4, 9  ;;  %vm2682_vm6 = vmor %vm320_vm4, %vm321_vm5  ;;  %v2540_v45 = vld [vmem:[#allocation2 + $0xb0] sm:$0xff]   ;;  %2451 = vmatprep.subr.bf16.mxu1 %v2539_v39 }
  0x11   :  { %v993_v5 = vunpack.c.0.s8 %v992_v2  ;;  %v2285_v11 = vld.sshfl [vmem:[%s3031_s0 + $0xc] sm:$0x12 pattern:$0x76325410]  ;;  %v587_v12 = vcombine.high %v2284_v6, %v2284_v6  ;;  %v2292_v13 = vrot.slane %v2284_v6, 9  ;;  %vm1141_vm14 = vcmask 523264  }
  0x12   :  { %v2286_v15 = vld.sshfl [vmem:[%s3031_s0 + $0x10] sm:$0x12 pattern:$0x76325410]  ;;  %v595_v16 = vcombine.high %v2285_v11, %v2285_v11  ;;  %v638_v17 = vrot.slane %v579_v7, 7  ;;  %v2293_v18 = vrot.slane %v2285_v11, 9 }
  0x13   :  { %v603_v19 = vcombine.high %v2286_v15, %v2286_v15  ;;  %v642_v20 = vrot.slane %v587_v12, 7  ;;  %v2294_v21 = vrot.slane %v2286_v15, 9  ;;  %v2692_v22 = vsub.s32 %v993_v5, %v995_v3  ;;  %v2235_v23 = vld.sshfl [vmem:[%s3031_s0] sm:$0x12 pattern:$0x76325410]  ;;  %2452 = vmatpush3.bf16.msra.mxu1 %v2540_v45 }
  0x14   :  { %v639_v24 = vsel %vm2682_vm6, %v2291_v8, %v638_v17  ;;  %v646_v25 = vrot.slane %v595_v16, 7  ;;  %v259_v26 = vcombine.high %v2235_v23, %v2235_v23  ;;  %v2243_v27 = vrot.slane %v2235_v23, 9  ;;  %v2287_v28 = vld.sshfl [vmem:[%s3031_s0 + $0x1c] sm:$0x12 pattern:$0x76325410] }
  0x15   :  { %v643_v29 = vsel %vm2682_vm6, %v2292_v13, %v642_v20  ;;  %v650_v30 = vrot.slane %v603_v19, 7  ;;  %v2288_v31 = vld.sshfl [vmem:[%s3031_s0 + $0x20] sm:$0x12 pattern:$0x76325410]  ;;  %v611_v32 = vcombine.high %v2287_v28, %v2287_v28  ;;  %v2295_v33 = vrot.slane %v2287_v28, 9 }
  0x16   :  { %v647_v34 = vsel %vm2682_vm6, %v2293_v18, %v646_v25  ;;  %v1373_v35 = vcombine.low %v639_v24, %v643_v29  ;;  %v325_v36 = vrot.slane %v259_v26, 7  ;;  %v2289_v37 = vld.sshfl [vmem:[%s3031_s0 + $0x24] sm:$0x12 pattern:$0x76325410]  ;;  %v619_v38 = vcombine.high %v2288_v31, %v2288_v31  ;;  %v2541_v55 = vld [vmem:[#allocation2 + $0xe8] sm:$0xff]  }
  0x17   :  { %vm118_vm8 = vsmask.f32 3336  ;;  %v2714_v40 = vsel %vm2682_vm6, %v2294_v21, %v650_v30  ;;  %v1336_v41 = vcombine.low %v643_v29, %v647_v34  ;;  %v2290_v42 = vld.sshfl [vmem:[%s3031_s0 + $0x28] sm:$0x12 pattern:$0x76325410]  ;;  %v627_v43 = vcombine.high %v2289_v37, %v2289_v37  ;;  %2453 = vmatprep.subr.bf16.mxu1 %v2541_v55 }
  0x18   :  { %v654_v44 = vrot.slane %v611_v32, 7  ;;  %v1374_v46 = vcombine.low %v647_v34, %v2714_v40  ;;  %v1381_v47 = vrot.slane %v1373_v35, %v2692_v22  ;;  %v326_v48 = vsel %vm2682_vm6, %v2243_v27, %v325_v36  ;;  %v2239_v50 = vld.sshfl [vmem:[%s3031_s0 + $0x18] sm:$0x12 pattern:$0x76325410]  ;;  %v2542_v60 = vld [vmem:[#allocation2 + $0xa8] sm:$0xff]   ;;  %vm2762_vm11 = vmor %vm117_vm7, %vm118_vm8 }
  0x19   :  { %v635_v49 = vcombine.high %v2290_v42, %v2290_v42  ;;  %v1335_v51 = vcombine.low %v326_v48, %v639_v24  ;;  %v2727_v52 = vrot.slane %v1336_v41, %v2692_v22  ;;  %v2296_v54 = vrot.slane %v2288_v31, 9  ;;  %v2334_v1 = vld.sshfl [vmem:[%s3031_s0 + $0x14] sm:$0x12 pattern:$0x76325410]  ;;  %v2543_v7 = vld [vmem:[#allocation2 + $0xe0] sm:$0xff]   ;;  %2454 = vmatpush3.bf16.msra.mxu1 %v2542_v60 }
  0x1a   :  { %v655_v53 = vsel %vm2682_vm6, %v2295_v33, %v654_v44  ;;  %v1388_v56 = vrot.slane %v1374_v46, %v2692_v22  ;;  %v658_v57 = vrot.slane %v619_v38, 7  ;;  %v2297_v58 = vrot.slane %v2289_v37, 9  ;;  %v2338_v6 = vld.sshfl [vmem:[%s3031_s0 + $0x2c] sm:$0x12 pattern:$0x76325410]  ;;  %2455 = vmatprep.subr.bf16.mxu1 %v2543_v7 }
  0x1b   :  { %v662_v59 = vrot.slane %v627_v43, 7  ;;  %v1343_v61 = vrot.slane %v1335_v51, %v2692_v22  ;;  %v2298_v62 = vrot.slane %v2290_v42, 9  ;;  %v666_v63 = vrot.slane %v635_v49, 7  ;;  %v2544_v13 = vld [vmem:[#allocation2 + $0xa0] sm:$0xff]   ;;  %v2545_v23 = vld [vmem:[#allocation2 + $0xd8] sm:$0xff]   ;;  %v2547_v51 = vld [vmem:[#allocation2 + $0xd0] sm:$0xff]  }
  0x1c   :  { %v291_v0 = vcombine.high %v2239_v50, %v2239_v50  ;;  %v1389_v2 = vcombine.low %v1381_v47, %v1388_v56  ;;  %v659_v3 = vsel %vm2682_vm6, %v2296_v54, %v658_v57  ;;  %v2247_v5 = vrot.slane %v2239_v50, 9  ;;  %v2267_v21 = vld.sshfl [vmem:[%s3031_s0 + $0x4] sm:$0x13 pattern:$0x76325410]  ;;  %v2546_v29 = vld [vmem:[#allocation2 + $0x98] sm:$0xff]  }
  0x1d   :  { %v663_v4 = vsel %vm2682_vm6, %v2297_v58, %v662_v59  ;;  %vm120_vm9 = vsmask.f32 5392  ;;  %v1351_v8 = vcombine.low %v1343_v61, %v2727_v52  ;;  %v667_v9 = vsel %vm2682_vm6, %v2298_v62, %v666_v63  ;;  %v2268_v28 = vld.sshfl [vmem:[%s3031_s0 + $0x8] sm:$0x13 pattern:$0x76325410]  ;;  %2456 = vmatpush3.bf16.msra.mxu1 %v2544_v13 }
  0x1e   :  { %v1390_v11 = vcombine.low %v655_v53, %v659_v3  ;;  %v341_v12 = vrot.slane %v291_v0, 7  ;;  %1407 = vrot.lane.b32.xlu0 %v1389_v2, %s2648_s15  ;;  %v1391_v14 = vcombine.low %v663_v4, %v667_v9  ;;  %v1353_v15 = vcombine.low %v659_v3, %v663_v4  ;;  %v2269_v33 = vld.sshfl [vmem:[%s3031_s0 + $0xc] sm:$0x13 pattern:$0x76325410]  ;;  %2457 = vmatprep.subr.bf16.mxu1 %v2545_v23  ;;  %v2548_v55 = vld [vmem:[#allocation2 + $0x90] sm:$0xff]   ;;  %vm2787_vm12 = vmor %vm2762_vm11, %vm120_vm9 }
  0x1f   :  { %v916_v16 = vcombine.high %v2334_v1, %v2334_v1  ;;  %v2342_v17 = vrot.slane %v2334_v1, 9  ;;  %v948_v20 = vcombine.high %v2338_v6, %v2338_v6  ;;  %vm122_vm10 = vsmask.f32 7448  ;;  %v2549_v61 = vld [vmem:[#allocation2 + $0xc8] sm:$0xff]   ;;  %v2551_v13 = vld [vmem:[#allocation2 + $0xc0] sm:$0xff]  }
  0x20   :  { %v1398_v18 = vrot.slane %v1390_v11, %v2692_v22  ;;  %v342_v19 = vsel %vm2682_vm6, %v2247_v5, %v341_v12  ;;  %v1405_v24 = vrot.slane %v1391_v14, %v2692_v22  ;;  %v2755_v26 = vrot.slane %v1353_v15, %v2692_v22  ;;  %v2270_v34 = vld.sshfl [vmem:[%s3031_s0 + $0x10] sm:$0x13 pattern:$0x76325410]  ;;  %vm2800_vm13 = vmor %vm2787_vm12, %vm122_vm10  ;;  %v2576_v7 = vld [vmem:[#allocation2 + $0x20] sm:$0xff]  }
  0x21   :  { %v1352_v25 = vcombine.low %v342_v19, %v655_v53  ;;  %v963_v27 = vrot.slane %v916_v16, 7  ;;  %v2346_v30 = vrot.slane %v2338_v6, 9  ;;  %v979_v31 = vrot.slane %v948_v20, 7  ;;  %2458 = vmatpush3.bf16.msra.mxu1 %v2546_v29  ;;  %v2550_v6 = vld [vmem:[#allocation2 + $0x88] sm:$0xff]  }
  0x22   :  { %1369 = vrot.lane.b32.xlu0 %v1351_v8, %s2648_s15  ;;  %v1406_v35 = vcombine.low %v1398_v18, %v1405_v24  ;;  %v387_v38 = vcombine.high %v2267_v21, %v2267_v21  ;;  %v395_v42 = vcombine.high %v2268_v28, %v2268_v28  ;;  %v403_v45 = vcombine.high %v2269_v33, %v2269_v33  ;;  %v2272_v32 = vld.sshfl [vmem:[%s3031_s0 + $0x20] sm:$0x13 pattern:$0x76325410] }
  0x23   :  { %v1360_v36 = vrot.slane %v1352_v25, %v2692_v22  ;;  %v964_v37 = vsel %vm2682_vm6, %v2342_v17, %v963_v27  ;;  %v980_v41 = vsel %vm2682_vm6, %v2346_v30, %v979_v31  ;;  %v411_v46 = vcombine.high %v2270_v34, %v2270_v34  ;;  %2459 = vmatprep.subr.bf16.mxu1 %v2547_v51  ;;  %v2271_v27 = vld.sshfl [vmem:[%s3031_s0 + $0x1c] sm:$0x13 pattern:$0x76325410] }
  0x24   :  { %v1935_v39 = vcombine.low %v2714_v40, %v964_v37  ;;  %1409 = vrot.lane.b32.xlu1 %v1406_v35, %s2648_s15  ;;  %v1952_v44 = vcombine.low %v667_v9, %v980_v41  ;;  %v445_v48 = vshrl.u32 %v2267_v21, 16  ;;  %v448_v49 = vshll.u32 %v2267_v21, 16 }
  0x25   :  { %v1368_v43 = vcombine.low %v1360_v36, %v2755_v26  ;;  %v454_v50 = vshll.u32 %v387_v38, 16  ;;  %v459_v10 = vshrl.u32 %v2268_v28, 16  ;;  %v462_v53 = vshll.u32 %v2268_v28, 16  ;;  %2460 = vmatpush3.bf16.msra.mxu1 %v2548_v55  ;;  %v2552_v28 = vld [vmem:[#allocation2 + $0x80] sm:$0xff]  }
  0x26   :  { %v1949_v47 = vrot.slane %v1935_v39, %v2692_v22  ;;  %v1966_v40 = vrot.slane %v1952_v44, %v2692_v22  ;;  %v468_v54 = vshll.u32 %v395_v42, 16  ;;  %v447_v58 = vrot.slane %v445_v48, 6  ;;  %2461 = vmatprep.subr.bf16.mxu1 %v2549_v61  ;;  %v2273_v42 = vld.sshfl [vmem:[%s3031_s0 + $0x24] sm:$0x13 pattern:$0x76325410] }
  0x27   :  { %v450_v59 = vrot.slane %v448_v49, 7  ;;  %v456_v60 = vrot.slane %v454_v50, 7  ;;  %v461_v63 = vrot.slane %v459_v10, 6  ;;  %v464_v0 = vrot.slane %v462_v53, 7 }
  0x28   :  { %v1950_v56 = vcombine.low %v2727_v52, %v1949_v47  ;;  %1371 = vrot.lane.b32.xlu1 %v1368_v43, %s2648_s15  ;;  %v1967_v62 = vcombine.low %v2755_v26, %v1966_v40  ;;  %v470_v1 = vrot.slane %v468_v54, 7  ;;  %v2227_v52 = vld.sshfl [vmem:[%s3031_s0] sm:$0x13 pattern:$0x76325410]  ;;  %v473_v3 = vshrl.u32 %v2269_v33, 16 }
  0x29   :  { %v451_v2 = vor.u32 %v450_v59, %v447_v58  ;;  %v476_v4 = vshll.u32 %v2269_v33, 16  ;;  %v482_v5 = vshll.u32 %v403_v45, 16  ;;  %v465_v8 = vor.u32 %v464_v0, %v461_v63  ;;  %2462 = vmatpush3.bf16.msra.mxu1 %v2550_v6  ;;  %v2274_v47 = vld.sshfl [vmem:[%s3031_s0 + $0x28] sm:$0x13 pattern:$0x76325410] }
  0x2a   :  { %1968 = vrot.lane.b32.xlu0 %v1950_v56, %s2648_s15  ;;  %v487_v9 = vshrl.u32 %v2270_v34, 16  ;;  %v490_v11 = vshll.u32 %v2270_v34, 16  ;;  %v496_v12 = vshll.u32 %v411_v46, 16  ;;  %v475_v15 = vrot.slane %v473_v3, 6  ;;  %2463 = vmatprep.subr.bf16.mxu1 %v2551_v13  ;;  %v2553_v34 = vld [vmem:[#allocation2 + $0x1f8] sm:$0xff]  }
  0x2b   :  { %v452_v14 = vrot.slane %v451_v2, 2  ;;  %v478_v16 = vrot.slane %v476_v4, 7  ;;  %v484_v17 = vrot.slane %v482_v5, 7  ;;  %v466_v18 = vrot.slane %v465_v8, 2 }
  0x2c   :  { %1970 = vrot.lane.b32.xlu1 %v1967_v62, %s2648_s15  ;;  %v489_v19 = vrot.slane %v487_v9, 6  ;;  %v492_v20 = vrot.slane %v490_v11, 7  ;;  %v498_v21 = vrot.slane %v496_v12, 7  ;;  %v60_v25 = vcombine.high %v2227_v52, %v2227_v52 }
  0x2d   :  { %v457_v23 = vsel %vm2800_vm13, %v452_v14, %v456_v60  ;;  %v479_v24 = vor.u32 %v478_v16, %v475_v15  ;;  %v125_v26 = vshrl.u32 %v2227_v52, 16  ;;  %v471_v29 = vsel %vm2800_vm13, %v466_v18, %v470_v1  ;;  %2464 = vmatpush3.bf16.msra.mxu1 %v2552_v28  ;;  %v2231_v13 = vld.sshfl [vmem:[%s3031_s0 + $0x18] sm:$0x13 pattern:$0x76325410] }
  0x2e   :  { %v493_v30 = vor.u32 %v492_v20, %v489_v19  ;;  %v128_v31 = vshll.u32 %v2227_v52, 16  ;;  %v419_v33 = vcombine.high %v2271_v27, %v2271_v27  ;;  %v1103_v36 = vcombine.low %v457_v23, %v471_v29  ;;  %2505 = vmatprep.subr.bf16.mxu1 %v2553_v34 }
  0x2f   :  { %v480_v35 = vrot.slane %v479_v24, 2  ;;  %v127_v37 = vrot.slane %v125_v26, 6  ;;  %v134_v38 = vshll.u32 %v60_v25, 16  ;;  %v427_v43 = vcombine.high %v2272_v32, %v2272_v32 }
  0x30   :  { %v494_v39 = vrot.slane %v493_v30, 2  ;;  %v130_v41 = vrot.slane %v128_v31, 7  ;;  %v1111_v45 = vrot.slane %v1103_v36, %v2692_v22  ;;  %v435_v48 = vcombine.high %v2273_v42, %v2273_v42 }
  0x31   :  { %v485_v44 = vsel %vm2800_vm13, %v480_v35, %v484_v17  ;;  %v136_v46 = vrot.slane %v134_v38, 7  ;;  %v443_v40 = vcombine.high %v2274_v47, %v2274_v47  ;;  %v501_v53 = vshrl.u32 %v2271_v27, 16 }
  0x32   :  { %v2826_v49 = vsel %vm2800_vm13, %v494_v39, %v498_v21  ;;  %v131_v50 = vor.u32 %v130_v41, %v127_v37  ;;  %v1024_v51 = vcombine.low %v471_v29, %v485_v44  ;;  %v504_v54 = vshll.u32 %v2271_v27, 16 }
  0x33   :  { %v1104_v10 = vcombine.low %v485_v44, %v2826_v49  ;;  %v510_v55 = vshll.u32 %v419_v33, 16  ;;  %v515_v58 = vshrl.u32 %v2272_v32, 16  ;;  %v518_v59 = vshll.u32 %v2272_v32, 16 }
  0x34   :  { %v132_v56 = vrot.slane %v131_v50, 2  ;;  %v2830_v57 = vrot.slane %v1024_v51, %v2692_v22  ;;  %v503_v61 = vrot.slane %v501_v53, 6  ;;  %v506_v62 = vrot.slane %v504_v54, 7 }
  0x35   :  { %v1118_v60 = vrot.slane %v1104_v10, %v2692_v22  ;;  %v512_v63 = vrot.slane %v510_v55, 7  ;;  %v517_v1 = vrot.slane %v515_v58, 6  ;;  %v520_v52 = vrot.slane %v518_v59, 7 }
  0x36   :  { %v137_v0 = vsel %vm2800_vm13, %v132_v56, %v136_v46  ;;  %v524_v2 = vshll.u32 %v427_v43, 16  ;;  %v507_v5 = vor.u32 %v506_v62, %v503_v61  ;;  %v529_v6 = vshrl.u32 %v2273_v42, 16 }
  0x37   :  { %v2835_v3 = vcombine.low %v1111_v45, %v1118_v60  ;;  %v1023_v4 = vcombine.low %v137_v0, %v457_v23  ;;  %v521_v8 = vor.u32 %v520_v52, %v517_v1  ;;  %v532_v11 = vshll.u32 %v2273_v42, 16  ;;  %v2318_v23 = vld.sshfl [vmem:[%s3031_s0 + $0x14] sm:$0x13 pattern:$0x76325410] }
  0x38   :  { %v526_v9 = vrot.slane %v524_v2, 7  ;;  %v538_v12 = vshll.u32 %v435_v48, 16  ;;  %v508_v15 = vrot.slane %v507_v5, 2  ;;  %v531_v16 = vrot.slane %v529_v6, 6 }
  0x39   :  { %1137 = vrot.lane.b32.xlu0 %v2835_v3, %s2648_s15  ;;  %v1031_v14 = vrot.slane %v1023_v4, %v2692_v22  ;;  %v543_v17 = vshrl.u32 %v2274_v47, 16  ;;  %v522_v18 = vrot.slane %v521_v8, 2  ;;  %v534_v19 = vrot.slane %v532_v11, 7 }
  0x3a   :  { %v540_v20 = vrot.slane %v538_v12, 7  ;;  %v546_v21 = vshll.u32 %v2274_v47, 16  ;;  %v513_v25 = vsel %vm2800_vm13, %v508_v15, %v512_v63  ;;  %v552_v27 = vshll.u32 %v443_v40, 16 }
  0x3b   :  { %v2847_v24 = vcombine.low %v1031_v14, %v2830_v57  ;;  %v545_v26 = vrot.slane %v543_v17, 6  ;;  %v527_v28 = vsel %vm2800_vm13, %v522_v18, %v526_v9  ;;  %v535_v29 = vor.u32 %v534_v19, %v531_v16  ;;  %v2322_v60 = vld.sshfl [vmem:[%s3031_s0 + $0x2c] sm:$0x13 pattern:$0x76325410]  ;;  %v2570_v16 = vld [vmem:[#allocation2 + $0x38] sm:$0xff]  }
  0x3c   :  { %v548_v30 = vrot.slane %v546_v21, 7  ;;  %v92_v31 = vcombine.high %v2231_v13, %v2231_v13  ;;  %v554_v32 = vrot.slane %v552_v27, 7  ;;  %v181_v33 = vshrl.u32 %v2231_v13, 16  ;;  %v2571_v21 = vld [vmem:[#allocation2 + $0x70] sm:$0xff]   ;;  %v2573_v27 = vld [vmem:[#allocation2 + $0x68] sm:$0xff]  }
  0x3d   :  { %1057 = vrot.lane.b32.xlu1 %v2847_v24, %s2648_s15  ;;  %v184_v34 = vshll.u32 %v2231_v13, 16  ;;  %v536_v35 = vrot.slane %v535_v29, 2  ;;  %v724_v38 = vcombine.high %v2318_v23, %v2318_v23  ;;  %v1120_v39 = vcombine.low %v513_v25, %v527_v28  ;;  %v2569_v13 = vld [vmem:[#allocation2 + $0x78] sm:$0xff]   ;;  %v2574_v29 = vld [vmem:[#allocation2 + $0x28] sm:$0xff]  }
  0x3e   :  { %v549_v36 = vor.u32 %v548_v30, %v545_v26  ;;  %v190_v37 = vshll.u32 %v92_v31, 16  ;;  %v183_v41 = vrot.slane %v181_v33, 6  ;;  %v800_v43 = vshrl.u32 %v2318_v23, 16  ;;  %2421 = vmatprep.subr.bf16.mxu0 %v2569_v13  ;;  %v2572_v26 = vld [vmem:[#allocation2 + $0x30] sm:$0xff]   ;;  %v2575_v30 = vld [vmem:[#allocation2 + $0x60] sm:$0xff]  }
  0x3f   :  { %v186_v42 = vrot.slane %v184_v34, 7  ;;  %v541_v44 = vsel %vm2800_vm13, %v536_v35, %v540_v20  ;;  %v803_v47 = vshll.u32 %v2318_v23, 16  ;;  %v809_v51 = vshll.u32 %v724_v38, 16  ;;  %2422 = vmatpush3.bf16.msra.mxu0 %v2570_v16  ;;  %v2579_v33 = vld [vmem:[#allocation2 + $0x50] sm:$0xff]   ;;  %v2582_v35 = vld [vmem:[#allocation2 + $0x8] sm:$0xff]   ;;  %v2587_v38 = vld [vmem:[#allocation2 + $0x178] sm:$0xff]  }
  0x40   :  { %v550_v45 = vrot.slane %v549_v36, 2  ;;  %v192_v46 = vrot.slane %v190_v37, 7  ;;  %v802_v50 = vrot.slane %v800_v43, 6  ;;  %v1041_v10 = vcombine.low %v527_v28, %v541_v44  ;;  %2423 = vmatprep.subr.bf16.mxu0 %v2571_v21  ;;  %v2580_v34 = vld [vmem:[#allocation2 + $0x10] sm:$0xff]   ;;  %v2583_v36 = vld [vmem:[#allocation2 + $0x40] sm:$0xff]  }
  0x41   :  { %v187_v48 = vor.u32 %v186_v42, %v183_v41  ;;  %v805_v53 = vrot.slane %v803_v47, 7  ;;  %v1128_v55 = vrot.slane %v1120_v39, %v2692_v22  ;;  %v811_v58 = vrot.slane %v809_v51, 7  ;;  %v2584_v37 = vld [vmem:[#allocation2] sm:$0xff]   ;;  %v2554_v42 = vld [vmem:[#allocation2 + $0x1b8] sm:$0xff]   ;;  %v2556_v47 = vld [vmem:[#allocation2 + $0x1b0] sm:$0xff]  }
  0x42   :  { %v555_v40 = vsel %vm2800_vm13, %v550_v45, %v554_v32  ;;  %v756_v63 = vcombine.high %v2322_v60, %v2322_v60  ;;  %v856_v0 = vshrl.u32 %v2322_v60, 16  ;;  %v1055_v52 = vrot.slane %v1041_v10, %v2692_v22  ;;  %v2578_v32 = vld [vmem:[#allocation2 + $0x18] sm:$0xff]   ;;  %v2558_v51 = vld [vmem:[#allocation2 + $0x1a8] sm:$0xff]   ;;  %v2591_v13 = vld [vmem:[#allocation2 + $0x170] sm:$0xff]  }
  0x43   :  { %v1121_v54 = vcombine.low %v541_v44, %v555_v40  ;;  %v188_v56 = vrot.slane %v187_v48, 2  ;;  %v806_v59 = vor.u32 %v805_v53, %v802_v50  ;;  %v859_v4 = vshll.u32 %v2322_v60, 16  ;;  %2424 = vmatpush3.bf16.msra.mxu0 %v2572_v26  ;;  %v2555_v44 = vld [vmem:[#allocation2 + $0x1f0] sm:$0xff]   ;;  %v2557_v50 = vld [vmem:[#allocation2 + $0x1e8] sm:$0xff]   ;;  %v2595_v26 = vld [vmem:[#allocation2 + $0x160] sm:$0xff]  }
  0x44   :  { %v858_v6 = vrot.slane %v856_v0, 6  ;;  %v865_v8 = vshll.u32 %v756_v63, 16  ;;  %2425 = vmatprep.subr.bf16.mxu0 %v2573_v27  ;;  %v2563_v60 = vld [vmem:[#allocation2 + $0x1d0] sm:$0xff]   ;;  %v2565_v0 = vld [vmem:[#allocation2 + $0x1c8] sm:$0xff]  }
  0x45   :  { %v1135_v61 = vrot.slane %v1121_v54, %v2692_v22  ;;  %v193_v62 = vsel %vm2800_vm13, %v188_v56, %v192_v46  ;;  %v807_v2 = vrot.slane %v806_v59, 2  ;;  %v861_v12 = vrot.slane %v859_v4, 7  ;;  %v2560_v54 = vld [vmem:[#allocation2 + $0x1a0] sm:$0xff]   ;;  %v2562_v59 = vld [vmem:[#allocation2 + $0x198] sm:$0xff]   ;;  %v2564_v63 = vld [vmem:[#allocation2 + $0x190] sm:$0xff]  }
  0x46   :  { %v1040_v1 = vcombine.low %v193_v62, %v513_v25  ;;  %v867_v15 = vrot.slane %v865_v8, 7  ;;  %v2613_v56 = vld.sshfl [vmem:[%s3031_s0 + $0x4] sm:$0xf pattern:$0x76325410] }
  0x47   :  { %v2867_v5 = vcombine.low %v1128_v55, %v1135_v61  ;;  %v812_v11 = vsel %vm2800_vm13, %v807_v2, %v811_v58  ;;  %v862_v18 = vor.u32 %v861_v12, %v858_v6  ;;  %2426 = vmatpush3.bf16.msra.mxu0 %v2574_v29  ;;  %v2561_v55 = vld [vmem:[#allocation2 + $0x1d8] sm:$0xff]   ;;  %v2614_v58 = vld.sshfl [vmem:[%s3031_s0 + $0xc] sm:$0xf pattern:$0x76325410] }
  0x48   :  { %v1048_v9 = vrot.slane %v1040_v1, %v2692_v22  ;;  %v1711_v14 = vcombine.low %v2826_v49, %v812_v11  ;;  %2427 = vmatprep.subr.bf16.mxu0 %v2575_v30  ;;  %v2615_v61 = vld.sshfl [vmem:[%s3031_s0] sm:$0xf pattern:$0x76325410]  ;;  %v1085_v1 = vcombine.low %v2613_v56, %v2614_v58  ;;  %v2597_v29 = vld [vmem:[#allocation2 + $0x158] sm:$0xff]  }
  0x49   :  { %1139 = vrot.lane.b32.xlu0 %v2867_v5, %s2648_s15  ;;  %v863_v20 = vrot.slane %v862_v18, 2  ;;  %v2616_v62 = vld.sshfl [vmem:[%s3031_s0 + $0x8] sm:$0xf pattern:$0x76325410]  ;;  %v2568_v11 = vld [vmem:[#allocation2 + $0x180] sm:$0xff]  }
  0x4a   :  { %v2875_v17 = vcombine.low %v1048_v9, %v1055_v52  ;;  %v1725_v19 = vrot.slane %v1711_v14, %v2692_v22  ;;  %v1005_v8 = vcombine.low %v2615_v61, %v2616_v62  ;;  %v2590_v9 = vld [vmem:[#allocation2 + $0x138] sm:$0xff]   ;;  %v2618_v16 = vld.sshfl [vmem:[%s3031_s0 + $0x24] sm:$0xf pattern:$0x76325410] }
  0x4b   :  { %v868_v25 = vsel %vm2800_vm13, %v863_v20, %v867_v15  ;;  %2428 = vmatpush3.bf16.msra.mxu0 %v2576_v7  ;;  %v2617_v15 = vld.sshfl [vmem:[%s3031_s0 + $0x1c] sm:$0xf pattern:$0x76325410]  ;;  %v2593_v18 = vld [vmem:[#allocation2 + $0x168] sm:$0xff]  }
  0x4c   :  { %1059 = vrot.lane.b32.xlu1 %v2875_v17, %s2648_s15  ;;  %v1726_v23 = vcombine.low %v2830_v57, %v1725_v19  ;;  %v1728_v49 = vcombine.low %v555_v40, %v868_v25  ;;  %v2577_v57 = vld [vmem:[#allocation2 + $0x58] sm:$0xff]   ;;  %v2620_v20 = vld.sshfl [vmem:[%s3031_s0 + $0x20] sm:$0xf pattern:$0x76325410]  ;;  %v1102_v27 = vcombine.low %v2617_v15, %v2618_v16 }
  0x4d   :  { %2429 = vmatprep.subr.bf16.mxu0 %v2577_v57  ;;  %v2619_v19 = vld.sshfl [vmem:[%s3031_s0 + $0x18] sm:$0xf pattern:$0x76325410]  ;;  %v2965_v15 = vld [vmem:[%s3033_s2] ss:$0 sm:$0xff] }
  0x4e   :  { %1744 = vrot.lane.b32.xlu0 %v1726_v23, %s2648_s15  ;;  %v1742_v28 = vrot.slane %v1728_v49, %v2692_v22  ;;  %v2581_v22 = vld [vmem:[#allocation2 + $0x48] sm:$0xff]   ;;  %v2622_v49 = vld.sshfl [vmem:[%s3031_s0 + $0x10] sm:$0xf pattern:$0x76325410]  ;;  %v2598_v57 = vld [vmem:[#allocation2 + $0x118] sm:$0xff]  }
  0x4f   :  { %2430 = vmatpush3.bf16.msra.mxu0 %v2578_v32  ;;  %v2621_v25 = vld.sshfl [vmem:[%s3031_s0 + $0x8] sm:$0xf pattern:$0x76325410] }
  0x50   :  { %v2885_v31 = vcombine.low %v1055_v52, %v1742_v28  ;;  %2431 = vmatprep.subr.bf16.mxu0 %v2579_v33  ;;  %v2566_v52 = vld [vmem:[#allocation2 + $0x188] sm:$0xff]   ;;  %v2596_v28 = vld [vmem:[#allocation2 + $0x120] sm:$0xff]   ;;  %v1692_v33 = vcombine.low %v2621_v25, %v2622_v49 }
  0x52   :  { %1746 = vrot.lane.b32.xlu1 %v2885_v31, %s2648_s15 }
  0x53   :  { %2432 = vmatpush3.bf16.msra.mxu0 %v2580_v34  ;;  %v2599_v34 = vld [vmem:[#allocation2 + $0x150] sm:$0xff]  }
  0x54   :  { %2433 = vmatprep.subr.bf16.mxu0 %v2581_v22 }
  0x57   :  { %2434 = vmatpush3.bf16.msra.mxu0 %v2582_v35 }
  0x58   :  { %2435 = vmatprep.subr.bf16.mxu0 %v2583_v36  ;;  %v2600_v36 = vld [vmem:[#allocation2 + $0x110] sm:$0xff]  }
  0x5b   :  { %2436 = vmatpush3.bf16.msra.mxu0 %v2584_v37 }
  0x5c   :  { %2477 = vmatprep.subr.bf16.mxu0 %v2587_v38  ;;  %v2605_v38 = vld [vmem:[#allocation2 + $0x148] sm:$0xff]  }
  0x90   :  { %v1408_v39 = vpop.permute.xlu0 %1407 }
  0x91   :  { %v2891_v41 = vsel %vm1141_vm14, %v2835_v3, %v1408_v39  ;;  %v2623_v39 = vld.sshfl [vmem:[%s3031_s0 + $0x20] sm:$0xf pattern:$0x76325410] }
  0x92   :  { %1588 = vmatprep.mubr.bf16.mxu1 %v2891_v41 }
  0x94   :  { %v1370_v43 = vpop.permute.xlu0 %1369 }
  0x95   :  { %v1413_v45 = vsel %vm1141_vm14, %v2847_v24, %v1370_v43  ;;  %v2559_v24 = vld [vmem:[#allocation2 + $0x1e0] sm:$0xff]  }
  0x96   :  { %1589 = vmatmul.mubr.bf16.vlgmr.msra.gmra.mxu1 %v1413_v45  ;;  %v1410_v46 = vpop.permute.xlu1 %1409  ;;  %v2607_v43 = vld [vmem:[#allocation2 + $0x140] sm:$0xff]  }
  0x97   :  { %2506 = vmatpush3.bf16.msra.mxu1 %v2554_v42  ;;  %v2898_v48 = vsel %vm1141_vm14, %v2867_v5, %v1410_v46  ;;  %v2567_v5 = vld [vmem:[#allocation2 + $0x1c0] sm:$0xff]   ;;  %v2606_v42 = vld [vmem:[#allocation2 + $0x108] sm:$0xff]  }
  0x98   :  { %2507 = vmatprep.subr.bf16.mxu1 %v2555_v44  ;;  %1596 = vmatprep.mubr.bf16.mxu1 %v2898_v48  ;;  %v2608_v44 = vld [vmem:[#allocation2 + $0x100] sm:$0xff]  }
  0x9a   :  { %v1372_v3 = vpop.permute.xlu1 %1371 }
  0x9b   :  { %2508 = vmatpush3.bf16.msra.mxu1 %v2556_v47  ;;  %v1417_v40 = vsel %vm1141_vm14, %v2875_v17, %v1372_v3  ;;  %v2592_v17 = vld [vmem:[#allocation2 + $0x130] sm:$0xff]  }
  0x9c   :  { %v1969_v10 = vpop.permute.xlu0 %1968  ;;  %2509 = vmatprep.subr.bf16.mxu1 %v2557_v50 }
  0x9d   :  { %v1974_v53 = vsel %vm1141_vm14, %v1726_v23, %v1969_v10  ;;  %v2594_v23 = vld [vmem:[#allocation2 + $0x128] sm:$0xff]  }
  0x9e   :  { %1597 = vmatmul.mubr.bf16.gmra.mxu1 %v1417_v40  ;;  %v1971_v2 = vpop.permute.xlu1 %1970 }
  0x9f   :  { %2510 = vmatpush3.bf16.msra.mxu1 %v2558_v51  ;;  %2141 = vmatprep.mubr.bf16.mxu1 %v1974_v53  ;;  %v1978_v21 = vsel %vm1141_vm14, %v2885_v31, %v1971_v2  ;;  %v1022_v31 = vcombine.low %v2619_v19, %v2620_v20 }
  0xa0   :  { %2511 = vmatprep.subr.bf16.mxu1 %v2559_v24 }
  0xa3   :  { %2512 = vmatpush3.bf16.msra.mxu1 %v2560_v54 }
  0xa4   :  { %2513 = vmatprep.subr.bf16.mxu1 %v2561_v55 }
  0xa7   :  { %2514 = vmatpush3.bf16.msra.mxu1 %v2562_v59 }
  0xa8   :  { %2515 = vmatprep.subr.bf16.mxu1 %v2563_v60 }
  0xab   :  { %2516 = vmatpush3.bf16.msra.mxu1 %v2564_v63  ;;  %v1138_v4 = vpop.permute.xlu0 %1137 }
  0xac   :  { %2517 = vmatprep.subr.bf16.mxu1 %v2565_v0  ;;  %v2917_v6 = vsel %vm1141_vm14, %v1085_v1, %v1138_v4 }
  0xad   :  { %1318 = vmatprep.mubr.bf16.mxu0 %v2917_v6 }
  0xaf   :  { %2518 = vmatpush3.bf16.msra.mxu1 %v2566_v52  ;;  %v1058_v12 = vpop.permute.xlu1 %1057 }
  0xb0   :  { %2519 = vmatprep.subr.bf16.mxu1 %v2567_v5  ;;  %v1144_v14 = vsel %vm1141_vm14, %v1005_v8, %v1058_v12 }
  0xb1   :  { %1319 = vmatmul.mubr.bf16.vlgmr.msra.gmra.mxu0 %v1144_v14 }
  0xb2   :  { %2478 = vmatpush3.bf16.msra.mxu0 %v2590_v9 }
  0xb3   :  { %2520 = vmatpush3.bf16.msra.mxu1 %v2568_v11  ;;  %2479 = vmatprep.subr.bf16.mxu0 %v2591_v13 }
  0xb6   :  { %2142 = vmatmul.mubr.bf16.vlgmr.msra.gmra.mxu1 %v2891_v41  ;;  %2480 = vmatpush3.bf16.msra.mxu0 %v2592_v17  ;;  %v2624_v41 = vld.sshfl [vmem:[%s3031_s0 + $0x28] sm:$0xf pattern:$0x76325410] }
  0xb7   :  { %2149 = vmatprep.mubr.bf16.mxu1 %v1978_v21  ;;  %2481 = vmatprep.subr.bf16.mxu0 %v2593_v18  ;;  %v1709_v45 = vcombine.low %v2623_v39, %v2624_v41 }
  0xba   :  { %2482 = vmatpush3.bf16.msra.mxu0 %v2594_v23 }
  0xbb   :  { %2483 = vmatprep.subr.bf16.mxu0 %v2595_v26  ;;  %v1140_v30 = vpop.permute.xlu0 %1139 }
  0xbc   :  { %v1156_v7 = vsel %vm1141_vm14, %v1102_v27, %v1140_v30 }
  0xbd   :  { %1326 = vmatprep.mubr.bf16.mxu0 %v1156_v7 }
  0xbe   :  { %2150 = vmatmul.mubr.bf16.gmra.mxu1 %v2898_v48  ;;  %2484 = vmatpush3.bf16.msra.mxu0 %v2596_v28  ;;  %v1060_v32 = vpop.permute.xlu1 %1059 }
  0xbf   :  { %2485 = vmatprep.subr.bf16.mxu0 %v2597_v29  ;;  %v1148_v22 = vsel %vm1141_vm14, %v1022_v31, %v1060_v32 }
  0xc0   :  { %1327 = vmatmul.mubr.bf16.gmra.mxu0 %v1148_v22  ;;  %v1745_v35 = vpop.permute.xlu0 %1744 }
  0xc1   :  { %v1750_v37 = vsel %vm1141_vm14, %v1692_v33, %v1745_v35 }
  0xc2   :  { %2486 = vmatpush3.bf16.msra.mxu0 %v2598_v57  ;;  %1917 = vmatprep.mubr.bf16.mxu0 %v1750_v37 }
  0xc3   :  { %2487 = vmatprep.subr.bf16.mxu0 %v2599_v34 }
  0xc4   :  { %v1747_v46 = vpop.permute.xlu1 %1746 }
  0xc5   :  { %v1754_v47 = vsel %vm1141_vm14, %v1709_v45, %v1747_v46 }
  0xc6   :  { %2488 = vmatpush3.bf16.msra.mxu0 %v2600_v36 }
  0xc7   :  { %2489 = vmatprep.subr.bf16.mxu0 %v2605_v38 }
  0xca   :  { %2490 = vmatpush3.bf16.msra.mxu0 %v2606_v42 }
  0xcb   :  { %2491 = vmatprep.subr.bf16.mxu0 %v2607_v43 }
  0xce   :  { %2492 = vmatpush3.bf16.msra.mxu0 %v2608_v44 }
  0xd1   :  { %1918 = vmatmul.mubr.bf16.vlgmr.msra.gmra.mxu0 %v2917_v6 }
  0xd2   :  { %1925 = vmatprep.mubr.bf16.mxu0 %v1754_v47 }
  0xd9   :  { %1926 = vmatmul.mubr.bf16.gmra.mxu0 %v1156_v7 }
 0x156   :  { %v2465_v48 = vpop.f32.mrf.mxu1 }
 0x158   :  { %v2466_v50 = vpop.f32.mrf.mxu1 }
 0x159   :  { %v2467_v3 = vadd.f32 %v2466_v50, %v2465_v48 }
 0x15a   :  { %v2468_v51 = vpop.f32.mrf.mxu1 }
 0x15b   :  { %1609 = vrot.lane.b32.xlu0 %v2467_v3, %s2648_s15 }
 0x15c   :  { %v2469_v40 = vpop.f32.mrf.mxu1 }
 0x15d   :  { %v2470_v10 = vadd.f32 %v2469_v40, %v2468_v51 }
 0x15e   :  { %v2471_v24 = vpop.f32.mrf.mxu1 }
 0x15f   :  { %1611 = vrot.lane.b32.xlu1 %v2470_v10, %s2648_s15 }
 0x160   :  { %v2472_v53 = vpop.f32.mrf.mxu1 }
 0x161   :  { %v2473_v54 = vadd.f32 %v2472_v53, %v2471_v24 }
 0x162   :  { %v2474_v55 = vpop.f32.mrf.mxu1 }
 0x163   :  { %1613 = vrot.lane.b32.xlu0 %v2473_v54, %s2648_s15 }
 0x164   :  { %v2475_v56 = vpop.f32.mrf.mxu1 }
 0x165   :  { %v2476_v58 = vadd.f32 %v2475_v56, %v2474_v55 }
 0x167   :  { %1615 = vrot.lane.b32.xlu1 %v2476_v58, %s2648_s15 }
 0x171   :  { %v2437_v8 = vpop.f32.mrf.mxu0 }
 0x173   :  { %v2438_v9 = vpop.f32.mrf.mxu0 }
 0x174   :  { %v2439_v14 = vadd.f32 %v2438_v9, %v2437_v8 }
 0x175   :  { %v2440_v11 = vpop.f32.mrf.mxu0 }
 0x176   :  { %v2521_v59 = vpop.f32.mrf.mxu1 }
 0x177   :  { %v2441_v12 = vpop.f32.mrf.mxu0 }
 0x178   :  { %v2522_v60 = vpop.f32.mrf.mxu1  ;;  %v2442_v20 = vadd.f32 %v2441_v12, %v2440_v11 }
 0x179   :  { %v2523_v61 = vadd.f32 %v2522_v60, %v2521_v59 }
 0x17a   :  { %v2524_v62 = vpop.f32.mrf.mxu1 }
 0x17b   :  { %2162 = vrot.lane.b32.xlu0 %v2523_v61, %s2648_s15 }
 0x17c   :  { %v2525_v63 = vpop.f32.mrf.mxu1 }
 0x17d   :  { %v2526_v0 = vadd.f32 %v2525_v63, %v2524_v62 }
 0x17e   :  { %v2527_v1 = vpop.f32.mrf.mxu1 }
 0x17f   :  { %2164 = vrot.lane.b32.xlu1 %v2526_v0, %s2648_s15 }
 0x180   :  { %v2528_v52 = vpop.f32.mrf.mxu1  ;;  %v2443_v13 = vpop.f32.mrf.mxu0 }
 0x181   :  { %v2529_v2 = vadd.f32 %v2528_v52, %v2527_v1 }
 0x182   :  { %v2530_v4 = vpop.f32.mrf.mxu1  ;;  %v2444_v16 = vpop.f32.mrf.mxu0 }
 0x183   :  { %2166 = vrot.lane.b32.xlu0 %v2529_v2, %s2648_s15  ;;  %v2445_v49 = vadd.f32 %v2444_v16, %v2443_v13 }
 0x184   :  { %v2531_v5 = vpop.f32.mrf.mxu1  ;;  %v2446_v21 = vpop.f32.mrf.mxu0 }
 0x185   :  { %v2532_v6 = vadd.f32 %v2531_v5, %v2530_v4 }
 0x186   :  { %v2447_v30 = vpop.f32.mrf.mxu0 }
 0x187   :  { %2168 = vrot.lane.b32.xlu1 %v2532_v6, %s2648_s15  ;;  %v2448_v32 = vadd.f32 %v2447_v30, %v2446_v21 }
 0x191   :  { %v2493_v41 = vpop.f32.mrf.mxu0 }
 0x193   :  { %v2494_v47 = vpop.f32.mrf.mxu0 }
 0x194   :  { %v2495_v24 = vadd.f32 %v2494_v47, %v2493_v41 }
 0x195   :  { %v2496_v51 = vpop.f32.mrf.mxu0 }
 0x197   :  { %v2497_v40 = vpop.f32.mrf.mxu0 }
 0x198   :  { %v2498_v58 = vadd.f32 %v2497_v40, %v2496_v51 }
 0x199   :  { %v2499_v10 = vpop.f32.mrf.mxu0 }
 0x19b   :  { %v2500_v53 = vpop.f32.mrf.mxu0 }
 0x19c   :  { %v2501_v52 = vadd.f32 %v2500_v53, %v2499_v10 }
 0x19d   :  { %v2502_v59 = vpop.f32.mrf.mxu0 }
 0x19f   :  { %v2503_v2 = vpop.f32.mrf.mxu0 }
 0x1a0   :  { %v2504_v13 = vadd.f32 %v2503_v2, %v2502_v59 }
 0x1cd   :  { %v1610_v17 = vpop.permute.xlu0 %1609 }
 0x1ce   :  { %v1621_v18 = vsel %vm1141_vm14, %v2439_v14, %v1610_v17 }
 0x1cf   :  { %v1632_v19 = vadd.f32 %v2965_v15, %v1621_v18 }
 0x1d1   :  { %v1636_v23 = vmax.f32 %v1632_v19, 0.0  ;;  %v1612_v25 = vpop.permute.xlu1 %1611 }
 0x1d2   :  { %v1622_v26 = vsel %vm1141_vm14, %v2442_v20, %v1612_v25 }
 0x1d3   :  { %v1644_v27 = vcombine.high %v1636_v23, %v1636_v23  ;;  %v1652_v28 = vpack.c.bf16 %v1636_v23, %v1636_v23  ;;  %v1633_v29 = vadd.f32 %v2965_v15, %v1622_v26 }
 0x1d5   :  { %v1653_v31 = vpack.c.bf16 %v1644_v27, %v1644_v27  ;;  %1660 = vst [vmem:[%s3034_s3] sm:$0x3] %v1652_v28  ;;  %v1637_v7 = vmax.f32 %v1633_v29, 0.0  ;;  %v1614_v57 = vpop.permute.xlu0 %1613 }
 0x1d6   :  { %v1623_v33 = vsel %vm1141_vm14, %v2445_v49, %v1614_v57 }
 0x1d7   :  { %1661 = vst [vmem:[%s3034_s3 + $0x4] sm:$0x3] %v1653_v31  ;;  %v1645_v34 = vcombine.high %v1637_v7, %v1637_v7  ;;  %v1654_v22 = vpack.c.bf16 %v1637_v7, %v1637_v7  ;;  %v1634_v35 = vadd.f32 %v2965_v15, %v1623_v33 }
 0x1d9   :  { %v1655_v36 = vpack.c.bf16 %v1645_v34, %v1645_v34  ;;  %1662 = vst [vmem:[%s3034_s3 + $0x8] sm:$0x3] %v1654_v22  ;;  %v1616_v37 = vpop.permute.xlu1 %1615  ;;  %v1638_v38 = vmax.f32 %v1634_v35, 0.0 }
 0x1da   :  { %v1624_v39 = vsel %vm1141_vm14, %v2448_v32, %v1616_v37 }
 0x1db   :  { %1663 = vst [vmem:[%s3034_s3 + $0xc] sm:$0x3] %v1655_v36  ;;  %v1635_v42 = vadd.f32 %v2965_v15, %v1624_v39  ;;  %v1646_v43 = vcombine.high %v1638_v38, %v1638_v38  ;;  %v1656_v44 = vpack.c.bf16 %v1638_v38, %v1638_v38 }
 0x1dd   :  { %v1639_v45 = vmax.f32 %v1635_v42, 0.0  ;;  %v1657_v46 = vpack.c.bf16 %v1646_v43, %v1646_v43  ;;  %1664 = vst [vmem:[%s3034_s3 + $0x10] sm:$0x3] %v1656_v44 }
 0x1df   :  { %v1647_v48 = vcombine.high %v1639_v45, %v1639_v45  ;;  %v1658_v50 = vpack.c.bf16 %v1639_v45, %v1639_v45  ;;  %1665 = vst [vmem:[%s3034_s3 + $0x14] sm:$0x3] %v1657_v46 }
 0x1e1   :  { %v1659_v3 = vpack.c.bf16 %v1647_v48, %v1647_v48  ;;  %1666 = vst [vmem:[%s3034_s3 + $0x18] sm:$0x3] %v1658_v50 }
 0x1e3   :  { %1667 = vst [vmem:[%s3034_s3 + $0x1c] sm:$0x3] %v1659_v3 }
 0x1ed   :  { %v2163_v54 = vpop.permute.xlu0 %2162 }
 0x1ee   :  { %v2174_v55 = vsel %vm1141_vm14, %v2495_v24, %v2163_v54 }
 0x1ef   :  { %v2185_v56 = vadd.f32 %v2965_v15, %v2174_v55 }
 0x1f1   :  { %v2189_v60 = vmax.f32 %v2185_v56, 0.0  ;;  %v2165_v61 = vpop.permute.xlu1 %2164 }
 0x1f2   :  { %v2175_v62 = vsel %vm1141_vm14, %v2498_v58, %v2165_v61 }
 0x1f3   :  { %v2197_v63 = vcombine.high %v2189_v60, %v2189_v60  ;;  %v2205_v0 = vpack.c.bf16 %v2189_v60, %v2189_v60  ;;  %v2186_v1 = vadd.f32 %v2965_v15, %v2175_v62 }
 0x1f5   :  { %v2206_v4 = vpack.c.bf16 %v2197_v63, %v2197_v63  ;;  %2413 = vst [vmem:[%s3034_s3 + $0x2] sm:$0x3] %v2205_v0  ;;  %v2190_v5 = vmax.f32 %v2186_v1, 0.0  ;;  %v2167_v6 = vpop.permute.xlu0 %2166 }
 0x1f6   :  { %v2176_v8 = vsel %vm1141_vm14, %v2501_v52, %v2167_v6 }
 0x1f7   :  { %2414 = vst [vmem:[%s3034_s3 + $0x6] sm:$0x3] %v2206_v4  ;;  %v2198_v9 = vcombine.high %v2190_v5, %v2190_v5  ;;  %v2207_v11 = vpack.c.bf16 %v2190_v5, %v2190_v5  ;;  %v2187_v12 = vadd.f32 %v2965_v15, %v2176_v8 }
 0x1f9   :  { %v2208_v14 = vpack.c.bf16 %v2198_v9, %v2198_v9  ;;  %2415 = vst [vmem:[%s3034_s3 + $0xa] sm:$0x3] %v2207_v11  ;;  %v2191_v16 = vmax.f32 %v2187_v12, 0.0  ;;  %v2169_v17 = vpop.permute.xlu1 %2168 }
 0x1fa   :  { %v2177_v18 = vsel %vm1141_vm14, %v2504_v13, %v2169_v17 }
 0x1fb   :  { %2416 = vst [vmem:[%s3034_s3 + $0xe] sm:$0x3] %v2208_v14  ;;  %v2199_v19 = vcombine.high %v2191_v16, %v2191_v16  ;;  %v2209_v20 = vpack.c.bf16 %v2191_v16, %v2191_v16  ;;  %v2188_v21 = vadd.f32 %v2965_v15, %v2177_v18 }
 0x1fd   :  { %v2210_v23 = vpack.c.bf16 %v2199_v19, %v2199_v19  ;;  %2417 = vst [vmem:[%s3034_s3 + $0x12] sm:$0x3] %v2209_v20  ;;  %v2192_v25 = vmax.f32 %v2188_v21, 0.0 }
 0x1ff   :  { %2418 = vst [vmem:[%s3034_s3 + $0x16] sm:$0x3] %v2210_v23  ;;  %v2200_v49 = vcombine.high %v2192_v25, %v2192_v25  ;;  %v2211_v26 = vpack.c.bf16 %v2192_v25, %v2192_v25 }
 0x201   :  { %v2212_v27 = vpack.c.bf16 %v2200_v49, %v2200_v49  ;;  %2419 = vst [vmem:[%s3034_s3 + $0x1a] sm:$0x3] %v2211_v26 }
 0x203   :  { %2420 = vst [vmem:[%s3034_s3 + $0x1e] sm:$0x3] %v2212_v27 }
 0x204   :  { %2226 = vsyncpa [#allocation3], 1 }

// kernel: _lambda_.5
= control target key start
LH: loop header
LB: loop body
LE: loop exit
PB: predicated region body
PF: predicated region fallthrough
CT: control target
= control target key end

     0   :  { %vm322_vm0 = vcmask 1042432   ;;  %vm323_vm1 = vcmask 1046532   ;;  %s3727_s11 = smov 64   ;;  %vm47_vm3 = vsmask.f32 3328  ;;  %vm1287_vm6 = vcmask 523264   ;;  %s5628_s0 = inlined_call_operand.vmem [shape: bf16[2,10,10,64], index: 0, kind: input, shape index: {}]   ;;  %s5629_s1 = inlined_call_operand.vmem [shape: bf16[4,256,64], index: 1, kind: input, shape index: {}]   ;;  %s5630_s2 = inlined_call_operand.vmem [shape: f32[1,128], index: 2, kind: input, shape index: {}]   ;;  %s5631_s3 = inlined_call_operand.vmem [shape: bf16[2,8,2,8,128], index: 3, kind: output, shape index: {}]  }
   0x1   :  { %v2922_v0 = vld [vmem:[%s5628_s0 + $0xc] sm:$0x1]  ;;  %v3754_v1 = vld [vmem:[%s5628_s0 + $0x14] sm:$0x1]  ;;  %vm3756_vm2 = vmor %vm322_vm0, %vm323_vm1  ;;  %vm48_vm4 = vsmask.f32 7440 }
   0x2   :  { %v446_v3 = vshll.u32 %v3754_v1, 16  ;;  %v2938_v4 = vld [vmem:[%s5628_s0 + $0x8] sm:$0xe]  ;;  %v2939_v5 = vld [vmem:[%s5628_s0 + $0x10] sm:$0xe]  ;;  %v696_v6 = vrot.slane %v2922_v0, 5  ;;  %vm4149_vm5 = vmor %vm47_vm3, %vm48_vm4 }
   0x3   :  { %v2954_v7 = vrot.slane %v2938_v4, 9  ;;  %v2955_v8 = vrot.slane %v2939_v5, 9  ;;  %v700_v9 = vrot.slane %v3754_v1, 5  ;;  %v432_v10 = vshll.u32 %v2922_v0, 16  ;;  %v3771_v11 = vld [vmem:[%s5628_s0 + $0x1c] sm:$0x1] }
   0x4   :  { %v3776_v12 = vld [vmem:[%s5628_s0 + $0x24] sm:$0x1]  ;;  %v2940_v13 = vld [vmem:[%s5628_s0 + $0x18] sm:$0xe]  ;;  %v2941_v14 = vld [vmem:[%s5628_s0 + $0x20] sm:$0xe] }
   0x5   :  { %v697_v15 = vsel %vm3756_vm2, %v2954_v7, %v696_v6  ;;  %v701_v16 = vsel %vm3756_vm2, %v2955_v8, %v700_v9  ;;  %v474_v17 = vshll.u32 %v3776_v12, 16  ;;  %v2956_v18 = vrot.slane %v2940_v13, 9  ;;  %v3792_v19 = vld [vmem:[%s5628_s0 + $0x4] sm:$0x1]  ;;  %v3797_v20 = vld [vmem:[%s5628_s0 + $0xc] sm:$0x1] }
   0x6   :  { %v3090_v21 = vcombine.low %v697_v15, %v701_v16  ;;  %v704_v22 = vrot.slane %v3771_v11, 5  ;;  %v2957_v23 = vrot.slane %v2941_v14, 9  ;;  %v708_v24 = vrot.slane %v3776_v12, 5  ;;  %v274_v25 = vld [vmem:[%s5628_s0] sm:$0xe]  ;;  %v3541_v26 = vld [vmem:[%s5629_s1 + $0xf8] sm:$0xff]  }
   0x7   :  { %v460_v27 = vshll.u32 %v3771_v11, 16  ;;  %v275_v28 = vld [vmem:[%s5628_s0 + $0x8] sm:$0xe]  ;;  %v2890_v29 = vrot.slane %v274_v25, 9  ;;  %v327_v30 = vrot.slane %v3792_v19, 5  ;;  %v331_v31 = vrot.slane %v3797_v20, 5  ;;  %3348 = vmatprep.subr.bf16.mxu1 %v3541_v26 }
   0x8   :  { %1641 = vrot.lane.b32.xlu0 %v3090_v21, %s3727_s11  ;;  %v705_v32 = vsel %vm3756_vm2, %v2956_v18, %v704_v22  ;;  %v709_v33 = vsel %vm3756_vm2, %v2957_v23, %v708_v24  ;;  %v2891_v34 = vrot.slane %v275_v28, 9  ;;  %v3821_v35 = vld [vmem:[%s5628_s0 + $0x14] sm:$0x1]  ;;  %v3826_v36 = vld [vmem:[%s5628_s0 + $0x1c] sm:$0x1]  ;;  %v3828_v37 = vrot.slane %v432_v10, 5 }
   0x9   :  { %v3091_v38 = vcombine.low %v705_v32, %v709_v33  ;;  %v328_v39 = vsel %vm3756_vm2, %v2890_v29, %v327_v30  ;;  %v276_v40 = vld [vmem:[%s5628_s0 + $0x10] sm:$0xe]  ;;  %v277_v41 = vld [vmem:[%s5628_s0 + $0x18] sm:$0xe]  ;;  %v335_v42 = vrot.slane %v3821_v35, 5  ;;  %v339_v43 = vrot.slane %v3826_v36, 5 }
   0xa   :  { %v332_v44 = vsel %vm3756_vm2, %v2891_v34, %v331_v31  ;;  %v2892_v45 = vrot.slane %v276_v40, 9  ;;  %v2893_v46 = vrot.slane %v277_v41, 9  ;;  %v3845_v47 = vld [vmem:[%s5628_s0 + $0x2c] sm:$0x1]  ;;  %v3850_v48 = vld [vmem:[%s5628_s0 + $0x34] sm:$0x1] }
   0xb   :  { %1643 = vrot.lane.b32.xlu1 %v3091_v38, %s3727_s11  ;;  %v3082_v49 = vcombine.low %v328_v39, %v332_v44  ;;  %v2942_v50 = vld [vmem:[%s5628_s0 + $0x28] sm:$0xe]  ;;  %v2943_v51 = vld [vmem:[%s5628_s0 + $0x30] sm:$0xe]  ;;  %v712_v52 = vrot.slane %v3845_v47, 5  ;;  %v716_v53 = vrot.slane %v3850_v48, 5 }
   0xc   :  { %v336_v54 = vsel %vm3756_vm2, %v2892_v45, %v335_v42  ;;  %v340_v55 = vsel %vm3756_vm2, %v2893_v46, %v339_v43  ;;  %v2958_v56 = vrot.slane %v2942_v50, 9  ;;  %v2959_v57 = vrot.slane %v2943_v51, 9  ;;  %v3868_v58 = vld [vmem:[%s5628_s0 + $0x24] sm:$0x1]  ;;  %v3873_v59 = vld [vmem:[%s5628_s0 + $0x2c] sm:$0x1] }
   0xd   :  { %1601 = vrot.lane.b32.xlu0 %v3082_v49, %s3727_s11  ;;  %v3083_v60 = vcombine.low %v336_v54, %v340_v55  ;;  %v278_v61 = vld [vmem:[%s5628_s0 + $0x20] sm:$0xe]  ;;  %v279_v62 = vld [vmem:[%s5628_s0 + $0x28] sm:$0xe]  ;;  %v343_v63 = vrot.slane %v3868_v58, 5  ;;  %v347_v0 = vrot.slane %v3873_v59, 5 }
   0xe   :  { %v713_v4 = vsel %vm3756_vm2, %v2958_v56, %v712_v52  ;;  %v717_v5 = vsel %vm3756_vm2, %v2959_v57, %v716_v53  ;;  %v2894_v6 = vrot.slane %v278_v61, 9  ;;  %v2895_v7 = vrot.slane %v279_v62, 9  ;;  %v3891_v8 = vld [vmem:[%s5628_s0 + $0x3c] sm:$0x1]  ;;  %v3896_v9 = vld [vmem:[%s5628_s0 + $0x44] sm:$0x1] }
   0xf   :  { %1603 = vrot.lane.b32.xlu1 %v3083_v60, %s3727_s11  ;;  %v3092_v10 = vcombine.low %v713_v4, %v717_v5  ;;  %v2944_v13 = vld [vmem:[%s5628_s0 + $0x38] sm:$0xe]  ;;  %v2945_v14 = vld [vmem:[%s5628_s0 + $0x40] sm:$0xe]  ;;  %v720_v15 = vrot.slane %v3891_v8, 5  ;;  %v724_v16 = vrot.slane %v3896_v9, 5 }
  0x10   :  { %v344_v18 = vsel %vm3756_vm2, %v2894_v6, %v343_v63  ;;  %v348_v21 = vsel %vm3756_vm2, %v2895_v7, %v347_v0  ;;  %v2960_v22 = vrot.slane %v2944_v13, 9  ;;  %v2961_v23 = vrot.slane %v2945_v14, 9  ;;  %v3914_v24 = vld [vmem:[%s5628_s0 + $0x34] sm:$0x1]  ;;  %v3919_v25 = vld [vmem:[%s5628_s0 + $0x3c] sm:$0x1] }
  0x11   :  { %1645 = vrot.lane.b32.xlu0 %v3092_v10, %s3727_s11  ;;  %v3084_v26 = vcombine.low %v344_v18, %v348_v21  ;;  %v280_v28 = vld [vmem:[%s5628_s0 + $0x30] sm:$0xe]  ;;  %v281_v29 = vld [vmem:[%s5628_s0 + $0x38] sm:$0xe]  ;;  %v351_v30 = vrot.slane %v3914_v24, 5  ;;  %v355_v31 = vrot.slane %v3919_v25, 5 }
  0x12   :  { %v721_v32 = vsel %vm3756_vm2, %v2960_v22, %v720_v15  ;;  %v725_v33 = vsel %vm3756_vm2, %v2961_v23, %v724_v16  ;;  %v2896_v34 = vrot.slane %v280_v28, 9  ;;  %v2897_v38 = vrot.slane %v281_v29, 9  ;;  %v3937_v39 = vld [vmem:[%s5628_s0 + $0x5c] sm:$0x1]  ;;  %v3942_v40 = vld [vmem:[%s5628_s0 + $0x64] sm:$0x1] }
  0x13   :  { %1605 = vrot.lane.b32.xlu1 %v3084_v26, %s3727_s11  ;;  %v3093_v41 = vcombine.low %v721_v32, %v725_v33  ;;  %v2946_v42 = vld [vmem:[%s5628_s0 + $0x58] sm:$0xe]  ;;  %v2947_v43 = vld [vmem:[%s5628_s0 + $0x60] sm:$0xe]  ;;  %v728_v44 = vrot.slane %v3937_v39, 5  ;;  %v732_v45 = vrot.slane %v3942_v40, 5 }
  0x14   :  { %v352_v46 = vsel %vm3756_vm2, %v2896_v34, %v351_v30  ;;  %v356_v49 = vsel %vm3756_vm2, %v2897_v38, %v355_v31  ;;  %v2962_v50 = vrot.slane %v2946_v42, 9  ;;  %v2963_v51 = vrot.slane %v2947_v43, 9  ;;  %v3960_v52 = vld [vmem:[%s5628_s0 + $0x54] sm:$0x1]  ;;  %v3965_v53 = vld [vmem:[%s5628_s0 + $0x5c] sm:$0x1] }
  0x15   :  { %1647 = vrot.lane.b32.xlu0 %v3093_v41, %s3727_s11  ;;  %v3085_v54 = vcombine.low %v352_v46, %v356_v49  ;;  %v282_v55 = vld [vmem:[%s5628_s0 + $0x50] sm:$0xe]  ;;  %v283_v56 = vld [vmem:[%s5628_s0 + $0x58] sm:$0xe]  ;;  %v359_v57 = vrot.slane %v3960_v52, 5  ;;  %v363_v60 = vrot.slane %v3965_v53, 5 }
  0x16   :  { %v729_v61 = vsel %vm3756_vm2, %v2962_v50, %v728_v44  ;;  %v733_v62 = vsel %vm3756_vm2, %v2963_v51, %v732_v45  ;;  %v2898_v63 = vrot.slane %v282_v55, 9  ;;  %v2899_v0 = vrot.slane %v283_v56, 9  ;;  %v3983_v4 = vld [vmem:[%s5628_s0 + $0x6c] sm:$0x1]  ;;  %v3988_v5 = vld [vmem:[%s5628_s0 + $0x74] sm:$0x1] }
  0x17   :  { %1607 = vrot.lane.b32.xlu1 %v3085_v54, %s3727_s11  ;;  %v3094_v6 = vcombine.low %v729_v61, %v733_v62  ;;  %v2948_v7 = vld [vmem:[%s5628_s0 + $0x68] sm:$0xe]  ;;  %v2949_v10 = vld [vmem:[%s5628_s0 + $0x70] sm:$0xe]  ;;  %v736_v13 = vrot.slane %v3983_v4, 5  ;;  %v740_v14 = vrot.slane %v3988_v5, 5 }
  0x18   :  { %v360_v15 = vsel %vm3756_vm2, %v2898_v63, %v359_v57  ;;  %v364_v16 = vsel %vm3756_vm2, %v2899_v0, %v363_v60  ;;  %v2964_v18 = vrot.slane %v2948_v7, 9  ;;  %v2965_v21 = vrot.slane %v2949_v10, 9  ;;  %v4006_v22 = vld [vmem:[%s5628_s0 + $0x64] sm:$0x1]  ;;  %v4011_v23 = vld [vmem:[%s5628_s0 + $0x6c] sm:$0x1] }
  0x19   :  { %1649 = vrot.lane.b32.xlu0 %v3094_v6, %s3727_s11  ;;  %v3086_v26 = vcombine.low %v360_v15, %v364_v16  ;;  %v284_v28 = vld [vmem:[%s5628_s0 + $0x60] sm:$0xe]  ;;  %v285_v29 = vld [vmem:[%s5628_s0 + $0x68] sm:$0xe]  ;;  %v367_v30 = vrot.slane %v4006_v22, 5  ;;  %v371_v31 = vrot.slane %v4011_v23, 5 }
  0x1a   :  { %v737_v32 = vsel %vm3756_vm2, %v2964_v18, %v736_v13  ;;  %v741_v33 = vsel %vm3756_vm2, %v2965_v21, %v740_v14  ;;  %v2900_v34 = vrot.slane %v284_v28, 9  ;;  %v2901_v38 = vrot.slane %v285_v29, 9  ;;  %v4029_v41 = vld [vmem:[%s5628_s0 + $0x7c] sm:$0x1]  ;;  %v4034_v42 = vld [vmem:[%s5628_s0 + $0x84] sm:$0x1] }
  0x1b   :  { %1609 = vrot.lane.b32.xlu1 %v3086_v26, %s3727_s11  ;;  %v3095_v43 = vcombine.low %v737_v32, %v741_v33  ;;  %v2950_v44 = vld [vmem:[%s5628_s0 + $0x78] sm:$0xe]  ;;  %v2951_v45 = vld [vmem:[%s5628_s0 + $0x80] sm:$0xe]  ;;  %v744_v46 = vrot.slane %v4029_v41, 5  ;;  %v748_v49 = vrot.slane %v4034_v42, 5 }
  0x1c   :  { %v368_v50 = vsel %vm3756_vm2, %v2900_v34, %v367_v30  ;;  %v372_v51 = vsel %vm3756_vm2, %v2901_v38, %v371_v31  ;;  %v2966_v54 = vrot.slane %v2950_v44, 9  ;;  %v2967_v55 = vrot.slane %v2951_v45, 9  ;;  %v4052_v56 = vld [vmem:[%s5628_s0 + $0x74] sm:$0x1]  ;;  %v4057_v57 = vld [vmem:[%s5628_s0 + $0x7c] sm:$0x1] }
  0x1d   :  { %1651 = vrot.lane.b32.xlu0 %v3095_v43, %s3727_s11  ;;  %v3087_v60 = vcombine.low %v368_v50, %v372_v51  ;;  %v286_v61 = vld [vmem:[%s5628_s0 + $0x70] sm:$0xe]  ;;  %v287_v62 = vld [vmem:[%s5628_s0 + $0x78] sm:$0xe]  ;;  %v375_v63 = vrot.slane %v4052_v56, 5  ;;  %v379_v0 = vrot.slane %v4057_v57, 5 }
  0x1e   :  { %v745_v6 = vsel %vm3756_vm2, %v2966_v54, %v744_v46  ;;  %v749_v7 = vsel %vm3756_vm2, %v2967_v55, %v748_v49  ;;  %v2902_v10 = vrot.slane %v286_v61, 9  ;;  %v2903_v13 = vrot.slane %v287_v62, 9  ;;  %v2936_v14 = vld [vmem:[%s5628_s0 + $0x8c] sm:$0x1]  ;;  %v2937_v15 = vld [vmem:[%s5628_s0 + $0x94] sm:$0x1] }
  0x1f   :  { %1611 = vrot.lane.b32.xlu1 %v3087_v60, %s3727_s11  ;;  %v3096_v16 = vcombine.low %v745_v6, %v749_v7  ;;  %v2952_v18 = vld [vmem:[%s5628_s0 + $0x88] sm:$0xe]  ;;  %v2953_v21 = vld [vmem:[%s5628_s0 + $0x90] sm:$0xe]  ;;  %v752_v26 = vrot.slane %v2936_v14, 5  ;;  %v756_v28 = vrot.slane %v2937_v15, 5 }
  0x20   :  { %v376_v29 = vsel %vm3756_vm2, %v2902_v10, %v375_v63  ;;  %v380_v30 = vsel %vm3756_vm2, %v2903_v13, %v379_v0  ;;  %v2968_v31 = vrot.slane %v2952_v18, 9  ;;  %v2969_v32 = vrot.slane %v2953_v21, 9  ;;  %v45_v33 = vld [vmem:[%s5628_s0 + $0x84] sm:$0x1]  ;;  %v46_v34 = vld [vmem:[%s5628_s0 + $0x8c] sm:$0x1] }
  0x21   :  { %1653 = vrot.lane.b32.xlu0 %v3096_v16, %s3727_s11  ;;  %v3088_v38 = vcombine.low %v376_v29, %v380_v30  ;;  %v288_v43 = vld [vmem:[%s5628_s0 + $0x80] sm:$0xe]  ;;  %v289_v44 = vld [vmem:[%s5628_s0 + $0x88] sm:$0xe]  ;;  %v383_v45 = vrot.slane %v45_v33, 5  ;;  %v387_v46 = vrot.slane %v46_v34, 5 }
  0x22   :  { %v753_v49 = vsel %vm3756_vm2, %v2968_v31, %v752_v26  ;;  %v757_v50 = vsel %vm3756_vm2, %v2969_v32, %v756_v28  ;;  %v2904_v51 = vrot.slane %v288_v43, 9  ;;  %v2905_v54 = vrot.slane %v289_v44, 9  ;;  %v2906_v55 = vld [vmem:[%s5628_s0 + $0x8] sm:$0xf]  ;;  %v2907_v60 = vld [vmem:[%s5628_s0 + $0x10] sm:$0xf] }
  0x23   :  { %1613 = vrot.lane.b32.xlu1 %v3088_v38, %s3727_s11  ;;  %v3097_v61 = vcombine.low %v753_v49, %v757_v50  ;;  %v423_v62 = vshrl.u32 %v2906_v55, 16  ;;  %v426_v63 = vshll.u32 %v2906_v55, 16  ;;  %v437_v0 = vshrl.u32 %v2907_v60, 16  ;;  %v15_v6 = vld [vmem:[%s5628_s0] sm:$0xf]  ;;  %v3542_v7 = vld [vmem:[%s5629_s1 + $0xb8] sm:$0xff]  }
  0x24   :  { %v384_v10 = vsel %vm3756_vm2, %v2904_v51, %v383_v45  ;;  %v388_v13 = vsel %vm3756_vm2, %v2905_v54, %v387_v46  ;;  %v440_v14 = vshll.u32 %v2907_v60, 16  ;;  %v448_v15 = vrot.slane %v446_v3, 5  ;;  %v16_v16 = vld [vmem:[%s5628_s0 + $0x8] sm:$0xf]  ;;  %v2986_v29 = vld [vmem:[%s5628_s0 + $0x14] sm:$0x1]  ;;  %3349 = vmatpush3.bf16.msra.mxu1 %v3542_v7 }
  0x25   :  { %1655 = vrot.lane.b32.xlu0 %v3097_v61, %s3727_s11  ;;  %v3089_v18 = vcombine.low %v384_v10, %v388_v13  ;;  %v425_v21 = vrot.slane %v423_v62, 4  ;;  %v428_v26 = vrot.slane %v426_v63, 5  ;;  %v439_v28 = vrot.slane %v437_v0, 4  ;;  %v3543_v1 = vld [vmem:[%s5629_s1 + $0xf0] sm:$0xff]   ;;  %v2987_v33 = vld [vmem:[%s5628_s0 + $0x1c] sm:$0x1] }
  0x26   :  { %v442_v3 = vrot.slane %v440_v14, 5  ;;  %v51_v30 = vshrl.u32 %v15_v6, 16  ;;  %v54_v31 = vshll.u32 %v15_v6, 16  ;;  %v60_v32 = vshll.u32 %v3792_v19, 16  ;;  %v3002_v45 = vld [vmem:[%s5628_s0 + $0x10] sm:$0xe]  ;;  %3350 = vmatprep.subr.bf16.mxu1 %v3543_v1 }
  0x27   :  { %1615 = vrot.lane.b32.xlu1 %v3089_v18, %s3727_s11  ;;  %v429_v34 = vor.u32 %v428_v26, %v425_v21  ;;  %v65_v38 = vshrl.u32 %v16_v16, 16  ;;  %v68_v43 = vshll.u32 %v16_v16, 16  ;;  %v74_v44 = vshll.u32 %v3797_v20, 16  ;;  %v3544_v19 = vld [vmem:[%s5629_s1 + $0xb0] sm:$0xff]   ;;  %v3003_v20 = vld [vmem:[%s5628_s0 + $0x18] sm:$0xe] }
  0x28   :  { %v443_v49 = vor.u32 %v442_v3, %v439_v28  ;;  %v53_v50 = vrot.slane %v51_v30, 4  ;;  %v56_v51 = vrot.slane %v54_v31, 5  ;;  %v62_v54 = vrot.slane %v60_v32, 5  ;;  %v3545_v55 = vld [vmem:[%s5629_s1 + $0xe8] sm:$0xff]   ;;  %v2908_v0 = vld [vmem:[%s5628_s0 + $0x18] sm:$0xf]  ;;  %3351 = vmatpush3.bf16.msra.mxu1 %v3544_v19 }
  0x29   :  { %v430_v60 = vrot.slane %v429_v34, 4  ;;  %v67_v61 = vrot.slane %v65_v38, 4  ;;  %v70_v62 = vrot.slane %v68_v43, 5  ;;  %v76_v63 = vrot.slane %v74_v44, 5  ;;  %3352 = vmatprep.subr.bf16.mxu1 %v3545_v55  ;;  %v3546_v14 = vld [vmem:[%s5629_s1 + $0xa8] sm:$0xff]  }
  0x2a   :  { %v444_v6 = vrot.slane %v443_v49, 4  ;;  %v57_v7 = vor.u32 %v56_v51, %v53_v50  ;;  %v3018_v10 = vrot.slane %v3002_v45, 9  ;;  %v1065_v13 = vrot.slane %v2986_v29, 5  ;;  %v2909_v29 = vld [vmem:[%s5628_s0 + $0x20] sm:$0xf] }
  0x2b   :  { %v435_v16 = vsel %vm4149_vm5, %v430_v60, %v3828_v37  ;;  %v71_v18 = vor.u32 %v70_v62, %v67_v61  ;;  %v3019_v21 = vrot.slane %v3003_v20, 9  ;;  %v1069_v26 = vrot.slane %v2987_v33, 5  ;;  %v18_v51 = vld [vmem:[%s5628_s0 + $0x18] sm:$0xf]  ;;  %v4203_v60 = vld [vmem:[%s5628_s0 + $0x24] sm:$0x1] }
  0x2c   :  { %v449_v28 = vsel %vm4149_vm5, %v444_v6, %v448_v15  ;;  %v58_v1 = vrot.slane %v57_v7, 4  ;;  %v1066_v3 = vsel %vm3756_vm2, %v3018_v10, %v1065_v13  ;;  %v451_v30 = vshrl.u32 %v2908_v0, 16  ;;  %v17_v15 = vld [vmem:[%s5628_s0 + $0x10] sm:$0xf]  ;;  %3353 = vmatpush3.bf16.msra.mxu1 %v3546_v14  ;;  %v3548_v61 = vld [vmem:[%s5629_s1 + $0xa0] sm:$0xff]  }
  0x2d   :  { %v4175_v31 = vcombine.low %v435_v16, %v449_v28  ;;  %v72_v32 = vrot.slane %v71_v18, 4  ;;  %v1070_v37 = vsel %vm3756_vm2, %v3019_v21, %v1069_v26  ;;  %v454_v34 = vshll.u32 %v2908_v0, 16  ;;  %v3004_v12 = vld [vmem:[%s5628_s0 + $0x20] sm:$0xe]  ;;  %v3005_v28 = vld [vmem:[%s5628_s0 + $0x28] sm:$0xe] }
  0x2e   :  { %v63_v33 = vsel %vm4149_vm5, %v58_v1, %v62_v54  ;;  %v3211_v38 = vcombine.low %v1066_v3, %v1070_v37  ;;  %v453_v43 = vrot.slane %v451_v30, 4  ;;  %v462_v44 = vrot.slane %v460_v27, 5  ;;  %v3547_v54 = vld [vmem:[%s5629_s1 + $0xe0] sm:$0xff]   ;;  %v3550_v1 = vld [vmem:[%s5629_s1 + $0x98] sm:$0xff]   ;;  %v2910_v37 = vld [vmem:[%s5628_s0 + $0x28] sm:$0xf] }
  0x2f   :  { %1271 = vrot.lane.b32.xlu0 %v4175_v31, %s3727_s11  ;;  %v77_v45 = vsel %vm4149_vm5, %v72_v32, %v76_v63  ;;  %v456_v19 = vrot.slane %v454_v34, 5  ;;  %v465_v49 = vshrl.u32 %v2909_v29, 16  ;;  %v468_v50 = vshll.u32 %v2909_v29, 16  ;;  %3354 = vmatprep.subr.bf16.mxu1 %v3547_v54  ;;  %v2911_v54 = vld [vmem:[%s5628_s0 + $0x30] sm:$0xf] }
  0x30   :  { %v4196_v20 = vcombine.low %v63_v33, %v77_v45  ;;  %v476_v11 = vrot.slane %v474_v17, 5  ;;  %v79_v27 = vshrl.u32 %v17_v15, 16  ;;  %v82_v55 = vshll.u32 %v17_v15, 16  ;;  %v3549_v17 = vld [vmem:[%s5629_s1 + $0xd8] sm:$0xff]   ;;  %3355 = vmatpush3.bf16.msra.mxu1 %v3548_v61  ;;  %v3553_v61 = vld [vmem:[%s5629_s1 + $0xc8] sm:$0xff]  }
  0x31   :  { %v457_v62 = vor.u32 %v456_v19, %v453_v43  ;;  %v467_v63 = vrot.slane %v465_v49, 4  ;;  %v470_v0 = vrot.slane %v468_v50, 5  ;;  %v88_v6 = vshll.u32 %v3821_v35, 16  ;;  %v4220_v35 = vld [vmem:[%s5628_s0 + $0x2c] sm:$0x1]  ;;  %3356 = vmatprep.subr.bf16.mxu1 %v3549_v17  ;;  %v3552_v50 = vld [vmem:[%s5629_s1 + $0x90] sm:$0xff]  }
  0x32   :  { %1191 = vrot.lane.b32.xlu1 %v4196_v20, %s3727_s11  ;;  %v81_v7 = vrot.slane %v79_v27, 4  ;;  %v84_v10 = vrot.slane %v82_v55, 5  ;;  %v93_v13 = vshrl.u32 %v18_v51, 16  ;;  %v96_v14 = vshll.u32 %v18_v51, 16 }
  0x33   :  { %2460 = vrot.lane.b32.xlu0 %v3211_v38, %s3727_s11  ;;  %v458_v16 = vrot.slane %v457_v62, 4  ;;  %v471_v18 = vor.u32 %v470_v0, %v467_v63  ;;  %v90_v21 = vrot.slane %v88_v6, 5  ;;  %v102_v26 = vshll.u32 %v3826_v36, 16  ;;  %v3551_v36 = vld [vmem:[%s5629_s1 + $0xd0] sm:$0xff]   ;;  %v19_v6 = vld [vmem:[%s5628_s0 + $0x20] sm:$0xf] }
  0x34   :  { %v85_v3 = vor.u32 %v84_v10, %v81_v7  ;;  %v95_v29 = vrot.slane %v93_v13, 4  ;;  %v98_v30 = vrot.slane %v96_v14, 5  ;;  %v3020_v32 = vrot.slane %v3004_v12, 9  ;;  %3357 = vmatpush3.bf16.msra.mxu1 %v3550_v1 }
  0x35   :  { %v463_v34 = vsel %vm4149_vm5, %v458_v16, %v462_v44  ;;  %v472_v15 = vrot.slane %v471_v18, 4  ;;  %v104_v33 = vrot.slane %v102_v26, 5  ;;  %v1073_v38 = vrot.slane %v4203_v60, 5  ;;  %3358 = vmatprep.subr.bf16.mxu1 %v3551_v36  ;;  %v3554_v26 = vld [vmem:[%s5629_s1 + $0x88] sm:$0xff]  }
  0x36   :  { %v86_v43 = vrot.slane %v85_v3, 4  ;;  %v99_v45 = vor.u32 %v98_v30, %v95_v29  ;;  %v3021_v19 = vrot.slane %v3005_v28, 9  ;;  %v1077_v49 = vrot.slane %v4220_v35, 5  ;;  %v3006_v29 = vld [vmem:[%s5628_s0 + $0x30] sm:$0xe] }
  0x37   :  { %v477_v51 = vsel %vm4149_vm5, %v472_v15, %v476_v11  ;;  %v1074_v44 = vsel %vm3756_vm2, %v3020_v32, %v1073_v38  ;;  %v479_v27 = vshrl.u32 %v2910_v37, 16  ;;  %v482_v55 = vshll.u32 %v2910_v37, 16  ;;  %v4290_v15 = vld [vmem:[%s5628_s0 + $0x3c] sm:$0x1] }
  0x38   :  { %v4253_v62 = vcombine.low %v463_v34, %v477_v51  ;;  %v91_v63 = vsel %vm4149_vm5, %v86_v43, %v90_v21  ;;  %v100_v11 = vrot.slane %v99_v45, 4  ;;  %v1078_v0 = vsel %vm3756_vm2, %v3021_v19, %v1077_v49  ;;  %v20_v21 = vld [vmem:[%s5628_s0 + $0x28] sm:$0xf]  ;;  %3359 = vmatpush3.bf16.msra.mxu1 %v3552_v50  ;;  %v4285_v34 = vld [vmem:[%s5628_s0 + $0x34] sm:$0x1] }
  0x39   :  { %v3212_v12 = vcombine.low %v1074_v44, %v1078_v0  ;;  %v481_v17 = vrot.slane %v479_v27, 4  ;;  %v484_v7 = vrot.slane %v482_v55, 5  ;;  %v488_v10 = vshll.u32 %v3845_v47, 16  ;;  %3360 = vmatprep.subr.bf16.mxu1 %v3553_v61  ;;  %v2912_v49 = vld [vmem:[%s5628_s0 + $0x38] sm:$0xf]  ;;  %v3556_v27 = vld [vmem:[%s5629_s1 + $0x80] sm:$0xff]  }
  0x3a   :  { %1273 = vrot.lane.b32.xlu1 %v4253_v62, %s3727_s11  ;;  %v105_v13 = vsel %vm4149_vm5, %v100_v11, %v104_v33  ;;  %v493_v14 = vshrl.u32 %v2911_v54, 16  ;;  %v496_v16 = vshll.u32 %v2911_v54, 16  ;;  %v502_v18 = vshll.u32 %v3850_v48, 16  ;;  %v3555_v48 = vld [vmem:[%s5629_s1 + $0xc0] sm:$0xff]   ;;  %v3007_v33 = vld [vmem:[%s5628_s0 + $0x38] sm:$0xe] }
  0x3b   :  { %v4274_v47 = vcombine.low %v91_v63, %v105_v13  ;;  %v485_v28 = vor.u32 %v484_v7, %v481_v17  ;;  %v490_v1 = vrot.slane %v488_v10, 5  ;;  %v107_v3 = vshrl.u32 %v19_v6, 16  ;;  %v3559_v7 = vld [vmem:[%s5629_s1 + $0x1f8] sm:$0xff]  }
  0x3c   :  { %v495_v30 = vrot.slane %v493_v14, 4  ;;  %v498_v32 = vrot.slane %v496_v16, 5  ;;  %v504_v37 = vrot.slane %v502_v18, 5  ;;  %v110_v36 = vshll.u32 %v19_v6, 16  ;;  %3361 = vmatpush3.bf16.msra.mxu1 %v3554_v26 }
  0x3d   :  { %1193 = vrot.lane.b32.xlu0 %v4274_v47, %s3727_s11  ;;  %v486_v38 = vrot.slane %v485_v28, 4  ;;  %v109_v43 = vrot.slane %v107_v3, 4  ;;  %v116_v45 = vshll.u32 %v3868_v58, 16  ;;  %v121_v19 = vshrl.u32 %v20_v21, 16  ;;  %v3557_v58 = vld [vmem:[%s5629_s1 + $0x78] sm:$0xff]   ;;  %3362 = vmatprep.subr.bf16.mxu1 %v3555_v48 }
  0x3e   :  { %2462 = vrot.lane.b32.xlu1 %v3212_v12, %s3727_s11  ;;  %v499_v50 = vor.u32 %v498_v32, %v495_v30  ;;  %v112_v51 = vrot.slane %v110_v36, 5  ;;  %v124_v44 = vshll.u32 %v20_v21, 16  ;;  %v130_v54 = vshll.u32 %v3873_v59, 16  ;;  %v3558_v59 = vld [vmem:[%s5629_s1 + $0x38] sm:$0xff]   ;;  %3284 = vmatprep.subr.bf16.mxu0 %v3557_v58  ;;  %v2913_v28 = vld [vmem:[%s5628_s0 + $0x40] sm:$0xf] }
  0x3f   :  { %v491_v55 = vsel %vm4149_vm5, %v486_v38, %v490_v1  ;;  %v118_v61 = vrot.slane %v116_v45, 5  ;;  %v123_v63 = vrot.slane %v121_v19, 4  ;;  %v3022_v11 = vrot.slane %v3006_v29, 9  ;;  %3285 = vmatpush3.bf16.msra.mxu0 %v3558_v59  ;;  %v21_v32 = vld [vmem:[%s5628_s0 + $0x30] sm:$0xf] }
  0x40   :  { %v500_v0 = vrot.slane %v499_v50, 4  ;;  %v113_v6 = vor.u32 %v112_v51, %v109_v43  ;;  %v126_v12 = vrot.slane %v124_v44, 5  ;;  %v132_v17 = vrot.slane %v130_v54, 5  ;;  %3363 = vmatpush3.bf16.msra.mxu1 %v3556_v27  ;;  %v22_v44 = vld [vmem:[%s5628_s0 + $0x38] sm:$0xf] }
  0x41   :  { %v1081_v10 = vrot.slane %v4285_v34, 5  ;;  %v3023_v13 = vrot.slane %v3007_v33, 9  ;;  %v1085_v14 = vrot.slane %v4290_v15, 5  ;;  %v507_v16 = vshrl.u32 %v2912_v49, 16  ;;  %3476 = vmatprep.subr.bf16.mxu1 %v3559_v7 }
  0x42   :  { %v505_v18 = vsel %vm4149_vm5, %v500_v0, %v504_v37  ;;  %v114_v21 = vrot.slane %v113_v6, 4  ;;  %v127_v26 = vor.u32 %v126_v12, %v123_v63  ;;  %v510_v1 = vshll.u32 %v2912_v49, 16  ;;  %v4355_v12 = vld [vmem:[%s5628_s0 + $0x44] sm:$0x1] }
  0x43   :  { %v4324_v3 = vcombine.low %v491_v55, %v505_v18  ;;  %v1082_v29 = vsel %vm3756_vm2, %v3022_v11, %v1081_v10  ;;  %v1086_v48 = vsel %vm3756_vm2, %v3023_v13, %v1085_v14  ;;  %v509_v30 = vrot.slane %v507_v16, 4  ;;  %v3009_v14 = vld [vmem:[%s5628_s0 + $0x48] sm:$0xe]  ;;  %v3562_v16 = vld [vmem:[%s5629_s1 + $0x30] sm:$0xff]  }
  0x44   :  { %v119_v37 = vsel %vm4149_vm5, %v114_v21, %v118_v61  ;;  %v128_v36 = vrot.slane %v127_v26, 4  ;;  %v3213_v33 = vcombine.low %v1082_v29, %v1086_v48  ;;  %v512_v38 = vrot.slane %v510_v1, 5  ;;  %v2914_v1 = vld [vmem:[%s5628_s0 + $0x58] sm:$0xf] }
  0x45   :  { %1275 = vrot.lane.b32.xlu0 %v4324_v3, %s3727_s11  ;;  %v516_v43 = vshll.u32 %v3891_v8, 16  ;;  %v521_v45 = vshrl.u32 %v2913_v28, 16  ;;  %v524_v19 = vshll.u32 %v2913_v28, 16  ;;  %v530_v49 = vshll.u32 %v3896_v9, 16  ;;  %v3008_v8 = vld [vmem:[%s5628_s0 + $0x40] sm:$0xe] }
  0x46   :  { %v133_v50 = vsel %vm4149_vm5, %v128_v36, %v132_v17  ;;  %v513_v51 = vor.u32 %v512_v38, %v509_v30  ;;  %v135_v54 = vshrl.u32 %v21_v32, 16  ;;  %v138_v27 = vshll.u32 %v21_v32, 16  ;;  %v3561_v9 = vld [vmem:[%s5629_s1 + $0x70] sm:$0xff]  }
  0x47   :  { %v4344_v58 = vcombine.low %v119_v37, %v133_v50  ;;  %v518_v55 = vrot.slane %v516_v43, 5  ;;  %v523_v61 = vrot.slane %v521_v45, 4  ;;  %v526_v63 = vrot.slane %v524_v19, 5  ;;  %3286 = vmatprep.subr.bf16.mxu0 %v3561_v9  ;;  %v2915_v37 = vld [vmem:[%s5628_s0 + $0x60] sm:$0xf] }
  0x48   :  { %v514_v11 = vrot.slane %v513_v51, 4  ;;  %v532_v59 = vrot.slane %v530_v49, 5  ;;  %v137_v0 = vrot.slane %v135_v54, 4  ;;  %v140_v6 = vrot.slane %v138_v27, 5  ;;  %3287 = vmatpush3.bf16.msra.mxu0 %v3562_v16  ;;  %v23_v27 = vld [vmem:[%s5628_s0 + $0x50] sm:$0xf] }
  0x49   :  { %1195 = vrot.lane.b32.xlu1 %v4344_v58, %s3727_s11  ;;  %2464 = vrot.lane.b32.xlu0 %v3213_v33, %s3727_s11  ;;  %v527_v17 = vor.u32 %v526_v63, %v523_v61  ;;  %v144_v7 = vshll.u32 %v3914_v24, 16  ;;  %v149_v10 = vshrl.u32 %v22_v44, 16  ;;  %v152_v13 = vshll.u32 %v22_v44, 16  ;;  %v4373_v24 = vld [vmem:[%s5628_s0 + $0x4c] sm:$0x1] }
  0x4a   :  { %v519_v18 = vsel %vm4149_vm5, %v514_v11, %v518_v55  ;;  %v141_v21 = vor.u32 %v140_v6, %v137_v0  ;;  %v158_v26 = vshll.u32 %v3919_v25, 16  ;;  %v3024_v28 = vrot.slane %v3008_v8, 9  ;;  %v3563_v55 = vld [vmem:[%s5629_s1 + $0x68] sm:$0xff]   ;;  %v3010_v16 = vld [vmem:[%s5628_s0 + $0x60] sm:$0xe] }
  0x4b   :  { %v528_v29 = vrot.slane %v527_v17, 4  ;;  %v146_v48 = vrot.slane %v144_v7, 5  ;;  %v151_v30 = vrot.slane %v149_v10, 4  ;;  %v154_v32 = vrot.slane %v152_v13, 5  ;;  %v3564_v11 = vld [vmem:[%s5629_s1 + $0x28] sm:$0xff]   ;;  %3288 = vmatprep.subr.bf16.mxu0 %v3563_v55 }
  0x4c   :  { %v142_v25 = vrot.slane %v141_v21, 4  ;;  %v160_v36 = vrot.slane %v158_v26, 5  ;;  %v1089_v33 = vrot.slane %v4355_v12, 5  ;;  %v3025_v38 = vrot.slane %v3009_v14, 9  ;;  %v24_v7 = vld [vmem:[%s5628_s0 + $0x58] sm:$0xf]  ;;  %3289 = vmatpush3.bf16.msra.mxu0 %v3564_v11 }
  0x4d   :  { %v533_v43 = vsel %vm4149_vm5, %v528_v29, %v532_v59  ;;  %v155_v45 = vor.u32 %v154_v32, %v151_v30  ;;  %v1093_v19 = vrot.slane %v4373_v24, 5  ;;  %v535_v49 = vshrl.u32 %v2914_v1, 16 }
  0x4e   :  { %v4385_v50 = vcombine.low %v519_v18, %v533_v43  ;;  %v147_v51 = vsel %vm4149_vm5, %v142_v25, %v146_v48  ;;  %v1090_v44 = vsel %vm3756_vm2, %v3024_v28, %v1089_v33  ;;  %v538_v54 = vshll.u32 %v2914_v1, 16  ;;  %v4419_v1 = vld [vmem:[%s5628_s0 + $0x64] sm:$0x1]  ;;  %v2916_v25 = vld [vmem:[%s5628_s0 + $0x68] sm:$0xf] }
  0x4f   :  { %v156_v61 = vrot.slane %v155_v45, 4  ;;  %v1094_v63 = vsel %vm3756_vm2, %v3025_v38, %v1093_v19  ;;  %v537_v8 = vrot.slane %v535_v49, 4  ;;  %v544_v9 = vshll.u32 %v3937_v39, 16 }
  0x50   :  { %1277 = vrot.lane.b32.xlu1 %v4385_v50, %s3727_s11  ;;  %v3214_v59 = vcombine.low %v1090_v44, %v1094_v63  ;;  %v540_v0 = vrot.slane %v538_v54, 5  ;;  %v549_v6 = vshrl.u32 %v2915_v37, 16  ;;  %v552_v17 = vshll.u32 %v2915_v37, 16  ;;  %v4428_v37 = vld [vmem:[%s5628_s0 + $0x6c] sm:$0x1] }
  0x51   :  { %v161_v10 = vsel %vm4149_vm5, %v156_v61, %v160_v36  ;;  %v546_v39 = vrot.slane %v544_v9, 5  ;;  %v558_v13 = vshll.u32 %v3942_v40, 16  ;;  %v163_v14 = vshrl.u32 %v23_v27, 16  ;;  %v3011_v40 = vld [vmem:[%s5628_s0 + $0x68] sm:$0xe]  ;;  %v3568_v61 = vld [vmem:[%s5629_s1 + $0x20] sm:$0xff]  }
  0x52   :  { %v4414_v18 = vcombine.low %v147_v51, %v161_v10  ;;  %v541_v21 = vor.u32 %v540_v0, %v537_v8  ;;  %v551_v26 = vrot.slane %v549_v6, 4  ;;  %v554_v28 = vrot.slane %v552_v17, 5  ;;  %v2917_v17 = vld [vmem:[%s5628_s0 + $0x70] sm:$0xf] }
  0x53   :  { %v560_v29 = vrot.slane %v558_v13, 5  ;;  %v165_v48 = vrot.slane %v163_v14, 4  ;;  %v166_v30 = vshll.u32 %v23_v27, 16  ;;  %v172_v32 = vshll.u32 %v3960_v52, 16  ;;  %v3567_v52 = vld [vmem:[%s5629_s1 + $0x60] sm:$0xff]  }
  0x54   :  { %1197 = vrot.lane.b32.xlu0 %v4414_v18, %s3727_s11  ;;  %2466 = vrot.lane.b32.xlu1 %v3214_v59, %s3727_s11  ;;  %v542_v36 = vrot.slane %v541_v21, 4  ;;  %v555_v33 = vor.u32 %v554_v28, %v551_v26  ;;  %v177_v38 = vshrl.u32 %v24_v7, 16  ;;  %v180_v43 = vshll.u32 %v24_v7, 16 }
  0x55   :  { %v168_v45 = vrot.slane %v166_v30, 5  ;;  %v174_v19 = vrot.slane %v172_v32, 5  ;;  %v186_v49 = vshll.u32 %v3965_v53, 16  ;;  %v3026_v51 = vrot.slane %v3010_v16, 9  ;;  %3290 = vmatprep.subr.bf16.mxu0 %v3567_v52  ;;  %v3569_v53 = vld [vmem:[%s5629_s1 + $0x58] sm:$0xff]  }
  0x56   :  { %v547_v44 = vsel %vm4149_vm5, %v542_v36, %v546_v39  ;;  %v556_v54 = vrot.slane %v555_v33, 4  ;;  %v179_v27 = vrot.slane %v177_v38, 4  ;;  %v182_v55 = vrot.slane %v180_v43, 5  ;;  %3291 = vmatpush3.bf16.msra.mxu0 %v3568_v61  ;;  %v25_v16 = vld [vmem:[%s5628_s0 + $0x60] sm:$0xf] }
  0x57   :  { %v169_v63 = vor.u32 %v168_v45, %v165_v48  ;;  %v188_v8 = vrot.slane %v186_v49, 5  ;;  %v1097_v9 = vrot.slane %v4419_v1, 5  ;;  %v3027_v11 = vrot.slane %v3011_v40, 9  ;;  %3292 = vmatprep.subr.bf16.mxu0 %v3569_v53  ;;  %v26_v43 = vld [vmem:[%s5628_s0 + $0x68] sm:$0xf] }
  0x58   :  { %v561_v59 = vsel %vm4149_vm5, %v556_v54, %v560_v29  ;;  %v183_v0 = vor.u32 %v182_v55, %v179_v27  ;;  %v1101_v6 = vrot.slane %v4428_v37, 5  ;;  %v563_v7 = vshrl.u32 %v2916_v25, 16  ;;  %v3570_v29 = vld [vmem:[%s5629_s1 + $0x18] sm:$0xff]  }
  0x59   :  { %v4455_v10 = vcombine.low %v547_v44, %v561_v59  ;;  %v170_v39 = vrot.slane %v169_v63, 4  ;;  %v1098_v13 = vsel %vm3756_vm2, %v3026_v51, %v1097_v9  ;;  %v566_v14 = vshll.u32 %v2916_v25, 16  ;;  %v4483_v51 = vld [vmem:[%s5628_s0 + $0x74] sm:$0x1]  ;;  %v3012_v44 = vld [vmem:[%s5628_s0 + $0x70] sm:$0xe] }
  0x5a   :  { %v184_v21 = vrot.slane %v183_v0, 4  ;;  %v1102_v26 = vsel %vm3756_vm2, %v3027_v11, %v1101_v6  ;;  %v565_v28 = vrot.slane %v563_v7, 4  ;;  %v572_v40 = vshll.u32 %v3983_v4, 16  ;;  %3293 = vmatpush3.bf16.msra.mxu0 %v3570_v29  ;;  %v4492_v61 = vld [vmem:[%s5628_s0 + $0x7c] sm:$0x1]  ;;  %v3574_v29 = vld [vmem:[%s5629_s1 + $0x10] sm:$0xff]  }
  0x5b   :  { %1279 = vrot.lane.b32.xlu0 %v4455_v10, %s3727_s11  ;;  %v175_v48 = vsel %vm4149_vm5, %v170_v39, %v174_v19  ;;  %v3215_v30 = vcombine.low %v1098_v13, %v1102_v26  ;;  %v568_v32 = vrot.slane %v566_v14, 5  ;;  %v577_v25 = vshrl.u32 %v2917_v17, 16  ;;  %v3013_v63 = vld [vmem:[%s5628_s0 + $0x78] sm:$0xe] }
  0x5c   :  { %v189_v36 = vsel %vm4149_vm5, %v184_v21, %v188_v8  ;;  %v574_v33 = vrot.slane %v572_v40, 5  ;;  %v580_v38 = vshll.u32 %v2917_v17, 16  ;;  %v586_v4 = vshll.u32 %v3988_v5, 16  ;;  %v2918_v8 = vld [vmem:[%s5628_s0 + $0x78] sm:$0xf] }
  0x5d   :  { %v4478_v52 = vcombine.low %v175_v48, %v189_v36  ;;  %v569_v45 = vor.u32 %v568_v32, %v565_v28  ;;  %v579_v49 = vrot.slane %v577_v25, 4  ;;  %v191_v19 = vshrl.u32 %v25_v16, 16  ;;  %v2919_v32 = vld [vmem:[%s5628_s0 + $0x80] sm:$0xf]  ;;  %v3575_v36 = vld [vmem:[%s5629_s1 + $0x48] sm:$0xff]  }
  0x5e   :  { %v582_v5 = vrot.slane %v580_v38, 5  ;;  %v588_v54 = vrot.slane %v586_v4, 5  ;;  %v194_v27 = vshll.u32 %v25_v16, 16  ;;  %v200_v55 = vshll.u32 %v4006_v22, 16  ;;  %v3573_v16 = vld [vmem:[%s5629_s1 + $0x50] sm:$0xff]  }
  0x5f   :  { %1199 = vrot.lane.b32.xlu1 %v4478_v52, %s3727_s11  ;;  %2468 = vrot.lane.b32.xlu0 %v3215_v30, %s3727_s11  ;;  %v570_v9 = vrot.slane %v569_v45, 4  ;;  %v193_v22 = vrot.slane %v191_v19, 4  ;;  %v205_v11 = vshrl.u32 %v26_v43, 16  ;;  %v208_v53 = vshll.u32 %v26_v43, 16  ;;  %v27_v45 = vld [vmem:[%s5628_s0 + $0x70] sm:$0xf] }
  0x60   :  { %v583_v59 = vor.u32 %v582_v5, %v579_v49  ;;  %v196_v0 = vrot.slane %v194_v27, 5  ;;  %v202_v6 = vrot.slane %v200_v55, 5  ;;  %v214_v17 = vshll.u32 %v4011_v23, 16  ;;  %3294 = vmatprep.subr.bf16.mxu0 %v3573_v16 }
  0x61   :  { %v575_v7 = vsel %vm4149_vm5, %v570_v9, %v574_v33  ;;  %v207_v39 = vrot.slane %v205_v11, 4  ;;  %v210_v13 = vrot.slane %v208_v53, 5  ;;  %v3028_v14 = vrot.slane %v3012_v44, 9  ;;  %3295 = vmatpush3.bf16.msra.mxu0 %v3574_v29 }
  0x62   :  { %v584_v21 = vrot.slane %v583_v59, 4  ;;  %v197_v26 = vor.u32 %v196_v0, %v193_v22  ;;  %v216_v28 = vrot.slane %v214_v17, 5  ;;  %v1105_v40 = vrot.slane %v4483_v51, 5  ;;  %3296 = vmatprep.subr.bf16.mxu0 %v3575_v36  ;;  %v3014_v59 = vld [vmem:[%s5628_s0 + $0x80] sm:$0xe]  ;;  %v3576_v0 = vld [vmem:[%s5629_s1 + $0x8] sm:$0xff]  }
  0x63   :  { %v211_v23 = vor.u32 %v210_v13, %v207_v39  ;;  %v3029_v48 = vrot.slane %v3013_v63, 9  ;;  %v1109_v30 = vrot.slane %v4492_v61, 5  ;;  %v591_v25 = vshrl.u32 %v2918_v8, 16 }
  0x64   :  { %v589_v33 = vsel %vm4149_vm5, %v584_v21, %v588_v54  ;;  %v198_v38 = vrot.slane %v197_v26, 4  ;;  %v1106_v4 = vsel %vm3756_vm2, %v3028_v14, %v1105_v40  ;;  %v594_v43 = vshll.u32 %v2918_v8, 16  ;;  %v28_v54 = vld [vmem:[%s5628_s0 + $0x78] sm:$0xf]  ;;  %v4558_v21 = vld [vmem:[%s5628_s0 + $0x8c] sm:$0x1] }
  0x65   :  { %v4527_v49 = vcombine.low %v575_v7, %v589_v33  ;;  %v212_v19 = vrot.slane %v211_v23, 4  ;;  %v1110_v44 = vsel %vm3756_vm2, %v3029_v48, %v1109_v30  ;;  %v593_v5 = vrot.slane %v591_v25, 4  ;;  %v3015_v26 = vld [vmem:[%s5628_s0 + $0x88] sm:$0xe]  ;;  %3297 = vmatpush3.bf16.msra.mxu0 %v3576_v0 }
  0x66   :  { %v203_v27 = vsel %vm4149_vm5, %v198_v38, %v202_v6  ;;  %v3216_v55 = vcombine.low %v1106_v4, %v1110_v44  ;;  %v596_v63 = vrot.slane %v594_v43, 5  ;;  %v600_v8 = vshll.u32 %v4029_v41, 16  ;;  %v4569_v48 = vld [vmem:[%s5628_s0 + $0x88] sm:$0xf] }
  0x67   :  { %1281 = vrot.lane.b32.xlu1 %v4527_v49, %s3727_s11  ;;  %v217_v9 = vsel %vm4149_vm5, %v212_v19, %v216_v28  ;;  %v605_v22 = vshrl.u32 %v2919_v32, 16  ;;  %v608_v11 = vshll.u32 %v2919_v32, 16  ;;  %v614_v53 = vshll.u32 %v4034_v42, 16  ;;  %v4553_v42 = vld [vmem:[%s5628_s0 + $0x84] sm:$0x1] }
  0x68   :  { %v4548_v6 = vcombine.low %v203_v27, %v217_v9  ;;  %v597_v41 = vor.u32 %v596_v63, %v593_v5  ;;  %v602_v17 = vrot.slane %v600_v8, 5  ;;  %v219_v7 = vshrl.u32 %v27_v45, 16  ;;  %v4578_v5 = vld [vmem:[%s5628_s0 + $0x90] sm:$0xf]  ;;  %v4589_v8 = vld [vmem:[%s5628_s0 + $0x80] sm:$0xf] }
  0x69   :  { %v607_v39 = vrot.slane %v605_v22, 4  ;;  %v610_v13 = vrot.slane %v608_v11, 5  ;;  %v616_v14 = vrot.slane %v614_v53, 5  ;;  %v222_v16 = vshll.u32 %v27_v45, 16 }
  0x6a   :  { %1201 = vrot.lane.b32.xlu0 %v4548_v6, %s3727_s11  ;;  %v598_v28 = vrot.slane %v597_v41, 4  ;;  %v221_v40 = vrot.slane %v219_v7, 4  ;;  %v228_v29 = vshll.u32 %v4052_v56, 16  ;;  %v233_v23 = vshrl.u32 %v28_v54, 16  ;;  %v3580_v7 = vld [vmem:[%s5629_s1] sm:$0xff]  }
  0x6b   :  { %2470 = vrot.lane.b32.xlu1 %v3216_v55, %s3727_s11  ;;  %v611_v30 = vor.u32 %v610_v13, %v607_v39  ;;  %v224_v32 = vrot.slane %v222_v16, 5  ;;  %v236_v25 = vshll.u32 %v28_v54, 16  ;;  %v242_v36 = vshll.u32 %v4057_v57, 16  ;;  %v3579_v54 = vld [vmem:[%s5629_s1 + $0x40] sm:$0xff]  }
  0x6c   :  { %v603_v33 = vsel %vm4149_vm5, %v598_v28, %v602_v17  ;;  %v230_v38 = vrot.slane %v228_v29, 5  ;;  %v235_v4 = vrot.slane %v233_v23, 4  ;;  %v3030_v43 = vrot.slane %v3014_v59, 9  ;;  %3298 = vmatprep.subr.bf16.mxu0 %v3579_v54  ;;  %v3694_v23 = vld [vmem:[%s5628_s0 + $0x94] sm:$0x1] }
  0x6d   :  { %v612_v56 = vrot.slane %v611_v30, 4  ;;  %v225_v45 = vor.u32 %v224_v32, %v221_v40  ;;  %v238_v19 = vrot.slane %v236_v25, 5  ;;  %v244_v44 = vrot.slane %v242_v36, 5  ;;  %v4618_v32 = vld [vmem:[%s5628_s0 + $0x88] sm:$0xf]  ;;  %3299 = vmatpush3.bf16.msra.mxu0 %v3580_v7 }
  0x6e   :  { %v1113_v57 = vrot.slane %v4553_v42, 5  ;;  %v3031_v27 = vrot.slane %v3015_v26, 9  ;;  %v1117_v55 = vrot.slane %v4558_v21, 5  ;;  %v619_v63 = vshrl.u32 %v4569_v48, 16  ;;  %v3693_v26 = vld [vmem:[%s5628_s0 + $0x8c] sm:$0x1] }
  0x6f   :  { %v617_v9 = vsel %vm4149_vm5, %v612_v56, %v616_v14  ;;  %v226_v22 = vrot.slane %v225_v45, 4  ;;  %v239_v11 = vor.u32 %v238_v19, %v235_v4  ;;  %v622_v53 = vshll.u32 %v4569_v48, 16  ;;  %v4627_v4 = vld [vmem:[%s5628_s0 + $0x10] sm:$0xf] }
  0x70   :  { %v4594_v59 = vcombine.low %v603_v33, %v617_v9  ;;  %v1114_v0 = vsel %vm3756_vm2, %v3030_v43, %v1113_v57  ;;  %v1118_v41 = vsel %vm3756_vm2, %v3031_v27, %v1117_v55  ;;  %v621_v17 = vrot.slane %v619_v63, 4  ;;  %v3695_v9 = vld [vmem:[%s5628_s0 + $0x84] sm:$0x1] }
  0x71   :  { %v231_v39 = vsel %vm4149_vm5, %v226_v22, %v230_v38  ;;  %v240_v13 = vrot.slane %v239_v11, 4  ;;  %v3217_v14 = vcombine.low %v1114_v0, %v1118_v41  ;;  %v624_v16 = vrot.slane %v622_v53, 5 }
  0x72   :  { %1283 = vrot.lane.b32.xlu0 %v4594_v59, %s3727_s11  ;;  %v628_v28 = vshll.u32 %v3693_v26, 16  ;;  %v633_v40 = vshrl.u32 %v4578_v5, 16  ;;  %v636_v29 = vshll.u32 %v4578_v5, 16  ;;  %v642_v30 = vshll.u32 %v3694_v23, 16 }
  0x73   :  { %v245_v25 = vsel %vm4149_vm5, %v240_v13, %v244_v44  ;;  %v625_v36 = vor.u32 %v624_v16, %v621_v17  ;;  %v247_v33 = vshrl.u32 %v4589_v8, 16  ;;  %v250_v38 = vshll.u32 %v4589_v8, 16  ;;  %v4634_v44 = vld [vmem:[%s5628_s0 + $0x18] sm:$0xf]  ;;  %v3696_v17 = vld [vmem:[%s5628_s0 + $0x8c] sm:$0x1] }
  0x74   :  { %v4629_v43 = vcombine.low %v231_v39, %v245_v25  ;;  %v630_v56 = vrot.slane %v628_v28, 5  ;;  %v635_v45 = vrot.slane %v633_v40, 4  ;;  %v638_v19 = vrot.slane %v636_v29, 5  ;;  %v4653_v28 = vld [vmem:[%s5628_s0 + $0x94] sm:$0x1] }
  0x75   :  { %v626_v54 = vrot.slane %v625_v36, 4  ;;  %v644_v57 = vrot.slane %v642_v30, 5  ;;  %v249_v27 = vrot.slane %v247_v33, 4  ;;  %v252_v55 = vrot.slane %v250_v38, 5  ;;  %v3016_v40 = vld [vmem:[%s5628_s0 + $0x90] sm:$0xe] }
  0x76   :  { %5645 = vst [vmem:[#allocation2_spill] sm:$0xff] %v4629_v43  ;;  %1203 = vrot.lane.b32.xlu1 %v4629_v43, %s3727_s11  ;;  %2472 = vrot.lane.b32.xlu0 %v3217_v14, %s3727_s11  ;;  %v639_v63 = vor.u32 %v638_v19, %v635_v45  ;;  %v256_v22 = vshll.u32 %v3695_v9, 16  ;;  %v261_v11 = vshrl.u32 %v4618_v32, 16  ;;  %v264_v53 = vshll.u32 %v4618_v32, 16  ;;  %v4662_v36 = vld [vmem:[%s5628_s0 + $0x9c] sm:$0x1] }
  0x77   :  { %v631_v0 = vsel %vm4149_vm5, %v626_v54, %v630_v56  ;;  %v253_v41 = vor.u32 %v252_v55, %v249_v27  ;;  %v270_v7 = vshll.u32 %v3696_v17, 16  ;;  %v792_v39 = vshrl.u32 %v4627_v4, 16  ;;  %v3017_v33 = vld [vmem:[%s5628_s0 + $0x98] sm:$0xe]  ;;  %v3697_v45 = vld [vmem:[%s5628_s0 + $0x14] sm:$0x1] }
  0x78   :  { %v640_v13 = vrot.slane %v639_v63, 4  ;;  %v258_v14 = vrot.slane %v256_v22, 5  ;;  %v263_v16 = vrot.slane %v261_v11, 4  ;;  %v266_v26 = vrot.slane %v264_v53, 5 }
  0x79   :  { %v254_v29 = vrot.slane %v253_v41, 4  ;;  %v272_v23 = vrot.slane %v270_v7, 5  ;;  %v794_v30 = vrot.slane %v792_v39, 4  ;;  %v795_v25 = vshll.u32 %v4627_v4, 16  ;;  %v3698_v41 = vld [vmem:[%s5628_s0 + $0x1c] sm:$0x1] }
  0x7a   :  { %v645_v38 = vsel %vm4149_vm5, %v640_v13, %v644_v57  ;;  %v267_v56 = vor.u32 %v266_v26, %v263_v16  ;;  %v801_v19 = vshll.u32 %v3697_v45, 16  ;;  %v806_v54 = vshrl.u32 %v4634_v44, 16  ;;  %v4673_v27 = vpop.permute.xlu0 %1641  ;;  %v4686_v7 = vld [vmem:[%s5628_s0 + $0x20] sm:$0xf]  ;;  %v4694_v16 = vld [vmem:[%s5628_s0 + $0x28] sm:$0xf] }
  0x7b   :  { %v4675_v55 = vcombine.low %v631_v0, %v645_v38  ;;  %v259_v63 = vsel %vm4149_vm5, %v254_v29, %v258_v14  ;;  %v797_v9 = vrot.slane %v795_v25, 5  ;;  %v809_v22 = vshll.u32 %v4634_v44, 16 }
  0x7c   :  { %v268_v11 = vrot.slane %v267_v56, 4  ;;  %v803_v57 = vrot.slane %v801_v19, 5  ;;  %v808_v53 = vrot.slane %v806_v54, 4  ;;  %v815_v17 = vshll.u32 %v3698_v41, 16 }
  0x7d   :  { %5646 = vst [vmem:[#allocation3_spill] sm:$0xff] %v4675_v55  ;;  %1285 = vrot.lane.b32.xlu1 %v4675_v55, %s3727_s11  ;;  %v798_v0 = vor.u32 %v797_v9, %v794_v30  ;;  %v811_v39 = vrot.slane %v809_v22, 5  ;;  %v3032_v13 = vrot.slane %v3016_v40, 9  ;;  %v1121_v14 = vrot.slane %v4653_v28, 5  ;;  %v4696_v26 = vpop.permute.xlu1 %1643  ;;  %v4704_v40 = vld [vmem:[%s5628_s0 + $0x30] sm:$0xf] }
  0x7e   :  { %v273_v29 = vsel %vm4149_vm5, %v268_v11, %v272_v23  ;;  %v817_v25 = vrot.slane %v815_v17, 5  ;;  %v3033_v38 = vrot.slane %v3017_v33, 9  ;;  %v1125_v56 = vrot.slane %v4662_v36, 5 }
  0x7f   :  { %v4706_v30 = vcombine.low %v259_v63, %v273_v29  ;;  %v799_v45 = vrot.slane %v798_v0, 4  ;;  %v812_v19 = vor.u32 %v811_v39, %v808_v53  ;;  %v1122_v54 = vsel %vm3756_vm2, %v3032_v13, %v1121_v14  ;;  %v4710_v9 = vpop.permute.xlu0 %1601  ;;  %v4720_v63 = vld [vmem:[%s5628_s0 + $0x38] sm:$0xf] }
  0x80   :  { %v1126_v23 = vsel %vm3756_vm2, %v3033_v38, %v1125_v56  ;;  %v820_v33 = vshrl.u32 %v4686_v7, 16  ;;  %v823_v22 = vshll.u32 %v4686_v7, 16  ;;  %v829_v11 = vshll.u32 %v4203_v60, 16 }
  0x81   :  { %5647 = vst [vmem:[#allocation4_spill] sm:$0xff] %v4706_v30  ;;  %1205 = vrot.lane.b32.xlu0 %v4706_v30, %s3727_s11  ;;  %v804_v53 = vsel %vm4149_vm5, %v799_v45, %v803_v57  ;;  %v813_v41 = vrot.slane %v812_v19, 4  ;;  %v3218_v2 = vcombine.low %v1122_v54, %v1126_v23  ;;  %v834_v17 = vshrl.u32 %v4694_v16, 16  ;;  %v4727_v0 = vpop.permute.xlu1 %1603 }
  0x82   :  { %v822_v39 = vrot.slane %v820_v33, 4  ;;  %v825_v13 = vrot.slane %v823_v22, 5  ;;  %v831_v60 = vrot.slane %v829_v11, 5  ;;  %v837_v14 = vshll.u32 %v4694_v16, 16  ;;  %v4743_v22 = vld [vmem:[%s5628_s0 + $0x40] sm:$0xf] }
  0x83   :  { %v818_v29 = vsel %vm4149_vm5, %v813_v41, %v817_v25  ;;  %2474 = vrot.lane.b32.xlu1 %v3218_v2, %s3727_s11  ;;  %v836_v38 = vrot.slane %v834_v17, 4  ;;  %v843_v56 = vshll.u32 %v4220_v35, 16  ;;  %v848_v57 = vshrl.u32 %v4704_v40, 16  ;;  %v4735_v45 = vpop.permute.xlu0 %1645 }
  0x84   :  { %v4737_v19 = vcombine.low %v804_v53, %v818_v29  ;;  %v826_v54 = vor.u32 %v825_v13, %v822_v39  ;;  %v839_v23 = vrot.slane %v837_v14, 5  ;;  %v851_v33 = vshll.u32 %v4704_v40, 16 }
  0x85   :  { %v845_v25 = vrot.slane %v843_v56, 5  ;;  %v850_v11 = vrot.slane %v848_v57, 4  ;;  %v857_v41 = vshll.u32 %v4285_v34, 16  ;;  %v862_v35 = vshrl.u32 %v4720_v63, 16  ;;  %v4747_v2 = vpop.permute.xlu1 %1605 }
  0x86   :  { %5648 = vst [vmem:[#allocation5_spill] sm:$0xff] %v4737_v19  ;;  %2162 = vrot.lane.b32.xlu0 %v4737_v19, %s3727_s11  ;;  %v827_v53 = vrot.slane %v826_v54, 4  ;;  %v840_v17 = vor.u32 %v839_v23, %v836_v38  ;;  %v853_v39 = vrot.slane %v851_v33, 5  ;;  %v865_v13 = vshll.u32 %v4720_v63, 16  ;;  %v4760_v38 = vld [vmem:[%s5628_s0 + $0x48] sm:$0xf] }
  0x87   :  { %v859_v14 = vrot.slane %v857_v41, 5  ;;  %v864_v29 = vrot.slane %v862_v35, 4  ;;  %v871_v30 = vshll.u32 %v4290_v15, 16  ;;  %v4753_v56 = vpop.permute.xlu0 %1647  ;;  %v4765_v23 = vsel %vm1287_vm6, %v4175_v31, %v4673_v27  ;;  %v3560_v19 = vld [vmem:[%s5629_s1 + $0x1b8] sm:$0xff]  }
  0x88   :  { %v832_v34 = vsel %vm4149_vm5, %v827_v53, %v831_v60  ;;  %v841_v57 = vrot.slane %v840_v17, 4  ;;  %v854_v55 = vor.u32 %v853_v39, %v850_v11  ;;  %v867_v43 = vrot.slane %v865_v13, 5  ;;  %v4774_v60 = vld [vmem:[%s5628_s0 + $0x60] sm:$0xf]  ;;  %1882 = vmatprep.mubr.bf16.mxu1 %v4765_v23 }
  0x89   :  { %v873_v54 = vrot.slane %v871_v30, 5  ;;  %v876_v15 = vshrl.u32 %v4743_v22, 16  ;;  %v879_v33 = vshll.u32 %v4743_v22, 16  ;;  %v4769_v41 = vpop.permute.xlu1 %1607  ;;  %v3599_v30 = vld [vmem:[%s5629_s1 + $0x178] sm:$0xff]   ;;  %v885_v35 = vshll.u32 %v4355_v12, 16 }
  0x8a   :  { %v846_v11 = vsel %vm4149_vm5, %v841_v57, %v845_v25  ;;  %v855_v31 = vrot.slane %v854_v55, 4  ;;  %v868_v27 = vor.u32 %v867_v43, %v864_v29  ;;  %v890_v13 = vshrl.u32 %v4760_v38, 16  ;;  %v4792_v25 = vld [vmem:[%s5628_s0 + $0x68] sm:$0xf]  ;;  %3412 = vmatprep.subr.bf16.mxu0 %v3599_v30  ;;  %v3565_v57 = vld [vmem:[%s5629_s1 + $0x1f0] sm:$0xff]  }
  0x8b   :  { %v4783_v53 = vcombine.low %v832_v34, %v846_v11  ;;  %v878_v17 = vrot.slane %v876_v15, 4  ;;  %v881_v39 = vrot.slane %v879_v33, 5  ;;  %v4794_v43 = vpop.permute.xlu0 %1649  ;;  %v887_v29 = vrot.slane %v885_v35, 5 }
  0x8c   :  { %v860_v12 = vsel %vm4149_vm5, %v855_v31, %v859_v14  ;;  %v869_v55 = vrot.slane %v868_v27, 4  ;;  %v893_v34 = vshll.u32 %v4760_v38, 16  ;;  %v892_v33 = vrot.slane %v890_v13, 4 }
  0x8d   :  { %2164 = vrot.lane.b32.xlu1 %v4783_v53, %s3727_s11  ;;  %v882_v15 = vor.u32 %v881_v39, %v878_v17  ;;  %v899_v11 = vshll.u32 %v4373_v24, 16  ;;  %v1659_v30 = vsel %vm1287_vm6, %v4196_v20, %v4710_v9  ;;  %v4808_v14 = vpop.permute.xlu1 %1609  ;;  %v4815_v35 = vsel %vm1287_vm6, %v4253_v62, %v4696_v26  ;;  %v3566_v9 = vld [vmem:[%s5629_s1 + $0x1b0] sm:$0xff]  }
  0x8e   :  { %v874_v31 = vsel %vm4149_vm5, %v869_v55, %v873_v54  ;;  %v895_v27 = vrot.slane %v893_v34, 5  ;;  %1883 = vmatmul.mubr.bf16.vlgmr.msra.gmra.mxu1 %v1659_v30  ;;  %5649 = vst [vmem:[#allocation6_spill] sm:$0xff] %v4815_v35  ;;  %v904_v17 = vshrl.u32 %v4774_v60, 16  ;;  %v907_v20 = vshll.u32 %v4774_v60, 16 }
  0x8f   :  { %v4818_v39 = vcombine.low %v860_v12, %v874_v31  ;;  %v883_v24 = vrot.slane %v882_v15, 4  ;;  %v901_v13 = vrot.slane %v899_v11, 5  ;;  %3477 = vmatpush3.bf16.msra.mxu1 %v3560_v19  ;;  %1890 = vmatprep.mubr.bf16.mxu1 %v4815_v35  ;;  %v4825_v54 = vpop.permute.xlu0 %1651  ;;  %v913_v26 = vshll.u32 %v4419_v1, 16  ;;  %v3571_v19 = vld [vmem:[%s5629_s1 + $0x1e8] sm:$0xff]   ;;  %v4841_v1 = vld [vmem:[%s5628_s0 + $0x70] sm:$0xf] }
  0x90   :  { %v896_v55 = vor.u32 %v895_v27, %v892_v33  ;;  %3478 = vmatprep.subr.bf16.mxu1 %v3565_v57  ;;  %v906_v62 = vrot.slane %v904_v17, 4  ;;  %v918_v12 = vshrl.u32 %v4792_v25, 16  ;;  %v909_v15 = vrot.slane %v907_v20, 5 }
  0x91   :  { %5650 = vst [vmem:[#allocation7_spill] sm:$0xff] %v4818_v39  ;;  %2166 = vrot.lane.b32.xlu0 %v4818_v39, %s3727_s11  ;;  %v888_v34 = vsel %vm4149_vm5, %v883_v24, %v887_v29  ;;  %v921_v11 = vshll.u32 %v4792_v25, 16  ;;  %v927_v57 = vshll.u32 %v4428_v37, 16  ;;  %v915_v30 = vrot.slane %v913_v26, 5  ;;  %v4846_v17 = vpop.permute.xlu1 %1611  ;;  %v4851_v29 = vld [vmem:[%s5628_s0 + $0x78] sm:$0xf] }
  0x92   :  { %v897_v33 = vrot.slane %v896_v55, 4  ;;  %v920_v31 = vrot.slane %v918_v12, 4  ;;  %v1663_v27 = vsel %vm1287_vm6, %v4274_v47, %v4727_v0  ;;  %v3572_v37 = vld [vmem:[%s5629_s1 + $0x1a8] sm:$0xff]   ;;  %v910_v24 = vor.u32 %v909_v15, %v906_v62  ;;  %v3577_v62 = vld [vmem:[%s5629_s1 + $0x1e0] sm:$0xff]  }
  0x93   :  { %v923_v20 = vrot.slane %v921_v11, 5  ;;  %v929_v55 = vrot.slane %v927_v57, 5  ;;  %3479 = vmatpush3.bf16.msra.mxu1 %v3566_v9  ;;  %v4859_v26 = vsel %vm1287_vm6, %v4324_v3, %v4735_v45  ;;  %v932_v0 = vshrl.u32 %v4841_v1, 16  ;;  %v4872_v9 = vld [vmem:[%s5628_s0 + $0x80] sm:$0xf]  ;;  %v4877_v15 = vpop.permute.xlu0 %1653 }
  0x94   :  { %5651 = vst [vmem:[#allocation8_spill] sm:$0xff] %v4859_v26  ;;  %v902_v47 = vsel %vm4149_vm5, %v897_v33, %v901_v13  ;;  %3480 = vmatprep.subr.bf16.mxu1 %v3571_v19  ;;  %v935_v12 = vshll.u32 %v4841_v1, 16  ;;  %v941_v35 = vshll.u32 %v4483_v51, 16  ;;  %v911_v45 = vrot.slane %v910_v24, 4 }
  0x95   :  { %v4874_v3 = vcombine.low %v888_v34, %v902_v47  ;;  %v924_v13 = vor.u32 %v923_v20, %v920_v31  ;;  %v946_v19 = vshrl.u32 %v4851_v29, 16  ;;  %v934_v11 = vrot.slane %v932_v0, 4 }
  0x96   :  { %1891 = vmatmul.mubr.bf16.gmra.mxu1 %v1663_v27  ;;  %v937_v51 = vrot.slane %v935_v12, 5  ;;  %v943_v57 = vrot.slane %v941_v35, 5  ;;  %v949_v33 = vshll.u32 %v4851_v29, 16  ;;  %v916_v39 = vsel %vm4149_vm5, %v911_v45, %v915_v30  ;;  %v4889_v27 = vpop.permute.xlu1 %1613  ;;  %v4899_v30 = vld [vmem:[%s5628_s0 + $0x88] sm:$0xf] }
  0x97   :  { %5652 = vst [vmem:[#allocation9_spill] sm:$0xff] %v4874_v3  ;;  %2168 = vrot.lane.b32.xlu1 %v4874_v3, %s3727_s11  ;;  %v925_v34 = vrot.slane %v924_v13, 4  ;;  %1898 = vmatprep.mubr.bf16.mxu1 %v4859_v26  ;;  %v948_v31 = vrot.slane %v946_v19, 4  ;;  %v955_v24 = vshll.u32 %v4492_v61, 16  ;;  %v1667_v35 = vsel %vm1287_vm6, %v4344_v58, %v4747_v2  ;;  %v3578_v61 = vld [vmem:[%s5629_s1 + $0x1a0] sm:$0xff]  }
  0x98   :  { %v938_v20 = vor.u32 %v937_v51, %v934_v11  ;;  %v951_v47 = vrot.slane %v949_v33, 5  ;;  %3481 = vmatpush3.bf16.msra.mxu1 %v3572_v37  ;;  %v4894_v0 = vsel %vm1287_vm6, %v4385_v50, %v4753_v56  ;;  %v960_v37 = vshrl.u32 %v4872_v9, 16  ;;  %v3583_v50 = vld [vmem:[%s5629_s1 + $0x1d8] sm:$0xff]   ;;  %v4917_v11 = vpop.permute.xlu0 %1655 }
  0x99   :  { %v930_v58 = vsel %vm4149_vm5, %v925_v34, %v929_v55  ;;  %v957_v2 = vrot.slane %v955_v24, 5  ;;  %3482 = vmatprep.subr.bf16.mxu1 %v3577_v62  ;;  %v963_v12 = vshll.u32 %v4872_v9, 16  ;;  %v969_v19 = vshll.u32 %v4553_v42, 16  ;;  %v3584_v55 = vld [vmem:[%s5629_s1 + $0x198] sm:$0xff]  }
  0x9a   :  { %v4911_v56 = vcombine.low %v916_v39, %v930_v58  ;;  %v939_v45 = vrot.slane %v938_v20, 4  ;;  %v952_v13 = vor.u32 %v951_v47, %v948_v31  ;;  %v962_v62 = vrot.slane %v960_v37, 4  ;;  %v4924_v39 = vld [vmem:[%s5628_s0 + $0x90] sm:$0xf]  ;;  %v4929_v42 = vld [vmem:[%s5628_s0 + $0x98] sm:$0xf] }
  0x9b   :  { %v965_v51 = vrot.slane %v963_v12, 5  ;;  %v974_v33 = vshrl.u32 %v4899_v30, 16  ;;  %v977_v34 = vshll.u32 %v4899_v30, 16  ;;  %v971_v20 = vrot.slane %v969_v19, 5  ;;  %v3587_v58 = vld [vmem:[%s5629_s1 + $0x1d0] sm:$0xff]  }
  0x9c   :  { %5653 = vst [vmem:[#allocation10_spill] sm:$0xff] %v4911_v56  ;;  %2170 = vrot.lane.b32.xlu0 %v4911_v56, %s3727_s11  ;;  %v944_v31 = vsel %vm4149_vm5, %v939_v45, %v943_v57  ;;  %v953_v24 = vrot.slane %v952_v13, 4  ;;  %v983_v47 = vshll.u32 %v4558_v21, 16  ;;  %3483 = vmatpush3.bf16.msra.mxu1 %v3578_v61  ;;  %v4941_v56 = vpop.permute.xlu1 %1615  ;;  %v1671_v21 = vsel %vm1287_vm6, %v4414_v18, %v4769_v41  ;;  %v3699_v61 = vld [vmem:[%s5628_s0 + $0x8] sm:$0xf] }
  0x9d   :  { %v966_v37 = vor.u32 %v965_v51, %v962_v62  ;;  %v976_v12 = vrot.slane %v974_v33, 4  ;;  %v979_v26 = vrot.slane %v977_v34, 5  ;;  %3484 = vmatprep.subr.bf16.mxu1 %v3583_v50  ;;  %v3700_v45 = vld [vmem:[%s5628_s0 + $0x10] sm:$0xf]  ;;  %v3701_v19 = vld [vmem:[%s5628_s0] sm:$0xf]  ;;  %v1675_v46 = vsel %vm1287_vm6, %v4478_v52, %v4808_v14 }
  0x9e   :  { %v958_v3 = vsel %vm4149_vm5, %v953_v24, %v957_v2  ;;  %1899 = vmatmul.mubr.bf16.gmra.mxu1 %v1667_v35  ;;  %v985_v57 = vrot.slane %v983_v47, 5  ;;  %v3050_v50 = vcombine.low %v3699_v61, %v3700_v45  ;;  %v3702_v18 = vld [vmem:[%s5628_s0 + $0x8] sm:$0xf]  ;;  %v3588_v62 = vld [vmem:[%s5629_s1 + $0x190] sm:$0xff]   ;;  %v991_v51 = vshll.u32 %v4924_v39, 16 }
  0x9f   :  { %v4952_v13 = vcombine.low %v944_v31, %v958_v3  ;;  %1906 = vmatprep.mubr.bf16.mxu1 %v4894_v0  ;;  %v967_v35 = vrot.slane %v966_v37, 4  ;;  %v980_v2 = vor.u32 %v979_v26, %v976_v12  ;;  %v3034_v41 = vcombine.low %v3701_v19, %v3702_v18  ;;  %v3600_v19 = vld [vmem:[%s5629_s1 + $0x138] sm:$0xff]  }
  0xa0   :  { %v988_v3 = vshrl.u32 %v4924_v39, 16  ;;  %v997_v33 = vshll.u32 %v4653_v28, 16  ;;  %v1002_v26 = vshrl.u32 %v4929_v42, 16  ;;  %3485 = vmatpush3.bf16.msra.mxu1 %v3584_v55  ;;  %v1005_v47 = vshll.u32 %v4929_v42, 16  ;;  %v3591_v28 = vld [vmem:[%s5629_s1 + $0x1c8] sm:$0xff]  }
  0xa1   :  { %2172 = vrot.lane.b32.xlu1 %v4952_v13, %s3727_s11  ;;  %v972_v34 = vsel %vm4149_vm5, %v967_v35, %v971_v20  ;;  %v981_v31 = vrot.slane %v980_v2, 4  ;;  %v1272_v24 = vpop.permute.xlu0 %1271  ;;  %v1011_v37 = vshll.u32 %v4662_v36, 16  ;;  %3486 = vmatprep.subr.bf16.mxu1 %v3587_v58  ;;  %v993_v61 = vrot.slane %v991_v51, 5  ;;  %v3592_v20 = vld [vmem:[%s5629_s1 + $0x188] sm:$0xff]  }
  0xa2   :  { %v4978_v12 = vsel %vm1287_vm6, %v3050_v50, %v1272_v24  ;;  %v990_v55 = vrot.slane %v988_v3, 4  ;;  %v999_v45 = vrot.slane %v997_v33, 5  ;;  %v1004_v36 = vrot.slane %v1002_v26, 4  ;;  %v3595_v50 = vld [vmem:[%s5629_s1 + $0x1c0] sm:$0xff]  }
  0xa3   :  { %v986_v35 = vsel %vm4149_vm5, %v981_v31, %v985_v57  ;;  %1512 = vmatprep.mubr.bf16.mxu0 %v4978_v12  ;;  %v1007_v58 = vrot.slane %v1005_v47, 5  ;;  %v1013_v2 = vrot.slane %v1011_v37, 5  ;;  %v4997_v57 = vsel %vm1287_vm6, %v4455_v10, %v4794_v43  ;;  %v3601_v10 = vld [vmem:[%s5629_s1 + $0x170] sm:$0xff]   ;;  %v3703_v47 = vld [vmem:[%s5628_s0 + $0x18] sm:$0xf] }
  0xa4   :  { %v4992_v18 = vcombine.low %v972_v34, %v986_v35  ;;  %v1192_v3 = vpop.permute.xlu1 %1191  ;;  %v994_v51 = vor.u32 %v993_v61, %v990_v55  ;;  %3487 = vmatpush3.bf16.msra.mxu1 %v3588_v62  ;;  %v3596_v34 = vld [vmem:[%s5629_s1 + $0x180] sm:$0xff]   ;;  %v3605_v55 = vld [vmem:[%s5629_s1 + $0x168] sm:$0xff]   ;;  %v3041_v52 = vcombine.low %v4589_v8, %v4618_v32 }
  0xa5   :  { %v1290_v33 = vsel %vm1287_vm6, %v3034_v41, %v1192_v3  ;;  %v1008_v26 = vor.u32 %v1007_v58, %v1004_v36  ;;  %3488 = vmatprep.subr.bf16.mxu1 %v3591_v28  ;;  %v3602_v41 = vld [vmem:[%s5629_s1 + $0x130] sm:$0xff]   ;;  %v5014_v62 = vpop.permute.xlu0 %2460  ;;  %v3704_v37 = vld [vmem:[%s5628_s0 + $0x20] sm:$0xf]  ;;  %v5041_v36 = vsel %vm1287_vm6, %v4527_v49, %v4825_v54  ;;  %v3057_v58 = vcombine.low %v4569_v48, %v4578_v5 }
  0xa6   :  { %2174 = vrot.lane.b32.xlu0 %v4992_v18, %s3727_s11  ;;  %1907 = vmatmul.mubr.bf16.gmra.mxu1 %v1671_v21  ;;  %v995_v31 = vrot.slane %v994_v51, 4  ;;  %v3051_v28 = vcombine.low %v3703_v47, %v3704_v37  ;;  %v3148_v49 = vcombine.low %v4686_v7, %v4694_v16  ;;  %v3149_v54 = vcombine.low %v4704_v40, %v4720_v63  ;;  %v3707_v47 = vld [vmem:[%s5628_s0 + $0x28] sm:$0xf]  ;;  %v3708_v37 = vld [vmem:[%s5628_s0 + $0x30] sm:$0xf] }
  0xa7   :  { %1513 = vmatmul.mubr.bf16.vlgmr.msra.gmra.mxu0 %v1290_v33  ;;  %1914 = vmatprep.mubr.bf16.mxu1 %v4997_v57  ;;  %v1009_v43 = vrot.slane %v1008_v26, 4  ;;  %v3150_v3 = vcombine.low %v4743_v22, %v4760_v38  ;;  %v3151_v51 = vcombine.low %v4774_v60, %v4792_v25  ;;  %v3152_v33 = vcombine.low %v4841_v1, %v4851_v29 }
  0xa8   :  { %v1000_v21 = vsel %vm4149_vm5, %v995_v31, %v999_v45  ;;  %3489 = vmatpush3.bf16.msra.mxu1 %v3592_v20  ;;  %3413 = vmatpush3.bf16.msra.mxu0 %v3600_v19  ;;  %v3705_v45 = vld [vmem:[%s5628_s0 + $0x10] sm:$0xf]  ;;  %v3706_v20 = vld [vmem:[%s5628_s0 + $0x18] sm:$0xf]  ;;  %v3153_v26 = vcombine.low %v4872_v9, %v4899_v30  ;;  %v3154_v31 = vcombine.low %v4924_v39, %v4929_v42 }
  0xa9   :  { %v1014_v24 = vsel %vm4149_vm5, %v1009_v43, %v1013_v2  ;;  %3490 = vmatprep.subr.bf16.mxu1 %v3595_v50  ;;  %3414 = vmatprep.subr.bf16.mxu0 %v3601_v10  ;;  %v3035_v35 = vcombine.low %v3705_v45, %v3706_v20  ;;  %v3606_v2 = vld [vmem:[%s5629_s1 + $0x128] sm:$0xff]   ;;  %v3147_v50 = vcombine.low %v4627_v4, %v4634_v44  ;;  %v3607_v10 = vld [vmem:[%s5629_s1 + $0x160] sm:$0xff]   ;;  %v3613_v45 = vld [vmem:[%s5629_s1 + $0x150] sm:$0xff]  }
  0xaa   :  { %v5027_v61 = vcombine.low %v1000_v21, %v1014_v24  ;;  %v1679_v21 = vsel %vm1287_vm6, %v4548_v6, %v4846_v17  ;;  %v3611_v24 = vld [vmem:[%s5629_s1 + $0x158] sm:$0xff]  }
  0xab   :  { %v3612_v17 = vld [vmem:[%s5629_s1 + $0x118] sm:$0xff]  }
  0xac   :  { %2176 = vrot.lane.b32.xlu1 %v5027_v61, %s3727_s11  ;;  %v1274_v14 = vpop.permute.xlu1 %1273  ;;  %3491 = vmatpush3.bf16.msra.mxu1 %v3596_v34 }
  0xad   :  { %v5059_v19 = vsel %vm1287_vm6, %v3051_v28, %v1274_v14  ;;  %3415 = vmatpush3.bf16.msra.mxu0 %v3602_v41  ;;  %v3608_v41 = vld [vmem:[%s5629_s1 + $0x120] sm:$0xff]   ;;  %v3052_v28 = vcombine.low %v3707_v47, %v3708_v37  ;;  %v3614_v14 = vld [vmem:[%s5629_s1 + $0x110] sm:$0xff]   ;;  %v3618_v47 = vld [vmem:[%s5629_s1 + $0x108] sm:$0xff]  }
  0xae   :  { %1915 = vmatmul.mubr.bf16.gmra.mxu1 %v1675_v46  ;;  %1520 = vmatprep.mubr.bf16.mxu0 %v5059_v19  ;;  %v3712_v37 = vld [vmem:[%s5628_s0 + $0x40] sm:$0xf] }
  0xaf   :  { %v1194_v34 = vpop.permute.xlu0 %1193  ;;  %1922 = vmatprep.mubr.bf16.mxu1 %v5041_v36  ;;  %3416 = vmatprep.subr.bf16.mxu0 %v3605_v55  ;;  %v5095_v55 = vsel %vm1287_vm6, %v4594_v59, %v4877_v15  ;;  %v3709_v59 = vld [vmem:[%s5628_s0 + $0x20] sm:$0xf]  ;;  %v3710_v15 = vld [vmem:[%s5628_s0 + $0x28] sm:$0xf] }
  0xb0   :  { %v1294_v43 = vsel %vm1287_vm6, %v3035_v35, %v1194_v34  ;;  %v2463_v6 = vpop.permute.xlu1 %2462  ;;  %v3036_v35 = vcombine.low %v3709_v59, %v3710_v15  ;;  %v5654_v34 = vld [vmem:[#allocation2_spill] sm:$0xff]  ;;  %v3713_v15 = vld [vmem:[%s5628_s0 + $0x30] sm:$0xf] }
  0xb1   :  { %1521 = vmatmul.mubr.bf16.gmra.mxu0 %v1294_v43  ;;  %v3617_v43 = vld [vmem:[%s5629_s1 + $0x148] sm:$0xff]  }
  0xb2   :  { %3417 = vmatpush3.bf16.msra.mxu0 %v3606_v2 }
  0xb3   :  { %3418 = vmatprep.subr.bf16.mxu0 %v3607_v10  ;;  %v1683_v10 = vsel %vm1287_vm6, %v5654_v34, %v4889_v27  ;;  %v3711_v27 = vld [vmem:[%s5628_s0 + $0x38] sm:$0xf] }
  0xb6   :  { %1923 = vmatmul.mubr.bf16.gmra.mxu1 %v1679_v21  ;;  %3419 = vmatpush3.bf16.msra.mxu0 %v3608_v41  ;;  %v5655_v21 = vld [vmem:[#allocation3_spill] sm:$0xff] }
  0xb7   :  { %v1276_v46 = vpop.permute.xlu0 %1275  ;;  %1930 = vmatprep.mubr.bf16.mxu1 %v5095_v55  ;;  %3420 = vmatprep.subr.bf16.mxu0 %v3611_v24  ;;  %v5127_v24 = vsel %vm1287_vm6, %v5655_v21, %v4917_v11  ;;  %v3619_v11 = vld [vmem:[%s5629_s1 + $0x140] sm:$0xff]  }
  0xb8   :  { %v5105_v20 = vsel %vm1287_vm6, %v3052_v28, %v1276_v46  ;;  %v3053_v28 = vcombine.low %v3711_v27, %v3712_v37 }
  0xb9   :  { %1528 = vmatprep.mubr.bf16.mxu0 %v5105_v20 }
  0xba   :  { %3421 = vmatpush3.bf16.msra.mxu0 %v3612_v17 }
  0xbb   :  { %v1196_v2 = vpop.permute.xlu1 %1195  ;;  %3422 = vmatprep.subr.bf16.mxu0 %v3613_v45  ;;  %v2465_v17 = vpop.permute.xlu0 %2464  ;;  %v3620_v45 = vld [vmem:[%s5629_s1 + $0x100] sm:$0xff]  }
  0xbc   :  { %v1298_v41 = vsel %vm1287_vm6, %v3036_v35, %v1196_v2  ;;  %v3714_v35 = vld [vmem:[%s5628_s0 + $0x38] sm:$0xf]  ;;  %v5656_v2 = vld [vmem:[#allocation4_spill] sm:$0xff] }
  0xbd   :  { %1529 = vmatmul.mubr.bf16.gmra.mxu0 %v1298_v41  ;;  %v1687_v34 = vsel %vm1287_vm6, %v5656_v2, %v4941_v56  ;;  %v3716_v56 = vld [vmem:[%s5628_s0 + $0x60] sm:$0xf] }
  0xbe   :  { %1931 = vmatmul.mubr.bf16.gmra.mxu1 %v1683_v10  ;;  %3423 = vmatpush3.bf16.msra.mxu0 %v3614_v14  ;;  %v3037_v14 = vcombine.low %v3713_v15, %v3714_v35  ;;  %v5657_v10 = vld [vmem:[#allocation5_spill] sm:$0xff] }
  0xbf   :  { %1938 = vmatprep.mubr.bf16.mxu1 %v5127_v24  ;;  %3424 = vmatprep.subr.bf16.mxu0 %v3617_v43  ;;  %v2478_v43 = vsel %vm1287_vm6, %v5657_v10, %v5014_v62  ;;  %v2482_v62 = vsel %vm1287_vm6, %v4783_v53, %v2463_v6  ;;  %v5658_v6 = vld [vmem:[#allocation7_spill] sm:$0xff]  ;;  %v3720_v10 = vld [vmem:[%s5628_s0 + $0x70] sm:$0xf] }
  0xc2   :  { %v1278_v46 = vpop.permute.xlu1 %1277  ;;  %3425 = vmatpush3.bf16.msra.mxu0 %v3618_v47  ;;  %v3715_v47 = vld [vmem:[%s5628_s0 + $0x58] sm:$0xf] }
  0xc3   :  { %v5146_v59 = vsel %vm1287_vm6, %v3053_v28, %v1278_v46  ;;  %3426 = vmatprep.subr.bf16.mxu0 %v3619_v11  ;;  %v3054_v27 = vcombine.low %v3715_v47, %v3716_v56  ;;  %v3717_v46 = vld [vmem:[%s5628_s0 + $0x50] sm:$0xf] }
  0xc4   :  { %1536 = vmatprep.mubr.bf16.mxu0 %v5146_v59 }
  0xc6   :  { %v1198_v41 = vpop.permute.xlu0 %1197  ;;  %1939 = vmatmul.mubr.bf16.gmra.mxu1 %v1687_v34  ;;  %3427 = vmatpush3.bf16.msra.mxu0 %v3620_v45  ;;  %v2467_v37 = vpop.permute.xlu1 %2466  ;;  %v3718_v45 = vld [vmem:[%s5628_s0 + $0x58] sm:$0xf]  ;;  %v3719_v34 = vld [vmem:[%s5628_s0 + $0x68] sm:$0xf] }
  0xc7   :  { %v1302_v21 = vsel %vm1287_vm6, %v3037_v14, %v1198_v41  ;;  %2669 = vmatprep.mubr.bf16.mxu1 %v2478_v43  ;;  %v3038_v15 = vcombine.low %v3717_v46, %v3718_v45  ;;  %v2486_v14 = vsel %vm1287_vm6, %v5658_v6, %v2465_v17  ;;  %v5659_v43 = vld [vmem:[#allocation6_spill] sm:$0xff]  ;;  %v3722_v17 = vld [vmem:[%s5628_s0 + $0x68] sm:$0xf]  ;;  %v5661_v45 = vld [vmem:[#allocation8_spill] sm:$0xff] }
  0xc8   :  { %1537 = vmatmul.mubr.bf16.gmra.mxu0 %v1302_v21  ;;  %v3721_v21 = vld [vmem:[%s5628_s0 + $0x60] sm:$0xf] }
  0xc9   :  { %v3039_v47 = vcombine.low %v3721_v21, %v3722_v17 }
  0xcd   :  { %v1280_v28 = vpop.permute.xlu0 %1279 }
  0xce   :  { %v5171_v11 = vsel %vm1287_vm6, %v3054_v27, %v1280_v28  ;;  %2670 = vmatmul.mubr.bf16.vlgmr.msra.gmra.mxu1 %v4765_v23  ;;  %v3055_v23 = vcombine.low %v3719_v34, %v3720_v10  ;;  %v5662_v34 = vld [vmem:[#allocation10_spill] sm:$0xff] }
  0xcf   :  { %1544 = vmatprep.mubr.bf16.mxu0 %v5171_v11  ;;  %2677 = vmatprep.mubr.bf16.mxu1 %v2482_v62  ;;  %v5660_v62 = vld [vmem:[#allocation9_spill] sm:$0xff] }
  0xd0   :  { %v2490_v28 = vsel %vm1287_vm6, %v5660_v62, %v2467_v37 }
  0xd1   :  { %v1200_v35 = vpop.permute.xlu1 %1199  ;;  %v2469_v2 = vpop.permute.xlu0 %2468 }
  0xd2   :  { %v1306_v53 = vsel %vm1287_vm6, %v3038_v15, %v1200_v35  ;;  %v3723_v15 = vld [vmem:[%s5628_s0 + $0x78] sm:$0xf]  ;;  %v3724_v35 = vld [vmem:[%s5628_s0 + $0x80] sm:$0xf]  ;;  %v2494_v37 = vsel %vm1287_vm6, %v5662_v34, %v2469_v2 }
  0xd3   :  { %1545 = vmatmul.mubr.bf16.gmra.mxu0 %v1306_v53  ;;  %v3056_v53 = vcombine.low %v3723_v15, %v3724_v35 }
  0xd6   :  { %2678 = vmatmul.mubr.bf16.gmra.mxu1 %v5659_v43  ;;  %v3726_v43 = vld [vmem:[%s5628_s0 + $0x78] sm:$0xf] }
  0xd7   :  { %2685 = vmatprep.mubr.bf16.mxu1 %v2486_v14 }
  0xd9   :  { %v1282_v41 = vpop.permute.xlu1 %1281 }
  0xda   :  { %v5198_v56 = vsel %vm1287_vm6, %v3055_v23, %v1282_v41  ;;  %v3725_v23 = vld [vmem:[%s5628_s0 + $0x70] sm:$0xf] }
  0xdb   :  { %1552 = vmatprep.mubr.bf16.mxu0 %v5198_v56  ;;  %v3040_v41 = vcombine.low %v3725_v23, %v3726_v43 }
  0xdc   :  { %v1202_v27 = vpop.permute.xlu0 %1201 }
  0xdd   :  { %v1310_v46 = vsel %vm1287_vm6, %v3039_v47, %v1202_v27  ;;  %v2471_v6 = vpop.permute.xlu1 %2470 }
  0xde   :  { %1553 = vmatmul.mubr.bf16.gmra.mxu0 %v1310_v46  ;;  %2686 = vmatmul.mubr.bf16.gmra.mxu1 %v5661_v45  ;;  %v2498_v2 = vsel %vm1287_vm6, %v4952_v13, %v2471_v6 }
  0xdf   :  { %2693 = vmatprep.mubr.bf16.mxu1 %v2490_v28 }
  0xe4   :  { %v1284_v14 = vpop.permute.xlu0 %1283 }
  0xe5   :  { %v1346_v10 = vsel %vm1287_vm6, %v3056_v53, %v1284_v14 }
  0xe6   :  { %1560 = vmatprep.mubr.bf16.mxu0 %v1346_v10  ;;  %2694 = vmatmul.mubr.bf16.gmra.mxu1 %v4894_v0 }
  0xe7   :  { %2701 = vmatprep.mubr.bf16.mxu1 %v2494_v37 }
  0xe8   :  { %v1204_v21 = vpop.permute.xlu1 %1203  ;;  %v2473_v47 = vpop.permute.xlu0 %2472 }
  0xe9   :  { %v1314_v17 = vsel %vm1287_vm6, %v3040_v41, %v1204_v21  ;;  %v2502_v13 = vsel %vm1287_vm6, %v4992_v18, %v2473_v47 }
  0xea   :  { %1561 = vmatmul.mubr.bf16.gmra.mxu0 %v1314_v17 }
  0xee   :  { %2702 = vmatmul.mubr.bf16.gmra.mxu1 %v4997_v57 }
  0xef   :  { %v1286_v27 = vpop.permute.xlu1 %1285  ;;  %2709 = vmatprep.mubr.bf16.mxu1 %v2498_v2 }
  0xf0   :  { %v1350_v62 = vsel %vm1287_vm6, %v3057_v58, %v1286_v27 }
  0xf1   :  { %1568 = vmatprep.mubr.bf16.mxu0 %v1350_v62 }
  0xf3   :  { %v1206_v0 = vpop.permute.xlu0 %1205 }
  0xf4   :  { %v1318_v28 = vsel %vm1287_vm6, %v3041_v52, %v1206_v0 }
  0xf5   :  { %1569 = vmatmul.mubr.bf16.gmra.mxu0 %v1318_v28  ;;  %v2475_v5 = vpop.permute.xlu1 %2474 }
  0xf6   :  { %2710 = vmatmul.mubr.bf16.gmra.mxu1 %v5041_v36  ;;  %v2506_v8 = vsel %vm1287_vm6, %v5027_v61, %v2475_v5 }
  0xf7   :  { %2717 = vmatprep.mubr.bf16.mxu1 %v2502_v13 }
  0xf8   :  { %v2163_v57 = vpop.permute.xlu0 %2162 }
  0xf9   :  { %v2180_v48 = vsel %vm1287_vm6, %v3147_v50, %v2163_v57 }
  0xfa   :  { %2371 = vmatprep.mubr.bf16.mxu0 %v2180_v48 }
  0xfd   :  { %2372 = vmatmul.mubr.bf16.vlgmr.msra.gmra.mxu0 %v4978_v12 }
  0xfe   :  { %2718 = vmatmul.mubr.bf16.gmra.mxu1 %v5095_v55 }
  0xff   :  { %v2165_v32 = vpop.permute.xlu1 %2164  ;;  %2725 = vmatprep.mubr.bf16.mxu1 %v2506_v8 }
 0x100   :  { %v2184_v18 = vsel %vm1287_vm6, %v3148_v49, %v2165_v32 }
 0x101   :  { %2379 = vmatprep.mubr.bf16.mxu0 %v2184_v18 }
 0x103   :  { %v2167_v4 = vpop.permute.xlu0 %2166 }
 0x104   :  { %v2188_v44 = vsel %vm1287_vm6, %v3149_v54, %v2167_v4 }
 0x105   :  { %2380 = vmatmul.mubr.bf16.gmra.mxu0 %v5059_v19 }
 0x106   :  { %2387 = vmatprep.mubr.bf16.mxu0 %v2188_v44  ;;  %2726 = vmatmul.mubr.bf16.gmra.mxu1 %v5127_v24 }
 0x109   :  { %v2169_v12 = vpop.permute.xlu1 %2168 }
 0x10a   :  { %v2192_v7 = vsel %vm1287_vm6, %v3150_v3, %v2169_v12 }
 0x10d   :  { %2388 = vmatmul.mubr.bf16.gmra.mxu0 %v5105_v20 }
 0x10e   :  { %2395 = vmatprep.mubr.bf16.mxu0 %v2192_v7  ;;  %v2171_v16 = vpop.permute.xlu0 %2170 }
 0x10f   :  { %v2196_v40 = vsel %vm1287_vm6, %v3151_v51, %v2171_v16 }
 0x113   :  { %v2173_v63 = vpop.permute.xlu1 %2172 }
 0x114   :  { %v2200_v22 = vsel %vm1287_vm6, %v3152_v33, %v2173_v63 }
 0x115   :  { %2396 = vmatmul.mubr.bf16.gmra.mxu0 %v5146_v59 }
 0x116   :  { %2403 = vmatprep.mubr.bf16.mxu0 %v2196_v40 }
 0x118   :  { %v2175_v38 = vpop.permute.xlu0 %2174 }
 0x119   :  { %v2204_v60 = vsel %vm1287_vm6, %v3153_v26, %v2175_v38 }
 0x11d   :  { %2404 = vmatmul.mubr.bf16.gmra.mxu0 %v5171_v11 }
 0x11e   :  { %2411 = vmatprep.mubr.bf16.mxu0 %v2200_v22  ;;  %v2177_v25 = vpop.permute.xlu1 %2176 }
 0x11f   :  { %v2208_v1 = vsel %vm1287_vm6, %v3154_v31, %v2177_v25 }
 0x125   :  { %2412 = vmatmul.mubr.bf16.gmra.mxu0 %v5198_v56 }
 0x126   :  { %2419 = vmatprep.mubr.bf16.mxu0 %v2204_v60 }
 0x12d   :  { %2420 = vmatmul.mubr.bf16.gmra.mxu0 %v1346_v10 }
 0x12e   :  { %2427 = vmatprep.mubr.bf16.mxu0 %v2208_v1 }
 0x135   :  { %2428 = vmatmul.mubr.bf16.gmra.mxu0 %v1350_v62 }
 0x14e   :  { %v3364_v29 = vpop.f32.mrf.mxu1 }
 0x150   :  { %v3365_v61 = vpop.f32.mrf.mxu1 }
 0x151   :  { %v3366_v36 = vadd.f32 %v3365_v61, %v3364_v29 }
 0x152   :  { %v3367_v58 = vpop.f32.mrf.mxu1 }
 0x153   :  { %1963 = vrot.lane.b32.xlu0 %v3366_v36, %s3727_s11 }
 0x154   :  { %v3368_v9 = vpop.f32.mrf.mxu1 }
 0x155   :  { %v3369_v30 = vadd.f32 %v3368_v9, %v3367_v58 }
 0x156   :  { %v3370_v52 = vpop.f32.mrf.mxu1 }
 0x157   :  { %1965 = vrot.lane.b32.xlu1 %v3369_v30, %s3727_s11 }
 0x158   :  { %v3371_v50 = vpop.f32.mrf.mxu1 }
 0x159   :  { %v3372_v49 = vadd.f32 %v3371_v50, %v3370_v52 }
 0x15a   :  { %v3373_v54 = vpop.f32.mrf.mxu1 }
 0x15b   :  { %1967 = vrot.lane.b32.xlu0 %v3372_v49, %s3727_s11 }
 0x15c   :  { %v3374_v39 = vpop.f32.mrf.mxu1 }
 0x15d   :  { %v3375_v42 = vadd.f32 %v3374_v39, %v3373_v54 }
 0x15e   :  { %v3376_v19 = vpop.f32.mrf.mxu1 }
 0x15f   :  { %1969 = vrot.lane.b32.xlu1 %v3375_v42, %s3727_s11 }
 0x160   :  { %v3377_v3 = vpop.f32.mrf.mxu1 }
 0x161   :  { %v3378_v51 = vadd.f32 %v3377_v3, %v3376_v19 }
 0x162   :  { %v3379_v33 = vpop.f32.mrf.mxu1 }
 0x163   :  { %1971 = vrot.lane.b32.xlu0 %v3378_v51, %s3727_s11 }
 0x164   :  { %v3380_v26 = vpop.f32.mrf.mxu1 }
 0x165   :  { %v3381_v31 = vadd.f32 %v3380_v26, %v3379_v33 }
 0x166   :  { %v3382_v55 = vpop.f32.mrf.mxu1 }
 0x167   :  { %1973 = vrot.lane.b32.xlu1 %v3381_v31, %s3727_s11  ;;  %v5284_v20 = vpop.f32.mrf.mxu0 }
 0x168   :  { %v3383_v24 = vpop.f32.mrf.mxu1 }
 0x169   :  { %v3384_v59 = vadd.f32 %v3383_v24, %v3382_v55  ;;  %v5286_v11 = vpop.f32.mrf.mxu0 }
 0x16a   :  { %v3385_v56 = vpop.f32.mrf.mxu1 }
 0x16b   :  { %1975 = vrot.lane.b32.xlu0 %v3384_v59, %s3727_s11  ;;  %v5289_v46 = vpop.f32.mrf.mxu0 }
 0x16c   :  { %v3386_v45 = vpop.f32.mrf.mxu1 }
 0x16d   :  { %v3387_v15 = vadd.f32 %v3386_v45, %v3385_v56  ;;  %v5291_v35 = vpop.f32.mrf.mxu0 }
 0x16e   :  { %v3388_v53 = vpop.f32.mrf.mxu1 }
 0x16f   :  { %1977 = vrot.lane.b32.xlu1 %v3387_v15, %s3727_s11 }
 0x170   :  { %v3389_v6 = vpop.f32.mrf.mxu1 }
 0x171   :  { %v3390_v14 = vadd.f32 %v3389_v6, %v3388_v53  ;;  %v5294_v34 = vpop.f32.mrf.mxu0 }
 0x172   :  { %v3391_v37 = vpop.f32.mrf.mxu1 }
 0x173   :  { %1979 = vrot.lane.b32.xlu0 %v3390_v14, %s3727_s11  ;;  %v5297_v10 = vpop.f32.mrf.mxu0 }
 0x174   :  { %v3392_v23 = vpop.f32.mrf.mxu1 }
 0x175   :  { %v3393_v43 = vadd.f32 %v3392_v23, %v3391_v37  ;;  %v5299_v41 = vpop.f32.mrf.mxu0 }
 0x176   :  { %v3394_v21 = vpop.f32.mrf.mxu1 }
 0x177   :  { %1981 = vrot.lane.b32.xlu1 %v3393_v43, %s3727_s11  ;;  %v5302_v47 = vpop.f32.mrf.mxu0 }
 0x178   :  { %v3395_v17 = vpop.f32.mrf.mxu1 }
 0x179   :  { %v3396_v2 = vadd.f32 %v3395_v17, %v3394_v21 }
 0x17a   :  { %v3397_v27 = vpop.f32.mrf.mxu1 }
 0x17b   :  { %1983 = vrot.lane.b32.xlu0 %v3396_v2, %s3727_s11 }
 0x17c   :  { %v3398_v62 = vpop.f32.mrf.mxu1 }
 0x17d   :  { %v5305_v0 = vpop.f32.mrf.mxu0  ;;  %v3399_v28 = vadd.f32 %v3398_v62, %v3397_v27 }
 0x17e   :  { %v3400_v13 = vpop.f32.mrf.mxu1 }
 0x17f   :  { %v5307_v57 = vpop.f32.mrf.mxu0  ;;  %1985 = vrot.lane.b32.xlu1 %v3399_v28, %s3727_s11 }
 0x180   :  { %v3401_v48 = vpop.f32.mrf.mxu1 }
 0x181   :  { %v5310_v5 = vpop.f32.mrf.mxu0  ;;  %v3402_v8 = vadd.f32 %v3401_v48, %v3400_v13 }
 0x182   :  { %v3403_v32 = vpop.f32.mrf.mxu1 }
 0x183   :  { %1987 = vrot.lane.b32.xlu0 %v3402_v8, %s3727_s11  ;;  %v5313_v18 = vpop.f32.mrf.mxu0 }
 0x184   :  { %v3404_v4 = vpop.f32.mrf.mxu1 }
 0x185   :  { %v3405_v44 = vadd.f32 %v3404_v4, %v3403_v32 }
 0x186   :  { %v3406_v12 = vpop.f32.mrf.mxu1 }
 0x187   :  { %1989 = vrot.lane.b32.xlu1 %v3405_v44, %s3727_s11 }
 0x188   :  { %v5316_v7 = vpop.f32.mrf.mxu0  ;;  %v3407_v16 = vpop.f32.mrf.mxu1 }
 0x189   :  { %v3408_v40 = vadd.f32 %v3407_v16, %v3406_v12 }
 0x18a   :  { %v5318_v63 = vpop.f32.mrf.mxu0  ;;  %v3409_v22 = vpop.f32.mrf.mxu1 }
 0x18b   :  { %1991 = vrot.lane.b32.xlu0 %v3408_v40, %s3727_s11 }
 0x18c   :  { %v5321_v38 = vpop.f32.mrf.mxu0  ;;  %v3410_v60 = vpop.f32.mrf.mxu1 }
 0x18d   :  { %v3411_v25 = vadd.f32 %v3410_v60, %v3409_v22 }
 0x18e   :  { %v3492_v1 = vpop.f32.mrf.mxu1  ;;  %v5323_v29 = vpop.f32.mrf.mxu0 }
 0x18f   :  { %1993 = vrot.lane.b32.xlu1 %v3411_v25, %s3727_s11 }
 0x190   :  { %v3493_v61 = vpop.f32.mrf.mxu1 }
 0x191   :  { %v3494_v36 = vadd.f32 %v3493_v61, %v3492_v1 }
 0x192   :  { %v3495_v58 = vpop.f32.mrf.mxu1 }
 0x193   :  { %v5326_v9 = vpop.f32.mrf.mxu0  ;;  %2750 = vrot.lane.b32.xlu0 %v3494_v36, %s3727_s11 }
 0x194   :  { %v3496_v30 = vpop.f32.mrf.mxu1 }
 0x195   :  { %v5329_v52 = vpop.f32.mrf.mxu0  ;;  %v3497_v50 = vadd.f32 %v3496_v30, %v3495_v58 }
 0x196   :  { %v3498_v49 = vpop.f32.mrf.mxu1 }
 0x197   :  { %v5331_v54 = vpop.f32.mrf.mxu0  ;;  %2752 = vrot.lane.b32.xlu1 %v3497_v50, %s3727_s11 }
 0x198   :  { %v3499_v39 = vpop.f32.mrf.mxu1 }
 0x199   :  { %v3500_v42 = vadd.f32 %v3499_v39, %v3498_v49  ;;  %v5334_v19 = vpop.f32.mrf.mxu0 }
 0x19a   :  { %v3501_v3 = vpop.f32.mrf.mxu1 }
 0x19b   :  { %2754 = vrot.lane.b32.xlu0 %v3500_v42, %s3727_s11 }
 0x19c   :  { %v3502_v51 = vpop.f32.mrf.mxu1 }
 0x19d   :  { %v3503_v33 = vadd.f32 %v3502_v51, %v3501_v3  ;;  %v3302_v3 = vadd.f32 %v5286_v11, %v5284_v20  ;;  %v3305_v20 = vadd.f32 %v5291_v35, %v5289_v46 }
 0x19e   :  { %v5337_v26 = vpop.f32.mrf.mxu0  ;;  %v3504_v31 = vpop.f32.mrf.mxu1 }
 0x19f   :  { %2756 = vrot.lane.b32.xlu1 %v3503_v33, %s3727_s11  ;;  %v5378_v33 = vld [vmem:[%s5630_s2] ss:$0 sm:$0xff] }
 0x1a0   :  { %v5340_v55 = vpop.f32.mrf.mxu0  ;;  %v3505_v24 = vpop.f32.mrf.mxu1 }
 0x1a1   :  { %v3506_v59 = vadd.f32 %v3505_v24, %v3504_v31 }
 0x1a2   :  { %v5342_v56 = vpop.f32.mrf.mxu0  ;;  %v3507_v45 = vpop.f32.mrf.mxu1 }
 0x1a3   :  { %2758 = vrot.lane.b32.xlu0 %v3506_v59, %s3727_s11 }
 0x1a4   :  { %v3508_v15 = vpop.f32.mrf.mxu1  ;;  %v5345_v6 = vpop.f32.mrf.mxu0 }
 0x1a5   :  { %v3509_v53 = vadd.f32 %v3508_v15, %v3507_v45 }
 0x1a6   :  { %v3510_v14 = vpop.f32.mrf.mxu1 }
 0x1a7   :  { %2760 = vrot.lane.b32.xlu1 %v3509_v53, %s3727_s11 }
 0x1a8   :  { %v3511_v37 = vpop.f32.mrf.mxu1 }
 0x1a9   :  { %v3512_v23 = vadd.f32 %v3511_v37, %v3510_v14 }
 0x1aa   :  { %v5348_v43 = vpop.f32.mrf.mxu0  ;;  %v3513_v21 = vpop.f32.mrf.mxu1 }
 0x1ab   :  { %2762 = vrot.lane.b32.xlu0 %v3512_v23, %s3727_s11 }
 0x1ac   :  { %v5351_v17 = vpop.f32.mrf.mxu0  ;;  %v3514_v2 = vpop.f32.mrf.mxu1 }
 0x1ad   :  { %v3515_v27 = vadd.f32 %v3514_v2, %v3513_v21 }
 0x1ae   :  { %v5353_v62 = vpop.f32.mrf.mxu0  ;;  %v3516_v28 = vpop.f32.mrf.mxu1 }
 0x1af   :  { %2764 = vrot.lane.b32.xlu1 %v3515_v27, %s3727_s11 }
 0x1b0   :  { %v3517_v13 = vpop.f32.mrf.mxu1  ;;  %v5356_v48 = vpop.f32.mrf.mxu0 }
 0x1b1   :  { %v3518_v8 = vadd.f32 %v3517_v13, %v3516_v28  ;;  %v3308_v28 = vadd.f32 %v5297_v10, %v5294_v34 }
 0x1b2   :  { %v3519_v32 = vpop.f32.mrf.mxu1 }
 0x1b3   :  { %2766 = vrot.lane.b32.xlu0 %v3518_v8, %s3727_s11 }
 0x1b4   :  { %v3520_v4 = vpop.f32.mrf.mxu1 }
 0x1b5   :  { %v5359_v44 = vpop.f32.mrf.mxu0  ;;  %v3521_v12 = vadd.f32 %v3520_v4, %v3519_v32 }
 0x1b6   :  { %v3522_v16 = vpop.f32.mrf.mxu1 }
 0x1b7   :  { %v5361_v40 = vpop.f32.mrf.mxu0  ;;  %2768 = vrot.lane.b32.xlu1 %v3521_v12, %s3727_s11  ;;  %v3311_v12 = vadd.f32 %v5302_v47, %v5299_v41  ;;  %v3317_v47 = vadd.f32 %v5313_v18, %v5310_v5 }
 0x1b8   :  { %v3523_v22 = vpop.f32.mrf.mxu1 }
 0x1b9   :  { %v5364_v60 = vpop.f32.mrf.mxu0  ;;  %v3524_v25 = vadd.f32 %v3523_v22, %v3522_v16 }
 0x1ba   :  { %v3525_v1 = vpop.f32.mrf.mxu1 }
 0x1bb   :  { %2770 = vrot.lane.b32.xlu0 %v3524_v25, %s3727_s11  ;;  %v5367_v36 = vpop.f32.mrf.mxu0  ;;  %v3314_v25 = vadd.f32 %v5307_v57, %v5305_v0 }
 0x1bc   :  { %v3526_v61 = vpop.f32.mrf.mxu1 }
 0x1bd   :  { %v3527_v58 = vadd.f32 %v3526_v61, %v3525_v1  ;;  %v5370_v49 = vpop.f32.mrf.mxu0 }
 0x1be   :  { %v3528_v30 = vpop.f32.mrf.mxu1 }
 0x1bf   :  { %2772 = vrot.lane.b32.xlu1 %v3527_v58, %s3727_s11  ;;  %v5380_v31 = vpop.f32.mrf.mxu0 }
 0x1c0   :  { %v3529_v50 = vpop.f32.mrf.mxu1 }
 0x1c1   :  { %v3530_v39 = vadd.f32 %v3529_v50, %v3528_v30  ;;  %v5387_v14 = vpop.f32.mrf.mxu0 }
 0x1c2   :  { %v3531_v42 = vpop.f32.mrf.mxu1 }
 0x1c3   :  { %2774 = vrot.lane.b32.xlu0 %v3530_v39, %s3727_s11  ;;  %v5394_v8 = vpop.f32.mrf.mxu0 }
 0x1c4   :  { %v3532_v51 = vpop.f32.mrf.mxu1 }
 0x1c5   :  { %v3533_v24 = vadd.f32 %v3532_v51, %v3531_v42  ;;  %v1964_v59 = vpop.permute.xlu0 %1963  ;;  %v5401_v16 = vpop.f32.mrf.mxu0 }
 0x1c6   :  { %v2011_v45 = vsel %vm1287_vm6, %v3302_v3, %v1964_v59  ;;  %v3534_v15 = vpop.f32.mrf.mxu1 }
 0x1c7   :  { %v2034_v53 = vadd.f32 %v5378_v33, %v2011_v45  ;;  %2776 = vrot.lane.b32.xlu1 %v3533_v24, %s3727_s11  ;;  %v5407_v1 = vpop.f32.mrf.mxu0  ;;  %v3320_v24 = vadd.f32 %v5318_v63, %v5316_v7 }
 0x1c8   :  { %v3535_v11 = vpop.f32.mrf.mxu1 }
 0x1c9   :  { %3629 = vtanh.f32 %v2034_v53  ;;  %v3536_v37 = vadd.f32 %v3535_v11, %v3534_v15  ;;  %v1966_v23 = vpop.permute.xlu1 %1965  ;;  %v5413_v39 = vpop.f32.mrf.mxu0 }
 0x1ca   :  { %v2012_v21 = vsel %vm1287_vm6, %v3305_v20, %v1966_v23  ;;  %v3537_v2 = vpop.f32.mrf.mxu1  ;;  %v3323_v20 = vadd.f32 %v5323_v29, %v5321_v38 }
 0x1cb   :  { %v2035_v27 = vadd.f32 %v5378_v33, %v2012_v21  ;;  %2778 = vrot.lane.b32.xlu0 %v3536_v37, %s3727_s11  ;;  %v5422_v59 = vpop.f32.mrf.mxu0 }
 0x1cc   :  { %v3538_v13 = vpop.f32.mrf.mxu1 }
 0x1cd   :  { %3631 = vtanh.f32 %v2035_v27  ;;  %v3539_v46 = vadd.f32 %v3538_v13, %v3537_v2  ;;  %v1968_v35 = vpop.permute.xlu0 %1967  ;;  %v5431_v11 = vpop.f32.mrf.mxu0  ;;  %v3326_v2 = vadd.f32 %v5329_v52, %v5326_v9 }
 0x1ce   :  { %v2013_v32 = vsel %vm1287_vm6, %v3308_v28, %v1968_v35  ;;  %v3329_v35 = vadd.f32 %v5334_v19, %v5331_v54 }
 0x1cf   :  { %v2036_v4 = vadd.f32 %v5378_v33, %v2013_v32  ;;  %2780 = vrot.lane.b32.xlu1 %v3539_v46, %s3727_s11  ;;  %v5440_v27 = vpop.f32.mrf.mxu0 }
 0x1d1   :  { %3633 = vtanh.f32 %v2036_v4  ;;  %v1970_v22 = vpop.permute.xlu1 %1969  ;;  %v5449_v32 = vpop.f32.mrf.mxu0 }
 0x1d2   :  { %v2014_v34 = vsel %vm1287_vm6, %v3311_v12, %v1970_v22 }
 0x1d3   :  { %v2037_v10 = vadd.f32 %v5378_v33, %v2014_v34  ;;  %v3332_v34 = vadd.f32 %v5340_v55, %v5337_v26 }
 0x1d5   :  { %3635 = vtanh.f32 %v2037_v10  ;;  %v1972_v61 = vpop.permute.xlu0 %1971  ;;  %v5458_v10 = vpop.f32.mrf.mxu0 }
 0x1d6   :  { %v3630_v58 = vpop.eup %3629  ;;  %v2015_v30 = vsel %vm1287_vm6, %v3314_v25, %v1972_v61 }
 0x1d7   :  { %v2066_v50 = vpack.c.bf16 %v3630_v58, %v3630_v58  ;;  %v2038_v41 = vadd.f32 %v5378_v33, %v2015_v30  ;;  %v3335_v30 = vadd.f32 %v5345_v6, %v5342_v56 }
 0x1d9   :  { %2082 = vst [vmem:[%s5631_s3] sm:$0xf] %v2066_v50  ;;  %3637 = vtanh.f32 %v2038_v41  ;;  %v1974_v0 = vpop.permute.xlu1 %1973  ;;  %v5467_v50 = vpop.f32.mrf.mxu0 }
 0x1da   :  { %v3632_v57 = vpop.eup %3631  ;;  %v2016_v42 = vsel %vm1287_vm6, %v3317_v47, %v1974_v0 }
 0x1db   :  { %v2067_v3 = vpack.c.bf16 %v3632_v57, %v3632_v57  ;;  %v2039_v51 = vadd.f32 %v5378_v33, %v2016_v42  ;;  %v3338_v57 = vadd.f32 %v5351_v17, %v5348_v43  ;;  %v5476_v42 = vpop.f32.mrf.mxu0 }
 0x1dd   :  { %2083 = vst [vmem:[%s5631_s3 + $0x8] sm:$0xf] %v2067_v3  ;;  %3639 = vtanh.f32 %v2039_v51  ;;  %v1976_v5 = vpop.permute.xlu0 %1975 }
 0x1de   :  { %v3634_v18 = vpop.eup %3633  ;;  %v2017_v45 = vsel %vm1287_vm6, %v3320_v24, %v1976_v5  ;;  %v3341_v5 = vadd.f32 %v5356_v48, %v5353_v62 }
 0x1df   :  { %v2068_v15 = vpack.c.bf16 %v3634_v18, %v3634_v18  ;;  %v2040_v53 = vadd.f32 %v5378_v33, %v2017_v45  ;;  %v5485_v18 = vpop.f32.mrf.mxu0 }
 0x1e1   :  { %2084 = vst [vmem:[%s5631_s3 + $0x10] sm:$0xf] %v2068_v15  ;;  %3641 = vtanh.f32 %v2040_v53  ;;  %v1978_v7 = vpop.permute.xlu1 %1977 }
 0x1e2   :  { %v3636_v63 = vpop.eup %3635  ;;  %v2018_v37 = vsel %vm1287_vm6, %v3323_v20, %v1978_v7  ;;  %v3344_v20 = vadd.f32 %v5361_v40, %v5359_v44  ;;  %v5494_v7 = vpop.f32.mrf.mxu0 }
 0x1e3   :  { %v2069_v23 = vpack.c.bf16 %v3636_v63, %v3636_v63  ;;  %v2041_v21 = vadd.f32 %v5378_v33, %v2018_v37 }
 0x1e5   :  { %2085 = vst [vmem:[%s5631_s3 + $0x18] sm:$0xf] %v2069_v23  ;;  %3643 = vtanh.f32 %v2041_v21  ;;  %v1980_v38 = vpop.permute.xlu0 %1979  ;;  %v3347_v21 = vadd.f32 %v5367_v36, %v5364_v60 }
 0x1e6   :  { %v3638_v29 = vpop.eup %3637  ;;  %v2019_v28 = vsel %vm1287_vm6, %v3326_v2, %v1980_v38  ;;  %v5503_v2 = vpop.f32.mrf.mxu0 }
 0x1e7   :  { %v2070_v13 = vpack.c.bf16 %v3638_v29, %v3638_v29  ;;  %v2042_v46 = vadd.f32 %v5378_v33, %v2019_v28 }
 0x1e9   :  { %2086 = vst [vmem:[%s5631_s3 + $0x20] sm:$0xf] %v2070_v13  ;;  %3645 = vtanh.f32 %v2042_v46  ;;  %v1982_v9 = vpop.permute.xlu1 %1981  ;;  %v3430_v13 = vadd.f32 %v5380_v31, %v5370_v49  ;;  %v5512_v46 = vpop.f32.mrf.mxu0 }
 0x1ea   :  { %v3640_v52 = vpop.eup %3639  ;;  %v2020_v4 = vsel %vm1287_vm6, %v3329_v35, %v1982_v9 }
 0x1eb   :  { %v2071_v12 = vpack.c.bf16 %v3640_v52, %v3640_v52  ;;  %v2043_v22 = vadd.f32 %v5378_v33, %v2020_v4  ;;  %v3433_v4 = vadd.f32 %v5394_v8, %v5387_v14 }
 0x1ed   :  { %2087 = vst [vmem:[%s5631_s3 + $0x28] sm:$0xf] %v2071_v12  ;;  %3647 = vtanh.f32 %v2043_v22  ;;  %v1984_v54 = vpop.permute.xlu0 %1983  ;;  %v5521_v12 = vpop.f32.mrf.mxu0 }
 0x1ee   :  { %v3642_v19 = vpop.eup %3641  ;;  %v2021_v25 = vsel %vm1287_vm6, %v3332_v34, %v1984_v54 }
 0x1ef   :  { %v2072_v61 = vpack.c.bf16 %v3642_v19, %v3642_v19  ;;  %v2044_v58 = vadd.f32 %v5378_v33, %v2021_v25  ;;  %v3436_v19 = vadd.f32 %v5407_v1, %v5401_v16  ;;  %v3456_v25 = vpop.f32.mrf.mxu0 }
 0x1f1   :  { %2088 = vst [vmem:[%s5631_s3 + $0x30] sm:$0xf] %v2072_v61  ;;  %3649 = vtanh.f32 %v2044_v58  ;;  %v1986_v26 = vpop.permute.xlu1 %1985 }
 0x1f2   :  { %v3644_v55 = vpop.eup %3643  ;;  %v2022_v41 = vsel %vm1287_vm6, %v3335_v30, %v1986_v26  ;;  %v3439_v26 = vadd.f32 %v5422_v59, %v5413_v39 }
 0x1f3   :  { %v2073_v47 = vpack.c.bf16 %v3644_v55, %v3644_v55  ;;  %v2045_v0 = vadd.f32 %v5378_v33, %v2022_v41  ;;  %v3458_v55 = vpop.f32.mrf.mxu0 }
 0x1f5   :  { %2089 = vst [vmem:[%s5631_s3 + $0x38] sm:$0xf] %v2073_v47  ;;  %3651 = vtanh.f32 %v2045_v0  ;;  %v1988_v56 = vpop.permute.xlu0 %1987 }
 0x1f6   :  { %v3646_v6 = vpop.eup %3645  ;;  %v2023_v3 = vsel %vm1287_vm6, %v3338_v57, %v1988_v56  ;;  %v3442_v57 = vadd.f32 %v5440_v27, %v5431_v11  ;;  %v3459_v56 = vpop.f32.mrf.mxu0 }
 0x1f7   :  { %v2074_v51 = vpack.c.bf16 %v3646_v6, %v3646_v6  ;;  %v2046_v24 = vadd.f32 %v5378_v33, %v2023_v3 }
 0x1f9   :  { %2090 = vst [vmem:[%s5631_s3 + $0x40] sm:$0xf] %v2074_v51  ;;  %3653 = vtanh.f32 %v2046_v24  ;;  %v1990_v43 = vpop.permute.xlu1 %1989  ;;  %v3445_v24 = vadd.f32 %v5458_v10, %v5449_v32 }
 0x1fa   :  { %v3648_v17 = vpop.eup %3647  ;;  %v2024_v45 = vsel %vm1287_vm6, %v3341_v5, %v1990_v43  ;;  %v3461_v5 = vpop.f32.mrf.mxu0 }
 0x1fb   :  { %v2075_v15 = vpack.c.bf16 %v3648_v17, %v3648_v17  ;;  %v2047_v53 = vadd.f32 %v5378_v33, %v2024_v45 }
 0x1fd   :  { %2091 = vst [vmem:[%s5631_s3 + $0x48] sm:$0xf] %v2075_v15  ;;  %3655 = vtanh.f32 %v2047_v53  ;;  %v1992_v62 = vpop.permute.xlu0 %1991  ;;  %v3448_v15 = vadd.f32 %v5476_v42, %v5467_v50  ;;  %v3462_v53 = vpop.f32.mrf.mxu0 }
 0x1fe   :  { %v3650_v48 = vpop.eup %3649  ;;  %v2025_v63 = vsel %vm1287_vm6, %v3344_v20, %v1992_v62 }
 0x1ff   :  { %v2076_v37 = vpack.c.bf16 %v3650_v48, %v3650_v48  ;;  %v2048_v23 = vadd.f32 %v5378_v33, %v2025_v63  ;;  %v3451_v63 = vadd.f32 %v5494_v7, %v5485_v18 }
 0x201   :  { %2092 = vst [vmem:[%s5631_s3 + $0x50] sm:$0xf] %v2076_v37  ;;  %3657 = vtanh.f32 %v2048_v23  ;;  %v1994_v44 = vpop.permute.xlu1 %1993  ;;  %v3464_v37 = vpop.f32.mrf.mxu0 }
 0x202   :  { %v3652_v40 = vpop.eup %3651  ;;  %v2026_v38 = vsel %vm1287_vm6, %v3347_v21, %v1994_v44 }
 0x203   :  { %v2077_v29 = vpack.c.bf16 %v3652_v40, %v3652_v40  ;;  %v2049_v28 = vadd.f32 %v5378_v33, %v2026_v38  ;;  %v3454_v40 = vadd.f32 %v5512_v46, %v5503_v2  ;;  %v3465_v38 = vpop.f32.mrf.mxu0 }
 0x205   :  { %2093 = vst [vmem:[%s5631_s3 + $0x58] sm:$0xf] %v2077_v29  ;;  %3659 = vtanh.f32 %v2049_v28  ;;  %v2751_v60 = vpop.permute.xlu0 %2750 }
 0x206   :  { %v3654_v36 = vpop.eup %3653  ;;  %v2798_v35 = vsel %vm1287_vm6, %v3430_v13, %v2751_v60  ;;  %v3457_v60 = vadd.f32 %v3456_v25, %v5521_v12 }
 0x207   :  { %v2078_v9 = vpack.c.bf16 %v3654_v36, %v3654_v36  ;;  %v2821_v52 = vadd.f32 %v5378_v33, %v2798_v35  ;;  %v3467_v36 = vpop.f32.mrf.mxu0 }
 0x209   :  { %2094 = vst [vmem:[%s5631_s3 + $0x60] sm:$0xf] %v2078_v9  ;;  %3661 = vtanh.f32 %v2821_v52  ;;  %v2753_v49 = vpop.permute.xlu1 %2752 }
 0x20a   :  { %v3656_v31 = vpop.eup %3655  ;;  %v2799_v22 = vsel %vm1287_vm6, %v3433_v4, %v2753_v49  ;;  %v3460_v4 = vadd.f32 %v3459_v56, %v3458_v55  ;;  %v3468_v49 = vpop.f32.mrf.mxu0 }
 0x20b   :  { %v2079_v34 = vpack.c.bf16 %v3656_v31, %v3656_v31  ;;  %v2822_v54 = vadd.f32 %v5378_v33, %v2799_v22 }
 0x20c   :  { %v3470_v25 = vpop.f32.mrf.mxu0 }
 0x20d   :  { %2095 = vst [vmem:[%s5631_s3 + $0x68] sm:$0xf] %v2079_v34  ;;  %3663 = vtanh.f32 %v2822_v54  ;;  %v2755_v14 = vpop.permute.xlu0 %2754 }
 0x20e   :  { %v3658_v8 = vpop.eup %3657  ;;  %v2800_v61 = vsel %vm1287_vm6, %v3436_v19, %v2755_v14  ;;  %v3463_v19 = vadd.f32 %v3462_v53, %v3461_v5  ;;  %v3471_v55 = vpop.f32.mrf.mxu0 }
 0x20f   :  { %v2080_v58 = vpack.c.bf16 %v3658_v8, %v3658_v8  ;;  %v2823_v30 = vadd.f32 %v5378_v33, %v2800_v61 }
 0x210   :  { %v3473_v56 = vpop.f32.mrf.mxu0 }
 0x211   :  { %2096 = vst [vmem:[%s5631_s3 + $0x70] sm:$0xf] %v2080_v58  ;;  %3665 = vtanh.f32 %v2823_v30  ;;  %v2757_v16 = vpop.permute.xlu1 %2756 }
 0x212   :  { %v3660_v1 = vpop.eup %3659  ;;  %v2801_v41 = vsel %vm1287_vm6, %v3439_v26, %v2757_v16  ;;  %v3466_v26 = vadd.f32 %v3465_v38, %v3464_v37  ;;  %v3474_v5 = vpop.f32.mrf.mxu0 }
 0x213   :  { %v2081_v47 = vpack.c.bf16 %v3660_v1, %v3660_v1  ;;  %v2824_v0 = vadd.f32 %v5378_v33, %v2801_v41 }
 0x215   :  { %2097 = vst [vmem:[%s5631_s3 + $0x78] sm:$0xf] %v2081_v47  ;;  %3667 = vtanh.f32 %v2824_v0  ;;  %v2759_v39 = vpop.permute.xlu0 %2758 }
 0x216   :  { %v3662_v59 = vpop.eup %3661  ;;  %v2802_v6 = vsel %vm1287_vm6, %v3442_v57, %v2759_v39  ;;  %v3469_v57 = vadd.f32 %v3468_v49, %v3467_v36 }
 0x217   :  { %v2853_v3 = vpack.c.bf16 %v3662_v59, %v3662_v59  ;;  %v2825_v51 = vadd.f32 %v5378_v33, %v2802_v6 }
 0x219   :  { %3268 = vst [vmem:[%s5631_s3 + $0x4] sm:$0xf] %v2853_v3  ;;  %3669 = vtanh.f32 %v2825_v51  ;;  %v2761_v11 = vpop.permute.xlu1 %2760 }
 0x21a   :  { %v3664_v27 = vpop.eup %3663  ;;  %v2803_v43 = vsel %vm1287_vm6, %v3445_v24, %v2761_v11  ;;  %v3472_v24 = vadd.f32 %v3471_v55, %v3470_v25 }
 0x21b   :  { %v2854_v17 = vpack.c.bf16 %v3664_v27, %v3664_v27  ;;  %v2826_v45 = vadd.f32 %v5378_v33, %v2803_v43 }
 0x21d   :  { %3269 = vst [vmem:[%s5631_s3 + $0xc] sm:$0xf] %v2854_v17  ;;  %3671 = vtanh.f32 %v2826_v45  ;;  %v2763_v32 = vpop.permute.xlu0 %2762 }
 0x21e   :  { %v3666_v10 = vpop.eup %3665  ;;  %v2804_v20 = vsel %vm1287_vm6, %v3448_v15, %v2763_v32  ;;  %v3475_v15 = vadd.f32 %v3474_v5, %v3473_v56 }
 0x21f   :  { %v2855_v62 = vpack.c.bf16 %v3666_v10, %v3666_v10  ;;  %v2827_v48 = vadd.f32 %v5378_v33, %v2804_v20 }
 0x221   :  { %3270 = vst [vmem:[%s5631_s3 + $0x14] sm:$0xf] %v2855_v62  ;;  %3673 = vtanh.f32 %v2827_v48  ;;  %v2765_v50 = vpop.permute.xlu1 %2764 }
 0x222   :  { %v3668_v42 = vpop.eup %3667  ;;  %v2805_v23 = vsel %vm1287_vm6, %v3451_v63, %v2765_v50 }
 0x223   :  { %v2856_v21 = vpack.c.bf16 %v3668_v42, %v3668_v42  ;;  %v2828_v44 = vadd.f32 %v5378_v33, %v2805_v23 }
 0x225   :  { %3271 = vst [vmem:[%s5631_s3 + $0x1c] sm:$0xf] %v2856_v21  ;;  %3675 = vtanh.f32 %v2828_v44  ;;  %v2767_v18 = vpop.permute.xlu0 %2766 }
 0x226   :  { %v3670_v7 = vpop.eup %3669  ;;  %v2806_v29 = vsel %vm1287_vm6, %v3454_v40, %v2767_v18 }
 0x227   :  { %v2857_v28 = vpack.c.bf16 %v3670_v7, %v3670_v7  ;;  %v2829_v13 = vadd.f32 %v5378_v33, %v2806_v29 }
 0x229   :  { %3272 = vst [vmem:[%s5631_s3 + $0x24] sm:$0xf] %v2857_v28  ;;  %3677 = vtanh.f32 %v2829_v13  ;;  %v2769_v2 = vpop.permute.xlu1 %2768 }
 0x22a   :  { %v3672_v46 = vpop.eup %3671  ;;  %v2807_v35 = vsel %vm1287_vm6, %v3457_v60, %v2769_v2 }
 0x22b   :  { %v2858_v9 = vpack.c.bf16 %v3672_v46, %v3672_v46  ;;  %v2830_v52 = vadd.f32 %v5378_v33, %v2807_v35 }
 0x22d   :  { %3273 = vst [vmem:[%s5631_s3 + $0x2c] sm:$0xf] %v2858_v9  ;;  %3679 = vtanh.f32 %v2830_v52  ;;  %v2771_v12 = vpop.permute.xlu0 %2770 }
 0x22e   :  { %v3674_v31 = vpop.eup %3673  ;;  %v2808_v22 = vsel %vm1287_vm6, %v3460_v4, %v2771_v12 }
 0x22f   :  { %v2859_v34 = vpack.c.bf16 %v3674_v31, %v3674_v31  ;;  %v2831_v54 = vadd.f32 %v5378_v33, %v2808_v22 }
 0x231   :  { %3274 = vst [vmem:[%s5631_s3 + $0x34] sm:$0xf] %v2859_v34  ;;  %3681 = vtanh.f32 %v2831_v54  ;;  %v2773_v14 = vpop.permute.xlu1 %2772 }
 0x232   :  { %v3676_v8 = vpop.eup %3675  ;;  %v2809_v61 = vsel %vm1287_vm6, %v3463_v19, %v2773_v14 }
 0x233   :  { %v2860_v58 = vpack.c.bf16 %v3676_v8, %v3676_v8  ;;  %v2832_v30 = vadd.f32 %v5378_v33, %v2809_v61 }
 0x235   :  { %3275 = vst [vmem:[%s5631_s3 + $0x3c] sm:$0xf] %v2860_v58  ;;  %3683 = vtanh.f32 %v2832_v30  ;;  %v2775_v16 = vpop.permute.xlu0 %2774 }
 0x236   :  { %v3678_v1 = vpop.eup %3677  ;;  %v2810_v41 = vsel %vm1287_vm6, %v3466_v26, %v2775_v16 }
 0x237   :  { %v2861_v47 = vpack.c.bf16 %v3678_v1, %v3678_v1  ;;  %v2833_v0 = vadd.f32 %v5378_v33, %v2810_v41 }
 0x239   :  { %3276 = vst [vmem:[%s5631_s3 + $0x44] sm:$0xf] %v2861_v47  ;;  %3685 = vtanh.f32 %v2833_v0  ;;  %v2777_v39 = vpop.permute.xlu1 %2776 }
 0x23a   :  { %v3680_v59 = vpop.eup %3679  ;;  %v2811_v6 = vsel %vm1287_vm6, %v3469_v57, %v2777_v39 }
 0x23b   :  { %v2862_v3 = vpack.c.bf16 %v3680_v59, %v3680_v59  ;;  %v2834_v51 = vadd.f32 %v5378_v33, %v2811_v6 }
 0x23d   :  { %3277 = vst [vmem:[%s5631_s3 + $0x4c] sm:$0xf] %v2862_v3  ;;  %3687 = vtanh.f32 %v2834_v51  ;;  %v2779_v11 = vpop.permute.xlu0 %2778 }
 0x23e   :  { %v3682_v27 = vpop.eup %3681  ;;  %v2812_v43 = vsel %vm1287_vm6, %v3472_v24, %v2779_v11 }
 0x23f   :  { %v2863_v17 = vpack.c.bf16 %v3682_v27, %v3682_v27  ;;  %v2835_v45 = vadd.f32 %v5378_v33, %v2812_v43 }
 0x241   :  { %3278 = vst [vmem:[%s5631_s3 + $0x54] sm:$0xf] %v2863_v17  ;;  %3689 = vtanh.f32 %v2835_v45  ;;  %v2781_v53 = vpop.permute.xlu1 %2780 }
 0x242   :  { %v3684_v32 = vpop.eup %3683  ;;  %v2813_v10 = vsel %vm1287_vm6, %v3475_v15, %v2781_v53 }
 0x243   :  { %v2864_v20 = vpack.c.bf16 %v3684_v32, %v3684_v32  ;;  %v2836_v62 = vadd.f32 %v5378_v33, %v2813_v10 }
 0x245   :  { %3279 = vst [vmem:[%s5631_s3 + $0x5c] sm:$0xf] %v2864_v20  ;;  %3691 = vtanh.f32 %v2836_v62 }
 0x246   :  { %v3686_v48 = vpop.eup %3685 }
 0x247   :  { %v2865_v63 = vpack.c.bf16 %v3686_v48, %v3686_v48 }
 0x249   :  { %3280 = vst [vmem:[%s5631_s3 + $0x64] sm:$0xf] %v2865_v63 }
 0x24a   :  { %v3688_v37 = vpop.eup %3687 }
 0x24b   :  { %v2866_v50 = vpack.c.bf16 %v3688_v37, %v3688_v37 }
 0x24d   :  { %3281 = vst [vmem:[%s5631_s3 + $0x6c] sm:$0xf] %v2866_v50 }
 0x24e   :  { %v3690_v42 = vpop.eup %3689 }
 0x24f   :  { %v2867_v23 = vpack.c.bf16 %v3690_v42, %v3690_v42 }
 0x251   :  { %3282 = vst [vmem:[%s5631_s3 + $0x74] sm:$0xf] %v2867_v23 }
 0x252   :  { %v3692_v33 = vpop.eup %3691 }
 0x253   :  { %v2868_v21 = vpack.c.bf16 %v3692_v33, %v3692_v33 }
 0x255   :  { %3283 = vst [vmem:[%s5631_s3 + $0x7c] sm:$0xf] %v2868_v21 }

</bundles_post_ra>
